<compile_context>
chip_gen: v7x
topology: tpu7x:2x2x1
jax: 0.10.0
libtpu: 0.0.40
codegen_flags: <defaults>
</compile_context>

<pallas_src>
import numpy as np

import jax
import jax.numpy as jnp
from jax.experimental import pallas as pl
from jax.experimental.pallas import tpu as pltpu

# Architecture implied by the PyTorch module (28x28 input -> 3x3x128 before
# the hard-coded Linear(3*3*128, ...)): (Hin, Win, Cin, Cout) per conv layer,
# stride=2, padding=2, kernel=3.
CONV_LAYERS = ((28, 28, 1, 8),
               (15, 15, 8, 16),
               (9, 9, 16, 32),
               (6, 6, 32, 64),
               (4, 4, 64, 128))
BN1_C = 16          # BatchNorm2d(16): Conv1 -> BN -> ReLU
BN3_C = 64          # BatchNorm2d(64): Conv3 -> ReLU -> BN
BN_EPS = 1e-5
X_PAD_COLS = 128    # input image lane width after zero padding (28 -> 128)


def _conv_out(n):
    return (n + 2 * 2 - 3) // 2 + 1


def _pad128(n):
    return ((n + 127) // 128) * 128


WO1 = _conv_out(CONV_LAYERS[1][1])   # 9: spatial width at BatchNorm2d(16)
WO3 = _conv_out(CONV_LAYERS[3][1])   # 4: spatial width at BatchNorm2d(64)


def _layer_dims():
    dims = []
    p_in = X_PAD_COLS
    for (hin, win, cin, cout) in CONV_LAYERS:
        ho, wo = _conv_out(hin), _conv_out(win)
        p_out = _pad128(wo * cout)
        dims.append(dict(hin=hin, win=win, cin=cin, cout=cout,
                         ho=ho, wo=wo, p_in=p_in, p_out=p_out))
        p_in = p_out
    return dims


# ----------------------------------------------------------------------------
# The single fused kernel
# ----------------------------------------------------------------------------
def _encoder_kernel(x_ref,
                    m0_ref, m1_ref, m2_ref, m3_ref, m4_ref,
                    r0_ref, r1_ref, r2_ref, r3_ref, r4_ref,
                    bt0_ref, bt2_ref, bt3_ref, bt4_ref,
                    pm1_ref, g1_ref, be1_ref,
                    pm3_ref, g3_ref, be3_ref,
                    s_ref, w1_ref, b1_ref, w2_ref, b2_ref,
                    o_ref):
    relu = lambda t: jnp.maximum(t, 0.0)

    def conv(a_bf16, r_ref, m_ref):
        """Stride-2 3x3 conv: (B*Hin, Pin) bf16 -> (B*Ho, Pout) f32.

        Three 0/1 row-gather matmuls (H tap / stride / zero pad), one 128-
        aligned lane concat, then ONE fat bf16 MXU matmul against the packed
        (3*Pin, Pout) weight matrix with f32 accumulation."""
        rows = [
            jnp.dot(r_ref[ky], a_bf16,
                    preferred_element_type=jnp.float32).astype(jnp.bfloat16)
            for ky in range(3)                         # exact: pure row select
        ]
        rows_cat = jnp.concatenate(rows, axis=1)       # (B*Ho, 3*Pin) bf16
        return jnp.dot(rows_cat, m_ref[...],
                       preferred_element_type=jnp.float32)

    def batchnorm(y, pm_ref, g_ref, be_ref, wo):
        """Training-mode BatchNorm2d over (batch, H, W), one-pass stats.

        Reduce-then-project: per-column sums first (VPU/XLU), then M==1
        channel-projector matmuls.  Stats stay f32 (negligible MXU cost at
        M==1, avoids bf16 cancellation in E[x^2] - E[x]^2)."""
        count = float(y.shape[0] * wo)                 # B * Ho * Wo
        pm = pm_ref[...].astype(jnp.float32)           # 0/1 projector (exact)
        colsum = jnp.sum(y, axis=0, keepdims=True)     # (1, P)
        sqsum = jnp.sum(y * y, axis=0, keepdims=True)  # (1, P)
        mean = jnp.dot(colsum, pm, preferred_element_type=jnp.float32) / count
        ex2 = jnp.dot(sqsum, pm, preferred_element_type=jnp.float32) / count
        var = jnp.maximum(ex2 - mean * mean, 0.0)
        inv = jax.lax.rsqrt(var + BN_EPS)              # EUP
        return (y - mean) * (inv * g_ref[...]) + be_ref[...]

    a = x_ref[...]                                     # (B*28, 128) bf16

    # encoder_cnn
    a = relu(conv(a, r0_ref, m0_ref) + bt0_ref[...]).astype(jnp.bfloat16)
    # Conv1 -> BN -> ReLU.  Bias intentionally skipped: BN's mean subtraction
    # cancels a per-channel bias exactly (zero numerical change).
    a = relu(batchnorm(conv(a, r1_ref, m1_ref),
                       pm1_ref, g1_ref, be1_ref, WO1)).astype(jnp.bfloat16)
    a = relu(conv(a, r2_ref, m2_ref) + bt2_ref[...]).astype(jnp.bfloat16)
    a = relu(conv(a, r3_ref, m3_ref) + bt3_ref[...])             # f32 into BN
    a = batchnorm(a, pm3_ref, g3_ref, be3_ref, WO3).astype(jnp.bfloat16)
    a = relu(conv(a, r4_ref, m4_ref) + bt4_ref[...]).astype(jnp.bfloat16)
    # a: (B*3, 3*128), rows=(b,h), cols=(w,c)

    # encoder_lin: gather each image's three h-rows, lane-concat (128-aligned)
    # into the NCHW-flatten order (folded into w1 at pack time), then ONE
    # matmul for fc1 and one for fc2.
    sel = [
        jnp.dot(s_ref[h], a,
                preferred_element_type=jnp.float32).astype(jnp.bfloat16)
        for h in range(3)                              # exact row selection
    ]
    flat = jnp.concatenate(sel, axis=1)                # (B, 1152) bf16
    z1 = relu(jnp.dot(flat, w1_ref[...],
                      preferred_element_type=jnp.float32) + b1_ref[...])
    z2 = jnp.dot(z1.astype(jnp.bfloat16), w2_ref[...],
                 preferred_element_type=jnp.float32) + b2_ref[...]
    o_ref[...] = z2                                    # (B, encoded_dim) f32


# ----------------------------------------------------------------------------
# One-time operand packing (weight / constant preprocessing, outside the
# per-call hot path).
# ----------------------------------------------------------------------------
def _build_row_select(batch, hin, ho):
    """R[ky, b*Ho+o, b*Hin+h] = 1 iff h == 2*o + ky - 2 and 0 <= h < Hin."""
    r = np.zeros((3, batch * ho, batch * hin), np.float32)
    for ky in range(3):
        for b in range(batch):
            for o in range(ho):
                h = 2 * o + ky - 2
                if 0 <= h < hin:
                    r[ky, b * ho + o, b * hin + h] = 1.0
    return jnp.asarray(r).astype(jnp.bfloat16)         # 0/1: exact in bf16


def _build_m_cat(w, win, wo, p_in, p_out):
    """Fold kx tap selection + stride-2 W subsample + zero padding + conv
    weights + 128-lane padding into one (3*p_in, p_out) bf16 matrix; row block
    ky matches the ky-gathered input rows that are lane-concatenated in-kernel.
    Padded rows/columns are zero."""
    w = np.asarray(w, np.float32)                      # (ky, kx, Cin, Cout)
    cin, cout = w.shape[2], w.shape[3]
    w_idx = np.arange(win)[:, None]
    wo_idx = np.arange(wo)[None, :]
    kx = w_idx - 2 * wo_idx + 2                        # (Win, Wo)
    valid = ((kx >= 0) & (kx <= 2)).astype(np.float32)
    kx_c = np.clip(kx, 0, 2)
    m = w[:, kx_c, :, :]                               # (3, Win, Wo, Cin, Cout)
    m = m * valid[None, :, :, None, None]
    m = np.transpose(m, (0, 1, 3, 2, 4))               # (3, Win, Cin, Wo, Cout)
    m = m.reshape(3, win * cin, wo * cout)
    m_cat = np.zeros((3 * p_in, p_out), np.float32)
    for ky in range(3):
        m_cat[ky * p_in:ky * p_in + win * cin, :wo * cout] = m[ky]
    return jnp.asarray(m_cat).astype(jnp.bfloat16)


def _build_channel_projector(wo, c, p):
    """0/1 projector mapping the lane-padded (w,c) layout onto per-channel
    tiled stats; padded columns map to / from nothing."""
    wc = wo * c
    pm = np.zeros((p, p), np.float32)
    ch = np.arange(wc) % c
    pm[:wc, :wc] = (ch[:, None] == ch[None, :]).astype(np.float32)
    return jnp.asarray(pm).astype(jnp.bfloat16)        # 0/1: exact in bf16


def _tile_pad(v, wo, p):
    """Tile a per-channel (C,) vector Wo times into the (w,c) lane layout and
    zero-pad to the 128-aligned width p."""
    v = np.asarray(v, np.float32)
    out = np.zeros((1, p), np.float32)
    out[0, :wo * v.shape[0]] = np.tile(v, wo)
    return jnp.asarray(out)


def pack_operands(params, batch):
    dims = _layer_dims()
    ops = []
    # Conv weight-fold matrices M_cat
    for i, d in enumerate(dims):
        ops.append(_build_m_cat(params[f"conv{i}_w"], d["win"], d["wo"],
                                d["p_in"], d["p_out"]))
    # Row-selection matrices R
    for d in dims:
        ops.append(_build_row_select(batch, d["hin"], d["ho"]))
    # Tiled conv biases (conv1's bias is cancelled by its BatchNorm -> skipped)
    for i in (0, 2, 3, 4):
        d = dims[i]
        ops.append(_tile_pad(params[f"conv{i}_b"], d["wo"], d["p_out"]))
    # BatchNorm constants (projector + tiled gamma/beta, zero in padded lanes)
    d1 = dims[1]
    ops += [_build_channel_projector(d1["wo"], BN1_C, d1["p_out"]),
            _tile_pad(params["bn1_gamma"], d1["wo"], d1["p_out"]),
            _tile_pad(params["bn1_beta"], d1["wo"], d1["p_out"])]
    d3 = dims[3]
    ops += [_build_channel_projector(d3["wo"], BN3_C, d3["p_out"]),
            _tile_pad(params["bn3_gamma"], d3["wo"], d3["p_out"]),
            _tile_pad(params["bn3_beta"], d3["wo"], d3["p_out"])]
    # FC layers: per-h row selection; fc1 weights permuted so the in-kernel
    # lane-concat (h, w, c) column order maps to PyTorch's NCHW flatten order.
    s = np.zeros((3, batch, batch * 3), np.float32)
    for h in range(3):
        for b in range(batch):
            s[h, b, b * 3 + h] = 1.0
    ops.append(jnp.asarray(s).astype(jnp.bfloat16))
    fc2_dim = params["fc1_w"].shape[1]
    w1 = np.asarray(params["fc1_w"], np.float32).reshape(128, 3, 3, fc2_dim)
    w1 = np.transpose(w1, (1, 2, 0, 3)).reshape(3 * 3 * 128, fc2_dim)
    ops.append(jnp.asarray(w1).astype(jnp.bfloat16))
    ops.append(params["fc1_b"].astype(jnp.float32).reshape(1, -1))
    ops.append(params["fc2_w"].astype(jnp.bfloat16))
    ops.append(params["fc2_b"].astype(jnp.float32).reshape(1, -1))
    return tuple(ops)


# ----------------------------------------------------------------------------
# Forward: one transpose/pad of x + ONE pallas_call.
# ----------------------------------------------------------------------------
def encoder_forward(packed, x_nchw):
    batch, cin, h, w = x_nchw.shape
    assert (cin, h, w) == (1, 28, 28), "Encoder is hard-wired to 1x28x28 input"
    enc_dim = packed[-1].shape[1]
    x2d = jnp.transpose(x_nchw, (0, 2, 3, 1)).reshape(batch * 28, 28)
    x2d = jnp.pad(x2d, ((0, 0), (0, X_PAD_COLS - 28))).astype(jnp.bfloat16)

    vmem = pl.BlockSpec(memory_space=pltpu.MemorySpace.VMEM)
    return pl.pallas_call(
        _encoder_kernel,
        out_shape=jax.ShapeDtypeStruct((batch, enc_dim), jnp.float32),
        in_specs=[vmem] * (1 + len(packed)),
        out_specs=vmem,
        compiler_params=pltpu.CompilerParams(
            vmem_limit_bytes=8 * 1024 * 1024),          # ~2.5 MiB real footprint
    )(x2d, *packed)


# ----------------------------------------------------------------------------
# Parameters + pure-JAX reference (for a numerical sanity check)
# ----------------------------------------------------------------------------
def init_params(key, encoded_space_dim, fc2_input_dim):
    keys = iter(jax.random.split(key, 16))
    p = {}
    for i, (_, _, cin, cout) in enumerate(CONV_LAYERS):
        p[f"conv{i}_w"] = 0.1 * jax.random.normal(next(keys), (3, 3, cin, cout),
                                                  jnp.float32)
        p[f"conv{i}_b"] = 0.1 * jax.random.normal(next(keys), (cout,),
                                                  jnp.float32)
    p["bn1_gamma"] = jnp.ones((BN1_C,), jnp.float32)
    p["bn1_beta"] = jnp.zeros((BN1_C,), jnp.float32)
    p["bn3_gamma"] = jnp.ones((BN3_C,), jnp.float32)
    p["bn3_beta"] = jnp.zeros((BN3_C,), jnp.float32)
    p["fc1_w"] = 0.05 * jax.random.normal(next(keys), (3 * 3 * 128,
                                                       fc2_input_dim),
                                          jnp.float32)
    p["fc1_b"] = 0.05 * jax.random.normal(next(keys), (fc2_input_dim,),
                                          jnp.float32)
    p["fc2_w"] = 0.05 * jax.random.normal(next(keys), (fc2_input_dim,
                                                       encoded_space_dim),
                                          jnp.float32)
    p["fc2_b"] = 0.05 * jax.random.normal(next(keys), (encoded_space_dim,),
                                          jnp.float32)
    return p


def reference_forward(params, x_nchw):
    def conv(x, w, b):
        y = jax.lax.conv_general_dilated(
            x, w, window_strides=(2, 2), padding=((2, 2), (2, 2)),
            dimension_numbers=("NHWC", "HWIO", "NHWC"))
        return y + b

    def bn(x, g, bta):
        mean = jnp.mean(x, axis=(0, 1, 2), keepdims=True)
        var = jnp.mean((x - mean) ** 2, axis=(0, 1, 2), keepdims=True)
        return (x - mean) * jax.lax.rsqrt(var + BN_EPS) * g + bta

    relu = lambda t: jnp.maximum(t, 0.0)
    x = jnp.transpose(x_nchw, (0, 2, 3, 1))
    x = relu(conv(x, params["conv0_w"], params["conv0_b"]))
    x = relu(bn(conv(x, params["conv1_w"], params["conv1_b"]),
                params["bn1_gamma"], params["bn1_beta"]))
    x = relu(conv(x, params["conv2_w"], params["conv2_b"]))
    x = bn(relu(conv(x, params["conv3_w"], params["conv3_b"])),
           params["bn3_gamma"], params["bn3_beta"])
    x = relu(conv(x, params["conv4_w"], params["conv4_b"]))
    x = jnp.transpose(x, (0, 3, 1, 2)).reshape(x.shape[0], -1)   # NCHW flatten
    x = relu(x @ params["fc1_w"] + params["fc1_b"])
    return x @ params["fc2_w"] + params["fc2_b"]


if __name__ == "__main__":
    encoded_space_dim, fc2_input_dim = 16, 128
    key = jax.random.PRNGKey(0)
    k_param, k_x = jax.random.split(key)
    params = init_params(k_param, encoded_space_dim, fc2_input_dim)

    # PyTorch-style NCHW input: batch=2, 1 channel, 28x28 (required by the
    # hard-coded Linear(3*3*128, ...) in the module).
    x = jax.random.normal(k_x, (2, 1, 28, 28), jnp.float32)

    packed = pack_operands(params, batch=2)            # one-time weight prep
    fwd = jax.jit(encoder_forward)
    out = jax.block_until_ready(fwd(packed, x))

    assert out.shape == (2, encoded_space_dim), out.shape
    assert bool(jnp.all(jnp.isfinite(out)))
    ref = reference_forward(params, x)
    err = float(jnp.max(jnp.abs(out - ref)))
    assert bool(jnp.allclose(out, ref, rtol=0.1, atol=0.1)), f"max err {err}"
    print("KERNEL_OK")
</pallas_src>

<mosaic_0001>
module attributes {stable_mosaic.version = 11 : i64} {
  func.func @_encoder_kernel(%arg0: memref<56x128xbf16, #tpu.memory_space<vmem>>, %arg1: memref<384x128xbf16, #tpu.memory_space<vmem>>, %arg2: memref<384x256xbf16, #tpu.memory_space<vmem>>, %arg3: memref<768x256xbf16, #tpu.memory_space<vmem>>, %arg4: memref<768x256xbf16, #tpu.memory_space<vmem>>, %arg5: memref<768x384xbf16, #tpu.memory_space<vmem>>, %arg6: memref<3x30x56xbf16, #tpu.memory_space<vmem>>, %arg7: memref<3x18x30xbf16, #tpu.memory_space<vmem>>, %arg8: memref<3x12x18xbf16, #tpu.memory_space<vmem>>, %arg9: memref<3x8x12xbf16, #tpu.memory_space<vmem>>, %arg10: memref<3x6x8xbf16, #tpu.memory_space<vmem>>, %arg11: memref<1x128xf32, #tpu.memory_space<vmem>>, %arg12: memref<1x256xf32, #tpu.memory_space<vmem>>, %arg13: memref<1x256xf32, #tpu.memory_space<vmem>>, %arg14: memref<1x384xf32, #tpu.memory_space<vmem>>, %arg15: memref<256x256xbf16, #tpu.memory_space<vmem>>, %arg16: memref<1x256xf32, #tpu.memory_space<vmem>>, %arg17: memref<1x256xf32, #tpu.memory_space<vmem>>, %arg18: memref<256x256xbf16, #tpu.memory_space<vmem>>, %arg19: memref<1x256xf32, #tpu.memory_space<vmem>>, %arg20: memref<1x256xf32, #tpu.memory_space<vmem>>, %arg21: memref<3x2x6xbf16, #tpu.memory_space<vmem>>, %arg22: memref<1152x128xbf16, #tpu.memory_space<vmem>>, %arg23: memref<1x128xf32, #tpu.memory_space<vmem>>, %arg24: memref<128x16xbf16, #tpu.memory_space<vmem>>, %arg25: memref<1x16xf32, #tpu.memory_space<vmem>>, %arg26: memref<2x16xf32, #tpu.memory_space<vmem>>) attributes {dimension_semantics = [], scalar_prefetch = 0 : i64, scratch_operands = 0 : i64, tpu.core_type = #tpu.core_type<tc>} {
    %c0 = arith.constant 0 : index
    %c0_0 = arith.constant 0 : index
    %0 = vector.load %arg0[%c0, %c0_0] : memref<56x128xbf16, #tpu.memory_space<vmem>>, vector<56x128xbf16>
    %c0_1 = arith.constant 0 : index
    %c0_2 = arith.constant 0 : index
    %c0_3 = arith.constant 0 : index
    %1 = vector.load %arg6[%c0_1, %c0_2, %c0_3] : memref<3x30x56xbf16, #tpu.memory_space<vmem>>, vector<1x30x56xbf16>
    %2 = vector.shape_cast %1 : vector<1x30x56xbf16> to vector<30x56xbf16>
    %cst = arith.constant dense<0.000000e+00> : vector<30x128xf32>
    %3 = tpu.matmul %2, %0, %cst {dimension_numbers = #tpu.dot_dimension_numbers<[1], [0], [0], [1], [0, 0, 1, 1], [], []>} : vector<30x56xbf16>, vector<56x128xbf16>, vector<30x128xf32> -> vector<30x128xf32>
    %4 = arith.truncf %3 : vector<30x128xf32> to vector<30x128xbf16>
    %c1 = arith.constant 1 : index
    %c0_4 = arith.constant 0 : index
    %c0_5 = arith.constant 0 : index
    %5 = vector.load %arg6[%c1, %c0_4, %c0_5] : memref<3x30x56xbf16, #tpu.memory_space<vmem>>, vector<1x30x56xbf16>
    %6 = vector.shape_cast %5 : vector<1x30x56xbf16> to vector<30x56xbf16>
    %cst_6 = arith.constant dense<0.000000e+00> : vector<30x128xf32>
    %7 = tpu.matmul %6, %0, %cst_6 {dimension_numbers = #tpu.dot_dimension_numbers<[1], [0], [0], [1], [0, 0, 1, 1], [], []>} : vector<30x56xbf16>, vector<56x128xbf16>, vector<30x128xf32> -> vector<30x128xf32>
    %8 = arith.truncf %7 : vector<30x128xf32> to vector<30x128xbf16>
    %c2 = arith.constant 2 : index
    %c0_7 = arith.constant 0 : index
    %c0_8 = arith.constant 0 : index
    %9 = vector.load %arg6[%c2, %c0_7, %c0_8] : memref<3x30x56xbf16, #tpu.memory_space<vmem>>, vector<1x30x56xbf16>
    %10 = vector.shape_cast %9 : vector<1x30x56xbf16> to vector<30x56xbf16>
    %cst_9 = arith.constant dense<0.000000e+00> : vector<30x128xf32>
    %11 = tpu.matmul %10, %0, %cst_9 {dimension_numbers = #tpu.dot_dimension_numbers<[1], [0], [0], [1], [0, 0, 1, 1], [], []>} : vector<30x56xbf16>, vector<56x128xbf16>, vector<30x128xf32> -> vector<30x128xf32>
    %12 = arith.truncf %11 : vector<30x128xf32> to vector<30x128xbf16>
    %13 = tpu.concatenate %4, %8, %12 in 1 : vector<30x128xbf16>, vector<30x128xbf16>, vector<30x128xbf16> -> vector<30x384xbf16>
    %c0_10 = arith.constant 0 : index
    %c0_11 = arith.constant 0 : index
    %14 = vector.load %arg1[%c0_10, %c0_11] : memref<384x128xbf16, #tpu.memory_space<vmem>>, vector<384x128xbf16>
    %cst_12 = arith.constant dense<0.000000e+00> : vector<30x128xf32>
    %15 = tpu.matmul %13, %14, %cst_12 {dimension_numbers = #tpu.dot_dimension_numbers<[1], [0], [0], [1], [0, 0, 1, 1], [], []>} : vector<30x384xbf16>, vector<384x128xbf16>, vector<30x128xf32> -> vector<30x128xf32>
    %c0_13 = arith.constant 0 : index
    %c0_14 = arith.constant 0 : index
    %16 = vector.load %arg11[%c0_13, %c0_14] : memref<1x128xf32, #tpu.memory_space<vmem>>, vector<1x128xf32>
    %17 = vector.broadcast %16 : vector<1x128xf32> to vector<30x128xf32>
    %18 = arith.addf %15, %17 : vector<30x128xf32>
    %cst_15 = arith.constant 0.000000e+00 : f32
    %19 = vector.broadcast %cst_15 : f32 to vector<30x128xf32>
    %20 = arith.maximumf %18, %19 : vector<30x128xf32>
    %21 = arith.truncf %20 : vector<30x128xf32> to vector<30x128xbf16>
    %c0_16 = arith.constant 0 : index
    %c0_17 = arith.constant 0 : index
    %c0_18 = arith.constant 0 : index
    %22 = vector.load %arg7[%c0_16, %c0_17, %c0_18] : memref<3x18x30xbf16, #tpu.memory_space<vmem>>, vector<1x18x30xbf16>
    %23 = vector.shape_cast %22 : vector<1x18x30xbf16> to vector<18x30xbf16>
    %cst_19 = arith.constant dense<0.000000e+00> : vector<18x128xf32>
    %24 = tpu.matmul %23, %21, %cst_19 {dimension_numbers = #tpu.dot_dimension_numbers<[1], [0], [0], [1], [0, 0, 1, 1], [], []>} : vector<18x30xbf16>, vector<30x128xbf16>, vector<18x128xf32> -> vector<18x128xf32>
    %25 = arith.truncf %24 : vector<18x128xf32> to vector<18x128xbf16>
    %c1_20 = arith.constant 1 : index
    %c0_21 = arith.constant 0 : index
    %c0_22 = arith.constant 0 : index
    %26 = vector.load %arg7[%c1_20, %c0_21, %c0_22] : memref<3x18x30xbf16, #tpu.memory_space<vmem>>, vector<1x18x30xbf16>
    %27 = vector.shape_cast %26 : vector<1x18x30xbf16> to vector<18x30xbf16>
    %cst_23 = arith.constant dense<0.000000e+00> : vector<18x128xf32>
    %28 = tpu.matmul %27, %21, %cst_23 {dimension_numbers = #tpu.dot_dimension_numbers<[1], [0], [0], [1], [0, 0, 1, 1], [], []>} : vector<18x30xbf16>, vector<30x128xbf16>, vector<18x128xf32> -> vector<18x128xf32>
    %29 = arith.truncf %28 : vector<18x128xf32> to vector<18x128xbf16>
    %c2_24 = arith.constant 2 : index
    %c0_25 = arith.constant 0 : index
    %c0_26 = arith.constant 0 : index
    %30 = vector.load %arg7[%c2_24, %c0_25, %c0_26] : memref<3x18x30xbf16, #tpu.memory_space<vmem>>, vector<1x18x30xbf16>
    %31 = vector.shape_cast %30 : vector<1x18x30xbf16> to vector<18x30xbf16>
    %cst_27 = arith.constant dense<0.000000e+00> : vector<18x128xf32>
    %32 = tpu.matmul %31, %21, %cst_27 {dimension_numbers = #tpu.dot_dimension_numbers<[1], [0], [0], [1], [0, 0, 1, 1], [], []>} : vector<18x30xbf16>, vector<30x128xbf16>, vector<18x128xf32> -> vector<18x128xf32>
    %33 = arith.truncf %32 : vector<18x128xf32> to vector<18x128xbf16>
    %34 = tpu.concatenate %25, %29, %33 in 1 : vector<18x128xbf16>, vector<18x128xbf16>, vector<18x128xbf16> -> vector<18x384xbf16>
    %c0_28 = arith.constant 0 : index
    %c0_29 = arith.constant 0 : index
    %35 = vector.load %arg2[%c0_28, %c0_29] : memref<384x256xbf16, #tpu.memory_space<vmem>>, vector<384x256xbf16>
    %cst_30 = arith.constant dense<0.000000e+00> : vector<18x256xf32>
    %36 = tpu.matmul %34, %35, %cst_30 {dimension_numbers = #tpu.dot_dimension_numbers<[1], [0], [0], [1], [0, 0, 1, 1], [], []>} : vector<18x384xbf16>, vector<384x256xbf16>, vector<18x256xf32> -> vector<18x256xf32>
    %c0_31 = arith.constant 0 : index
    %c0_32 = arith.constant 0 : index
    %37 = vector.load %arg15[%c0_31, %c0_32] : memref<256x256xbf16, #tpu.memory_space<vmem>>, vector<256x256xbf16>
    %38 = arith.extf %37 : vector<256x256xbf16> to vector<256x256xf32>
    %cst_33 = arith.constant dense<0.000000e+00> : vector<256xf32>
    %39 = vector.multi_reduction <add>, %36, %cst_33 [0] : vector<18x256xf32> to vector<256xf32>
    %40 = vector.shape_cast %39 : vector<256xf32> to vector<1x256xf32>
    %41 = arith.mulf %36, %36 : vector<18x256xf32>
    %cst_34 = arith.constant dense<0.000000e+00> : vector<256xf32>
    %42 = vector.multi_reduction <add>, %41, %cst_34 [0] : vector<18x256xf32> to vector<256xf32>
    %43 = vector.shape_cast %42 : vector<256xf32> to vector<1x256xf32>
    %cst_35 = arith.constant dense<0.000000e+00> : vector<1x256xf32>
    %44 = tpu.matmul %40, %38, %cst_35 {dimension_numbers = #tpu.dot_dimension_numbers<[1], [0], [0], [1], [0, 0, 1, 1], [], []>} : vector<1x256xf32>, vector<256x256xf32>, vector<1x256xf32> -> vector<1x256xf32>
    %cst_36 = arith.constant 1.620000e+02 : f32
    %45 = vector.broadcast %cst_36 : f32 to vector<1x256xf32>
    %46 = arith.divf %44, %45 : vector<1x256xf32>
    %cst_37 = arith.constant dense<0.000000e+00> : vector<1x256xf32>
    %47 = tpu.matmul %43, %38, %cst_37 {dimension_numbers = #tpu.dot_dimension_numbers<[1], [0], [0], [1], [0, 0, 1, 1], [], []>} : vector<1x256xf32>, vector<256x256xf32>, vector<1x256xf32> -> vector<1x256xf32>
    %cst_38 = arith.constant 1.620000e+02 : f32
    %48 = vector.broadcast %cst_38 : f32 to vector<1x256xf32>
    %49 = arith.divf %47, %48 : vector<1x256xf32>
    %50 = arith.mulf %46, %46 : vector<1x256xf32>
    %51 = arith.subf %49, %50 : vector<1x256xf32>
    %cst_39 = arith.constant 0.000000e+00 : f32
    %52 = vector.broadcast %cst_39 : f32 to vector<1x256xf32>
    %53 = arith.maximumf %51, %52 : vector<1x256xf32>
    %cst_40 = arith.constant 9.99999974E-6 : f32
    %54 = vector.broadcast %cst_40 : f32 to vector<1x256xf32>
    %55 = arith.addf %53, %54 : vector<1x256xf32>
    %56 = math.rsqrt %55 : vector<1x256xf32>
    %57 = vector.broadcast %46 : vector<1x256xf32> to vector<18x256xf32>
    %58 = arith.subf %36, %57 : vector<18x256xf32>
    %c0_41 = arith.constant 0 : index
    %c0_42 = arith.constant 0 : index
    %59 = vector.load %arg16[%c0_41, %c0_42] : memref<1x256xf32, #tpu.memory_space<vmem>>, vector<1x256xf32>
    %60 = arith.mulf %56, %59 : vector<1x256xf32>
    %61 = vector.broadcast %60 : vector<1x256xf32> to vector<18x256xf32>
    %62 = arith.mulf %58, %61 : vector<18x256xf32>
    %c0_43 = arith.constant 0 : index
    %c0_44 = arith.constant 0 : index
    %63 = vector.load %arg17[%c0_43, %c0_44] : memref<1x256xf32, #tpu.memory_space<vmem>>, vector<1x256xf32>
    %64 = vector.broadcast %63 : vector<1x256xf32> to vector<18x256xf32>
    %65 = arith.addf %62, %64 : vector<18x256xf32>
    %cst_45 = arith.constant 0.000000e+00 : f32
    %66 = vector.broadcast %cst_45 : f32 to vector<18x256xf32>
    %67 = arith.maximumf %65, %66 : vector<18x256xf32>
    %68 = arith.truncf %67 : vector<18x256xf32> to vector<18x256xbf16>
    %c0_46 = arith.constant 0 : index
    %c0_47 = arith.constant 0 : index
    %c0_48 = arith.constant 0 : index
    %69 = vector.load %arg8[%c0_46, %c0_47, %c0_48] : memref<3x12x18xbf16, #tpu.memory_space<vmem>>, vector<1x12x18xbf16>
    %70 = vector.shape_cast %69 : vector<1x12x18xbf16> to vector<12x18xbf16>
    %cst_49 = arith.constant dense<0.000000e+00> : vector<12x256xf32>
    %71 = tpu.matmul %70, %68, %cst_49 {dimension_numbers = #tpu.dot_dimension_numbers<[1], [0], [0], [1], [0, 0, 1, 1], [], []>} : vector<12x18xbf16>, vector<18x256xbf16>, vector<12x256xf32> -> vector<12x256xf32>
    %72 = arith.truncf %71 : vector<12x256xf32> to vector<12x256xbf16>
    %c1_50 = arith.constant 1 : index
    %c0_51 = arith.constant 0 : index
    %c0_52 = arith.constant 0 : index
    %73 = vector.load %arg8[%c1_50, %c0_51, %c0_52] : memref<3x12x18xbf16, #tpu.memory_space<vmem>>, vector<1x12x18xbf16>
    %74 = vector.shape_cast %73 : vector<1x12x18xbf16> to vector<12x18xbf16>
    %cst_53 = arith.constant dense<0.000000e+00> : vector<12x256xf32>
    %75 = tpu.matmul %74, %68, %cst_53 {dimension_numbers = #tpu.dot_dimension_numbers<[1], [0], [0], [1], [0, 0, 1, 1], [], []>} : vector<12x18xbf16>, vector<18x256xbf16>, vector<12x256xf32> -> vector<12x256xf32>
    %76 = arith.truncf %75 : vector<12x256xf32> to vector<12x256xbf16>
    %c2_54 = arith.constant 2 : index
    %c0_55 = arith.constant 0 : index
    %c0_56 = arith.constant 0 : index
    %77 = vector.load %arg8[%c2_54, %c0_55, %c0_56] : memref<3x12x18xbf16, #tpu.memory_space<vmem>>, vector<1x12x18xbf16>
    %78 = vector.shape_cast %77 : vector<1x12x18xbf16> to vector<12x18xbf16>
    %cst_57 = arith.constant dense<0.000000e+00> : vector<12x256xf32>
    %79 = tpu.matmul %78, %68, %cst_57 {dimension_numbers = #tpu.dot_dimension_numbers<[1], [0], [0], [1], [0, 0, 1, 1], [], []>} : vector<12x18xbf16>, vector<18x256xbf16>, vector<12x256xf32> -> vector<12x256xf32>
    %80 = arith.truncf %79 : vector<12x256xf32> to vector<12x256xbf16>
    %81 = tpu.concatenate %72, %76, %80 in 1 : vector<12x256xbf16>, vector<12x256xbf16>, vector<12x256xbf16> -> vector<12x768xbf16>
    %c0_58 = arith.constant 0 : index
    %c0_59 = arith.constant 0 : index
    %82 = vector.load %arg3[%c0_58, %c0_59] : memref<768x256xbf16, #tpu.memory_space<vmem>>, vector<768x256xbf16>
    %cst_60 = arith.constant dense<0.000000e+00> : vector<12x256xf32>
    %83 = tpu.matmul %81, %82, %cst_60 {dimension_numbers = #tpu.dot_dimension_numbers<[1], [0], [0], [1], [0, 0, 1, 1], [], []>} : vector<12x768xbf16>, vector<768x256xbf16>, vector<12x256xf32> -> vector<12x256xf32>
    %c0_61 = arith.constant 0 : index
    %c0_62 = arith.constant 0 : index
    %84 = vector.load %arg12[%c0_61, %c0_62] : memref<1x256xf32, #tpu.memory_space<vmem>>, vector<1x256xf32>
    %85 = vector.broadcast %84 : vector<1x256xf32> to vector<12x256xf32>
    %86 = arith.addf %83, %85 : vector<12x256xf32>
    %cst_63 = arith.constant 0.000000e+00 : f32
    %87 = vector.broadcast %cst_63 : f32 to vector<12x256xf32>
    %88 = arith.maximumf %86, %87 : vector<12x256xf32>
    %89 = arith.truncf %88 : vector<12x256xf32> to vector<12x256xbf16>
    %c0_64 = arith.constant 0 : index
    %c0_65 = arith.constant 0 : index
    %c0_66 = arith.constant 0 : index
    %90 = vector.load %arg9[%c0_64, %c0_65, %c0_66] : memref<3x8x12xbf16, #tpu.memory_space<vmem>>, vector<1x8x12xbf16>
    %91 = vector.shape_cast %90 : vector<1x8x12xbf16> to vector<8x12xbf16>
    %cst_67 = arith.constant dense<0.000000e+00> : vector<8x256xf32>
    %92 = tpu.matmul %91, %89, %cst_67 {dimension_numbers = #tpu.dot_dimension_numbers<[1], [0], [0], [1], [0, 0, 1, 1], [], []>} : vector<8x12xbf16>, vector<12x256xbf16>, vector<8x256xf32> -> vector<8x256xf32>
    %93 = arith.truncf %92 : vector<8x256xf32> to vector<8x256xbf16>
    %c1_68 = arith.constant 1 : index
    %c0_69 = arith.constant 0 : index
    %c0_70 = arith.constant 0 : index
    %94 = vector.load %arg9[%c1_68, %c0_69, %c0_70] : memref<3x8x12xbf16, #tpu.memory_space<vmem>>, vector<1x8x12xbf16>
    %95 = vector.shape_cast %94 : vector<1x8x12xbf16> to vector<8x12xbf16>
    %cst_71 = arith.constant dense<0.000000e+00> : vector<8x256xf32>
    %96 = tpu.matmul %95, %89, %cst_71 {dimension_numbers = #tpu.dot_dimension_numbers<[1], [0], [0], [1], [0, 0, 1, 1], [], []>} : vector<8x12xbf16>, vector<12x256xbf16>, vector<8x256xf32> -> vector<8x256xf32>
    %97 = arith.truncf %96 : vector<8x256xf32> to vector<8x256xbf16>
    %c2_72 = arith.constant 2 : index
    %c0_73 = arith.constant 0 : index
    %c0_74 = arith.constant 0 : index
    %98 = vector.load %arg9[%c2_72, %c0_73, %c0_74] : memref<3x8x12xbf16, #tpu.memory_space<vmem>>, vector<1x8x12xbf16>
    %99 = vector.shape_cast %98 : vector<1x8x12xbf16> to vector<8x12xbf16>
    %cst_75 = arith.constant dense<0.000000e+00> : vector<8x256xf32>
    %100 = tpu.matmul %99, %89, %cst_75 {dimension_numbers = #tpu.dot_dimension_numbers<[1], [0], [0], [1], [0, 0, 1, 1], [], []>} : vector<8x12xbf16>, vector<12x256xbf16>, vector<8x256xf32> -> vector<8x256xf32>
    %101 = arith.truncf %100 : vector<8x256xf32> to vector<8x256xbf16>
    %102 = tpu.concatenate %93, %97, %101 in 1 : vector<8x256xbf16>, vector<8x256xbf16>, vector<8x256xbf16> -> vector<8x768xbf16>
    %c0_76 = arith.constant 0 : index
    %c0_77 = arith.constant 0 : index
    %103 = vector.load %arg4[%c0_76, %c0_77] : memref<768x256xbf16, #tpu.memory_space<vmem>>, vector<768x256xbf16>
    %cst_78 = arith.constant dense<0.000000e+00> : vector<8x256xf32>
    %104 = tpu.matmul %102, %103, %cst_78 {dimension_numbers = #tpu.dot_dimension_numbers<[1], [0], [0], [1], [0, 0, 1, 1], [], []>} : vector<8x768xbf16>, vector<768x256xbf16>, vector<8x256xf32> -> vector<8x256xf32>
    %c0_79 = arith.constant 0 : index
    %c0_80 = arith.constant 0 : index
    %105 = vector.load %arg13[%c0_79, %c0_80] : memref<1x256xf32, #tpu.memory_space<vmem>>, vector<1x256xf32>
    %106 = vector.broadcast %105 : vector<1x256xf32> to vector<8x256xf32>
    %107 = arith.addf %104, %106 : vector<8x256xf32>
    %cst_81 = arith.constant 0.000000e+00 : f32
    %108 = vector.broadcast %cst_81 : f32 to vector<8x256xf32>
    %109 = arith.maximumf %107, %108 : vector<8x256xf32>
    %c0_82 = arith.constant 0 : index
    %c0_83 = arith.constant 0 : index
    %110 = vector.load %arg18[%c0_82, %c0_83] : memref<256x256xbf16, #tpu.memory_space<vmem>>, vector<256x256xbf16>
    %111 = arith.extf %110 : vector<256x256xbf16> to vector<256x256xf32>
    %cst_84 = arith.constant dense<0.000000e+00> : vector<256xf32>
    %112 = vector.multi_reduction <add>, %109, %cst_84 [0] : vector<8x256xf32> to vector<256xf32>
    %113 = vector.shape_cast %112 : vector<256xf32> to vector<1x256xf32>
    %114 = arith.mulf %109, %109 : vector<8x256xf32>
    %cst_85 = arith.constant dense<0.000000e+00> : vector<256xf32>
    %115 = vector.multi_reduction <add>, %114, %cst_85 [0] : vector<8x256xf32> to vector<256xf32>
    %116 = vector.shape_cast %115 : vector<256xf32> to vector<1x256xf32>
    %cst_86 = arith.constant dense<0.000000e+00> : vector<1x256xf32>
    %117 = tpu.matmul %113, %111, %cst_86 {dimension_numbers = #tpu.dot_dimension_numbers<[1], [0], [0], [1], [0, 0, 1, 1], [], []>} : vector<1x256xf32>, vector<256x256xf32>, vector<1x256xf32> -> vector<1x256xf32>
    %cst_87 = arith.constant 3.200000e+01 : f32
    %118 = vector.broadcast %cst_87 : f32 to vector<1x256xf32>
    %119 = arith.divf %117, %118 : vector<1x256xf32>
    %cst_88 = arith.constant dense<0.000000e+00> : vector<1x256xf32>
    %120 = tpu.matmul %116, %111, %cst_88 {dimension_numbers = #tpu.dot_dimension_numbers<[1], [0], [0], [1], [0, 0, 1, 1], [], []>} : vector<1x256xf32>, vector<256x256xf32>, vector<1x256xf32> -> vector<1x256xf32>
    %cst_89 = arith.constant 3.200000e+01 : f32
    %121 = vector.broadcast %cst_89 : f32 to vector<1x256xf32>
    %122 = arith.divf %120, %121 : vector<1x256xf32>
    %123 = arith.mulf %119, %119 : vector<1x256xf32>
    %124 = arith.subf %122, %123 : vector<1x256xf32>
    %cst_90 = arith.constant 0.000000e+00 : f32
    %125 = vector.broadcast %cst_90 : f32 to vector<1x256xf32>
    %126 = arith.maximumf %124, %125 : vector<1x256xf32>
    %cst_91 = arith.constant 9.99999974E-6 : f32
    %127 = vector.broadcast %cst_91 : f32 to vector<1x256xf32>
    %128 = arith.addf %126, %127 : vector<1x256xf32>
    %129 = math.rsqrt %128 : vector<1x256xf32>
    %130 = vector.broadcast %119 : vector<1x256xf32> to vector<8x256xf32>
    %131 = arith.subf %109, %130 : vector<8x256xf32>
    %c0_92 = arith.constant 0 : index
    %c0_93 = arith.constant 0 : index
    %132 = vector.load %arg19[%c0_92, %c0_93] : memref<1x256xf32, #tpu.memory_space<vmem>>, vector<1x256xf32>
    %133 = arith.mulf %129, %132 : vector<1x256xf32>
    %134 = vector.broadcast %133 : vector<1x256xf32> to vector<8x256xf32>
    %135 = arith.mulf %131, %134 : vector<8x256xf32>
    %c0_94 = arith.constant 0 : index
    %c0_95 = arith.constant 0 : index
    %136 = vector.load %arg20[%c0_94, %c0_95] : memref<1x256xf32, #tpu.memory_space<vmem>>, vector<1x256xf32>
    %137 = vector.broadcast %136 : vector<1x256xf32> to vector<8x256xf32>
    %138 = arith.addf %135, %137 : vector<8x256xf32>
    %139 = arith.truncf %138 : vector<8x256xf32> to vector<8x256xbf16>
    %c0_96 = arith.constant 0 : index
    %c0_97 = arith.constant 0 : index
    %c0_98 = arith.constant 0 : index
    %140 = vector.load %arg10[%c0_96, %c0_97, %c0_98] : memref<3x6x8xbf16, #tpu.memory_space<vmem>>, vector<1x6x8xbf16>
    %141 = vector.shape_cast %140 : vector<1x6x8xbf16> to vector<6x8xbf16>
    %cst_99 = arith.constant dense<0.000000e+00> : vector<6x256xf32>
    %142 = tpu.matmul %141, %139, %cst_99 {dimension_numbers = #tpu.dot_dimension_numbers<[1], [0], [0], [1], [0, 0, 1, 1], [], []>} : vector<6x8xbf16>, vector<8x256xbf16>, vector<6x256xf32> -> vector<6x256xf32>
    %143 = arith.truncf %142 : vector<6x256xf32> to vector<6x256xbf16>
    %c1_100 = arith.constant 1 : index
    %c0_101 = arith.constant 0 : index
    %c0_102 = arith.constant 0 : index
    %144 = vector.load %arg10[%c1_100, %c0_101, %c0_102] : memref<3x6x8xbf16, #tpu.memory_space<vmem>>, vector<1x6x8xbf16>
    %145 = vector.shape_cast %144 : vector<1x6x8xbf16> to vector<6x8xbf16>
    %cst_103 = arith.constant dense<0.000000e+00> : vector<6x256xf32>
    %146 = tpu.matmul %145, %139, %cst_103 {dimension_numbers = #tpu.dot_dimension_numbers<[1], [0], [0], [1], [0, 0, 1, 1], [], []>} : vector<6x8xbf16>, vector<8x256xbf16>, vector<6x256xf32> -> vector<6x256xf32>
    %147 = arith.truncf %146 : vector<6x256xf32> to vector<6x256xbf16>
    %c2_104 = arith.constant 2 : index
    %c0_105 = arith.constant 0 : index
    %c0_106 = arith.constant 0 : index
    %148 = vector.load %arg10[%c2_104, %c0_105, %c0_106] : memref<3x6x8xbf16, #tpu.memory_space<vmem>>, vector<1x6x8xbf16>
    %149 = vector.shape_cast %148 : vector<1x6x8xbf16> to vector<6x8xbf16>
    %cst_107 = arith.constant dense<0.000000e+00> : vector<6x256xf32>
    %150 = tpu.matmul %149, %139, %cst_107 {dimension_numbers = #tpu.dot_dimension_numbers<[1], [0], [0], [1], [0, 0, 1, 1], [], []>} : vector<6x8xbf16>, vector<8x256xbf16>, vector<6x256xf32> -> vector<6x256xf32>
    %151 = arith.truncf %150 : vector<6x256xf32> to vector<6x256xbf16>
    %152 = tpu.concatenate %143, %147, %151 in 1 : vector<6x256xbf16>, vector<6x256xbf16>, vector<6x256xbf16> -> vector<6x768xbf16>
    %c0_108 = arith.constant 0 : index
    %c0_109 = arith.constant 0 : index
    %153 = vector.load %arg5[%c0_108, %c0_109] : memref<768x384xbf16, #tpu.memory_space<vmem>>, vector<768x384xbf16>
    %cst_110 = arith.constant dense<0.000000e+00> : vector<6x384xf32>
    %154 = tpu.matmul %152, %153, %cst_110 {dimension_numbers = #tpu.dot_dimension_numbers<[1], [0], [0], [1], [0, 0, 1, 1], [], []>} : vector<6x768xbf16>, vector<768x384xbf16>, vector<6x384xf32> -> vector<6x384xf32>
    %c0_111 = arith.constant 0 : index
    %c0_112 = arith.constant 0 : index
    %155 = vector.load %arg14[%c0_111, %c0_112] : memref<1x384xf32, #tpu.memory_space<vmem>>, vector<1x384xf32>
    %156 = vector.broadcast %155 : vector<1x384xf32> to vector<6x384xf32>
    %157 = arith.addf %154, %156 : vector<6x384xf32>
    %cst_113 = arith.constant 0.000000e+00 : f32
    %158 = vector.broadcast %cst_113 : f32 to vector<6x384xf32>
    %159 = arith.maximumf %157, %158 : vector<6x384xf32>
    %160 = arith.truncf %159 : vector<6x384xf32> to vector<6x384xbf16>
    %c0_114 = arith.constant 0 : index
    %c0_115 = arith.constant 0 : index
    %c0_116 = arith.constant 0 : index
    %161 = vector.load %arg21[%c0_114, %c0_115, %c0_116] : memref<3x2x6xbf16, #tpu.memory_space<vmem>>, vector<1x2x6xbf16>
    %162 = vector.shape_cast %161 : vector<1x2x6xbf16> to vector<2x6xbf16>
    %cst_117 = arith.constant dense<0.000000e+00> : vector<2x384xf32>
    %163 = tpu.matmul %162, %160, %cst_117 {dimension_numbers = #tpu.dot_dimension_numbers<[1], [0], [0], [1], [0, 0, 1, 1], [], []>} : vector<2x6xbf16>, vector<6x384xbf16>, vector<2x384xf32> -> vector<2x384xf32>
    %164 = arith.truncf %163 : vector<2x384xf32> to vector<2x384xbf16>
    %c1_118 = arith.constant 1 : index
    %c0_119 = arith.constant 0 : index
    %c0_120 = arith.constant 0 : index
    %165 = vector.load %arg21[%c1_118, %c0_119, %c0_120] : memref<3x2x6xbf16, #tpu.memory_space<vmem>>, vector<1x2x6xbf16>
    %166 = vector.shape_cast %165 : vector<1x2x6xbf16> to vector<2x6xbf16>
    %cst_121 = arith.constant dense<0.000000e+00> : vector<2x384xf32>
    %167 = tpu.matmul %166, %160, %cst_121 {dimension_numbers = #tpu.dot_dimension_numbers<[1], [0], [0], [1], [0, 0, 1, 1], [], []>} : vector<2x6xbf16>, vector<6x384xbf16>, vector<2x384xf32> -> vector<2x384xf32>
    %168 = arith.truncf %167 : vector<2x384xf32> to vector<2x384xbf16>
    %c2_122 = arith.constant 2 : index
    %c0_123 = arith.constant 0 : index
    %c0_124 = arith.constant 0 : index
    %169 = vector.load %arg21[%c2_122, %c0_123, %c0_124] : memref<3x2x6xbf16, #tpu.memory_space<vmem>>, vector<1x2x6xbf16>
    %170 = vector.shape_cast %169 : vector<1x2x6xbf16> to vector<2x6xbf16>
    %cst_125 = arith.constant dense<0.000000e+00> : vector<2x384xf32>
    %171 = tpu.matmul %170, %160, %cst_125 {dimension_numbers = #tpu.dot_dimension_numbers<[1], [0], [0], [1], [0, 0, 1, 1], [], []>} : vector<2x6xbf16>, vector<6x384xbf16>, vector<2x384xf32> -> vector<2x384xf32>
    %172 = arith.truncf %171 : vector<2x384xf32> to vector<2x384xbf16>
    %173 = tpu.concatenate %164, %168, %172 in 1 : vector<2x384xbf16>, vector<2x384xbf16>, vector<2x384xbf16> -> vector<2x1152xbf16>
    %c0_126 = arith.constant 0 : index
    %c0_127 = arith.constant 0 : index
    %174 = vector.load %arg22[%c0_126, %c0_127] : memref<1152x128xbf16, #tpu.memory_space<vmem>>, vector<1152x128xbf16>
    %cst_128 = arith.constant dense<0.000000e+00> : vector<2x128xf32>
    %175 = tpu.matmul %173, %174, %cst_128 {dimension_numbers = #tpu.dot_dimension_numbers<[1], [0], [0], [1], [0, 0, 1, 1], [], []>} : vector<2x1152xbf16>, vector<1152x128xbf16>, vector<2x128xf32> -> vector<2x128xf32>
    %c0_129 = arith.constant 0 : index
    %c0_130 = arith.constant 0 : index
    %176 = vector.load %arg23[%c0_129, %c0_130] : memref<1x128xf32, #tpu.memory_space<vmem>>, vector<1x128xf32>
    %177 = vector.broadcast %176 : vector<1x128xf32> to vector<2x128xf32>
    %178 = arith.addf %175, %177 : vector<2x128xf32>
    %cst_131 = arith.constant 0.000000e+00 : f32
    %179 = vector.broadcast %cst_131 : f32 to vector<2x128xf32>
    %180 = arith.maximumf %178, %179 : vector<2x128xf32>
    %181 = arith.truncf %180 : vector<2x128xf32> to vector<2x128xbf16>
    %c0_132 = arith.constant 0 : index
    %c0_133 = arith.constant 0 : index
    %182 = vector.load %arg24[%c0_132, %c0_133] : memref<128x16xbf16, #tpu.memory_space<vmem>>, vector<128x16xbf16>
    %cst_134 = arith.constant dense<0.000000e+00> : vector<2x16xf32>
    %183 = tpu.matmul %181, %182, %cst_134 {dimension_numbers = #tpu.dot_dimension_numbers<[1], [0], [0], [1], [0, 0, 1, 1], [], []>} : vector<2x128xbf16>, vector<128x16xbf16>, vector<2x16xf32> -> vector<2x16xf32>
    %c0_135 = arith.constant 0 : index
    %c0_136 = arith.constant 0 : index
    %184 = vector.load %arg25[%c0_135, %c0_136] : memref<1x16xf32, #tpu.memory_space<vmem>>, vector<1x16xf32>
    %185 = vector.broadcast %184 : vector<1x16xf32> to vector<2x16xf32>
    %186 = arith.addf %183, %185 : vector<2x16xf32>
    %c0_137 = arith.constant 0 : index
    %c0_138 = arith.constant 0 : index
    %187 = vector.load %arg26[%c0_137, %c0_138] : memref<2x16xf32, #tpu.memory_space<vmem>>, vector<2x16xf32>
    tpu.vector_store %arg26[%c0_137, %c0_138], %186 {strides = array<i32>} : memref<2x16xf32, #tpu.memory_space<vmem>>, vector<2x16xf32>,
    return
  }
}

</mosaic_0001>

<bundles_post_ra>
// kernel: encoder_forward.1
= control target key start
LH: loop header
LB: loop body
LE: loop exit
PB: predicated region body
PF: predicated region fallthrough
CT: control target
= control target key end

     0   :  { %s10282_s0 = inlined_call_operand.vmem [shape: bf16[56,128], index: 0, kind: input, shape index: {}]   ;;  %s10283_s1 = inlined_call_operand.hbm [shape: bf16[384,128], index: 1, kind: input, shape index: {}]   ;;  %s10284_s2 = inlined_call_operand.hbm [shape: bf16[384,256], index: 2, kind: input, shape index: {}]   ;;  %s10285_s3 = inlined_call_operand.hbm [shape: bf16[768,256], index: 3, kind: input, shape index: {}]   ;;  %s10286_s4 = inlined_call_operand.hbm [shape: bf16[768,256], index: 4, kind: input, shape index: {}]   ;;  %s10287_s5 = inlined_call_operand.hbm [shape: bf16[768,384], index: 5, kind: input, shape index: {}]   ;;  %s10288_s6 = inlined_call_operand.vmem [shape: bf16[3,30,56], index: 6, kind: input, shape index: {}]   ;;  %s10289_s7 = inlined_call_operand.hbm [shape: bf16[3,18,30], index: 7, kind: input, shape index: {}]   ;;  %s10290_s8 = inlined_call_operand.hbm [shape: bf16[3,12,18], index: 8, kind: input, shape index: {}]   ;;  %s10291_s9 = inlined_call_operand.hbm [shape: bf16[3,8,12], index: 9, kind: input, shape index: {}]   ;;  %s10292_s10 = inlined_call_operand.hbm [shape: bf16[3,6,8], index: 10, kind: input, shape index: {}]   ;;  %s10293_s11 = inlined_call_operand.hbm [shape: f32[1,128], index: 11, kind: input, shape index: {}]   ;;  %s10294_s12 = inlined_call_operand.hbm [shape: f32[1,256], index: 12, kind: input, shape index: {}]   ;;  %s10295_s13 = inlined_call_operand.hbm [shape: f32[1,256], index: 13, kind: input, shape index: {}]   ;;  %s10296_s14 = inlined_call_operand.vmem [shape: f32[1,384], index: 14, kind: input, shape index: {}]   ;;  %s10297_s15 = inlined_call_operand.vmem [shape: bf16[256,256], index: 15, kind: input, shape index: {}]   ;;  %s10298_s16 = inlined_call_operand.hbm [shape: f32[1,256], index: 16, kind: input, shape index: {}]   ;;  %s10299_s17 = inlined_call_operand.hbm [shape: f32[1,256], index: 17, kind: input, shape index: {}]   ;;  %s10300_s18 = inlined_call_operand.hbm [shape: bf16[256,256], index: 18, kind: input, shape index: {}]   ;;  %s10301_s19 = inlined_call_operand.hbm [shape: f32[1,256], index: 19, kind: input, shape index: {}]   ;;  %s10302_s20 = inlined_call_operand.hbm [shape: f32[1,256], index: 20, kind: input, shape index: {}]   ;;  %s10303_s21 = inlined_call_operand.hbm [shape: bf16[3,2,6], index: 21, kind: input, shape index: {}]   ;;  %s10304_s22 = inlined_call_operand.hbm [shape: bf16[1152,128], index: 22, kind: input, shape index: {}]   ;;  %s10305_s23 = inlined_call_operand.hbm [shape: f32[1,128], index: 23, kind: input, shape index: {}]   ;;  %s10306_s24 = inlined_call_operand.vmem [shape: bf16[128,16], index: 24, kind: input, shape index: {}]   ;;  %s10307_s25 = inlined_call_operand.hbm [shape: f32[1,16], index: 25, kind: input, shape index: {}]   ;;  %s10308_s26 = inlined_call_operand.hbm [shape: f32[2,16], index: 26, kind: output, shape index: {}]  }
   0x1   :  { %10326 = sst [smem:[#allocation48_spill]] %s10282_s0 }
   0x2   :  { %10327 = sst [smem:[#allocation49_spill]] %s10283_s1 }
   0x3   :  { %10328 = sst [smem:[#allocation50_spill]] %s10284_s2 }
   0x4   :  { %10329 = sst [smem:[#allocation51_spill]] %s10285_s3 }
   0x5   :  { %10330 = sst [smem:[#allocation52_spill]] %s10286_s4 }
   0x6   :  { %10331 = sst [smem:[#allocation53_spill]] %s10287_s5 }
   0x7   :  { %10332 = sst [smem:[#allocation54_spill]] %s10288_s6 }
   0x8   :  { %10333 = sst [smem:[#allocation55_spill]] %s10289_s7 }
   0x9   :  { %10334 = sst [smem:[#allocation56_spill]] %s10290_s8 }
   0xa   :  { %10335 = sst [smem:[#allocation57_spill]] %s10291_s9 }
   0xb   :  { %10336 = sst [smem:[#allocation58_spill]] %s10292_s10 }
   0xc   :  { %10337 = sst [smem:[#allocation59_spill]] %s10296_s14 }
   0xd   :  { %10338 = sst [smem:[#allocation60_spill]] %s10306_s24 }
   0xe   :  { %10339 = sst [smem:[#allocation61_spill]] %s10308_s26 }
   0xf   :  { %31 = vsyncpa [#allocation3], 0 }
  0x10   :  { %32 = vsyncpa [#allocation6], 0 }
  0x11   :  { %33 = vsyncpa [#allocation9], 0 }
  0x12   :  { %34 = vsyncpa [#allocation12], 0 }
  0x13   :  { %35 = vsyncpa [#allocation15], 0 }
  0x14   :  { %36 = vsyncpa [#allocation18], 0 }
  0x15   :  { %37 = vsyncpa [#allocation21], 0 }
  0x16   :  { %38 = vsyncpa [#allocation24], 0 }
  0x17   :  { %39 = vsyncpa [#allocation27], 0 }
  0x18   :  { %40 = vsyncpa [#allocation30], 0 }
  0x19   :  { %41 = vsyncpa [#allocation33], 0 }
  0x1a   :  { %42 = vsyncpa [#allocation4], 0  ;;  %s9224_s27 = smov [#allocation5]   ;;  %s10340_s8 = sld [smem:[#allocation50_spill]] }
  0x1b   :  { %s62_s3 = sshll.u32 %s9224_s27, 4  ;;  %s63_s3 = int_to_ptr.vmem [resolvable:$true] %s62_s3 }
  0x20   :  { %s8716_s4 = scalar_lea.hbm %s10340_s8, 6144 }
  0x21   :  { %p8717_p0 = scmp.ne.s32.totalorder %s10340_s8, %s8716_s4  ;;  %p8720_p1 = scmp.lt.u32.totalorder %s8716_s4, %s10340_s8 }
  0x23   :  { %p8722_p2 = pnand %p8720_p1, %p8717_p0 }
  0x25   :  { %8725 = shalt.err (!%p8722_p2)
}
  0x26   :  { %s8726_s2 = scalar_lea.vmem %s63_s3, 6144  ;;  %p8731_p4 = scmp.lt.s32.totalorder %s63_s3, %s63_s3 }
  0x27   :  { %p8727_p3 = scmp.ne.s32.totalorder %s63_s3, %s8726_s2  ;;  %p8732_p5 = scmp.lt.s32.totalorder %s8726_s2, %s8726_s2 }
  0x29   :  { %p8733_p6 = por %p8732_p5, %p8731_p4 }
  0x2b   :  { %p8734_p7 = pnand %p8733_p6, %p8727_p3 }
  0x2d   :  { %8737 = shalt.err (!%p8734_p7)
}
  0x2e   :  { %s10322_s5 = smov 128   ;;  %s9226_s10 = smov 8  }
  0x2f   :  { %68 = dma.hbm_to_vmem [thread:$0]  %s10340_s8, 6144, %s63_s3, [#allocation6], %s10322_s5, %s10322_s5, %s9226_s10  }
  0x30   :  { %s9227_s27 = smov [#allocation8]   ;;  %s10341_s29 = sld [smem:[#allocation52_spill]] }
  0x31   :  { %s86_s7 = sshll.u32 %s9227_s27, 4  ;;  %s87_s7 = int_to_ptr.vmem [resolvable:$true] %s86_s7 }
  0x36   :  { %s8738_s0 = scalar_lea.hbm %s10341_s29, 12288 }
  0x37   :  { %p8739_p8 = scmp.ne.s32.totalorder %s10341_s29, %s8738_s0  ;;  %p8742_p9 = scmp.lt.u32.totalorder %s8738_s0, %s10341_s29 }
  0x39   :  { %p8744_p10 = pnand %p8742_p9, %p8739_p8 }
  0x3b   :  { %8747 = shalt.err (!%p8744_p10)
}
  0x3c   :  { %s8748_s24 = scalar_lea.vmem %s87_s7, 12288  ;;  %p8753_p12 = scmp.lt.s32.totalorder %s87_s7, %s87_s7 }
  0x3d   :  { %p8749_p11 = scmp.ne.s32.totalorder %s87_s7, %s8748_s24  ;;  %p8754_p13 = scmp.lt.s32.totalorder %s8748_s24, %s8748_s24 }
  0x3f   :  { %p8755_p0 = por %p8754_p13, %p8753_p12 }
  0x41   :  { %p8756_p1 = pnand %p8755_p0, %p8749_p11 }
  0x43   :  { %8759 = shalt.err (!%p8756_p1)
}
  0x44   :  { %92 = dma.hbm_to_vmem [thread:$0]  %s10341_s29, 12288, %s87_s7, [#allocation9], %s10322_s5, %s10322_s5, %s9226_s10  }
  0x45   :  { %s9228_s6 = smov [#allocation11]   ;;  %s9229_s26 = smov [#allocation14]  }
  0x46   :  { %s112_s1 = sshll.u32 %s9228_s6, 4  ;;  %s136_s27 = sshll.u32 %s9229_s26, 4  ;;  %s113_s1 = int_to_ptr.vmem [resolvable:$true] %s112_s1  ;;  %s9422_s27 = int_to_ptr.vmem [resolvable:$true] %s136_s27 }
  0x47   :  { %s10342_s24 = sld [smem:[#allocation55_spill]] }
  0x4d   :  { %s8760_s0 = scalar_lea.hbm %s10342_s24, 576 }
  0x4e   :  { %p8761_p2 = scmp.ne.s32.totalorder %s10342_s24, %s8760_s0  ;;  %p8764_p3 = scmp.lt.u32.totalorder %s8760_s0, %s10342_s24 }
  0x50   :  { %p8766_p4 = pnand %p8764_p3, %p8761_p2 }
  0x52   :  { %8769 = shalt.err (!%p8766_p4)
}
  0x53   :  { %s8770_s7 = scalar_lea.vmem %s113_s1, 576  ;;  %p8775_p6 = scmp.lt.s32.totalorder %s113_s1, %s113_s1 }
  0x54   :  { %p8771_p5 = scmp.ne.s32.totalorder %s113_s1, %s8770_s7  ;;  %p8776_p7 = scmp.lt.s32.totalorder %s8770_s7, %s8770_s7 }
  0x56   :  { %p8777_p8 = por %p8776_p7, %p8775_p6 }
  0x58   :  { %p8778_p9 = pnand %p8777_p8, %p8771_p5 }
  0x5a   :  { %8781 = shalt.err (!%p8778_p9)
}
  0x5b   :  { %s9230_s29 = smov 64   ;;  %s9231_s3 = smov 4  }
  0x5c   :  { %118 = dma.hbm_to_vmem [thread:$0]  %s10342_s24, 576, %s113_s1, [#allocation12], %s9230_s29, %s9230_s29, %s9231_s3  }
  0x5d   :  { %s10343_s28 = sld [smem:[#allocation57_spill]] }
  0x63   :  { %s8782_s4 = scalar_lea.hbm %s10343_s28, 192 }
  0x64   :  { %p8783_p10 = scmp.ne.s32.totalorder %s10343_s28, %s8782_s4  ;;  %p8786_p11 = scmp.lt.u32.totalorder %s8782_s4, %s10343_s28 }
  0x66   :  { %p8788_p12 = pnand %p8786_p11, %p8783_p10 }
  0x68   :  { %8791 = shalt.err (!%p8788_p12)
}
  0x69   :  { %s8792_s7 = scalar_lea.vmem %s9422_s27, 192  ;;  %p8797_p0 = scmp.lt.s32.totalorder %s9422_s27, %s9422_s27 }
  0x6a   :  { %p8793_p13 = scmp.ne.s32.totalorder %s9422_s27, %s8792_s7  ;;  %p8798_p1 = scmp.lt.s32.totalorder %s8792_s7, %s8792_s7 }
  0x6c   :  { %p8799_p2 = por %p8798_p1, %p8797_p0 }
  0x6e   :  { %p8800_p3 = pnand %p8799_p2, %p8793_p13 }
  0x70   :  { %8803 = shalt.err (!%p8800_p3)
}
  0x71   :  { %142 = dma.hbm_to_vmem [thread:$0]  %s10343_s28, 192, %s9422_s27, [#allocation15], %s9230_s29, %s9230_s29, %s9231_s3  }
  0x72   :  { %s9232_s8 = smov [#allocation17]   ;;  %s9233_s14 = smov [#allocation20]  }
  0x73   :  { %s161_s6 = sshll.u32 %s9232_s8, 4  ;;  %s181_s26 = sshll.u32 %s9233_s14, 4  ;;  %s162_s6 = int_to_ptr.vmem [resolvable:$true] %s161_s6  ;;  %s182_s26 = int_to_ptr.vmem [resolvable:$true] %s181_s26 }
  0x74   :  { %s8804_s9 = scalar_lea.hbm %s10293_s11, 16 }
  0x75   :  { %p8805_p4 = scmp.ne.s32.totalorder %s10293_s11, %s8804_s9  ;;  %p8808_p5 = scmp.lt.u32.totalorder %s8804_s9, %s10293_s11 }
  0x77   :  { %p8810_p6 = pnand %p8808_p5, %p8805_p4 }
  0x79   :  { %8813 = shalt.err (!%p8810_p6)
}
  0x7a   :  { %s8814_s27 = scalar_lea.vmem %s162_s6, 16  ;;  %s8818_s28 = scalar_lea.vmem %s162_s6, 32 }
  0x7b   :  { %p8815_p7 = scmp.ne.s32.totalorder %s162_s6, %s8814_s27  ;;  %p8819_p8 = scmp.lt.s32.totalorder %s162_s6, %s162_s6 }
  0x7c   :  { %p8820_p9 = scmp.lt.s32.totalorder %s8818_s28, %s8814_s27 }
  0x7e   :  { %p8821_p10 = por %p8820_p9, %p8819_p8 }
  0x80   :  { %p8822_p11 = pnand %p8821_p10, %p8815_p7 }
  0x82   :  { %8825 = shalt.err (!%p8822_p11)
}
  0x83   :  { %164 = dma.hbm_to_vmem [thread:$0]  %s10293_s11, 16, %s162_s6, [#allocation18]  }
  0x84   :  { %s8826_s4 = scalar_lea.hbm %s10295_s13, 32 }
  0x85   :  { %p8827_p12 = scmp.ne.s32.totalorder %s10295_s13, %s8826_s4  ;;  %p8830_p13 = scmp.lt.u32.totalorder %s8826_s4, %s10295_s13 }
  0x87   :  { %p8832_p0 = pnand %p8830_p13, %p8827_p12 }
  0x89   :  { %8835 = shalt.err (!%p8832_p0)
}
  0x8a   :  { %s8836_s2 = scalar_lea.vmem %s182_s26, 32  ;;  %p8841_p2 = scmp.lt.s32.totalorder %s182_s26, %s182_s26 }
  0x8b   :  { %p8837_p1 = scmp.ne.s32.totalorder %s182_s26, %s8836_s2  ;;  %p8842_p3 = scmp.lt.s32.totalorder %s8836_s2, %s8836_s2 }
  0x8d   :  { %p8843_p4 = por %p8842_p3, %p8841_p2 }
  0x8f   :  { %p8844_p5 = pnand %p8843_p4, %p8837_p1 }
  0x91   :  { %8847 = shalt.err (!%p8844_p5)
}
  0x92   :  { %184 = dma.hbm_to_vmem [thread:$0]  %s10295_s13, 32, %s182_s26, [#allocation21]  }
  0x93   :  { %s9234_s7 = smov [#allocation23]   ;;  %s9235_s28 = smov [#allocation26]  }
  0x94   :  { %s205_s27 = sshll.u32 %s9234_s7, 4  ;;  %s227_s1 = sshll.u32 %s9235_s28, 4  ;;  %s206_s27 = int_to_ptr.vmem [resolvable:$true] %s205_s27  ;;  %s228_s1 = int_to_ptr.vmem [resolvable:$true] %s227_s1 }
  0x95   :  { %s8848_s14 = scalar_lea.hbm %s10299_s17, 32 }
  0x96   :  { %p8849_p6 = scmp.ne.s32.totalorder %s10299_s17, %s8848_s14  ;;  %p8852_p7 = scmp.lt.u32.totalorder %s8848_s14, %s10299_s17 }
  0x98   :  { %p8854_p8 = pnand %p8852_p7, %p8849_p6 }
  0x9a   :  { %8857 = shalt.err (!%p8854_p8)
}
  0x9b   :  { %s8858_s13 = scalar_lea.vmem %s206_s27, 32  ;;  %p8863_p10 = scmp.lt.s32.totalorder %s206_s27, %s206_s27 }
  0x9c   :  { %p8859_p9 = scmp.ne.s32.totalorder %s206_s27, %s8858_s13  ;;  %p8864_p11 = scmp.lt.s32.totalorder %s8858_s13, %s8858_s13 }
  0x9e   :  { %p8865_p12 = por %p8864_p11, %p8863_p10 }
  0xa0   :  { %p8866_p13 = pnand %p8865_p12, %p8859_p9 }
  0xa2   :  { %8869 = shalt.err (!%p8866_p13)
}
  0xa3   :  { %208 = dma.hbm_to_vmem [thread:$0]  %s10299_s17, 32, %s206_s27, [#allocation24]  }
  0xa4   :  { %s8870_s6 = scalar_lea.hbm %s10301_s19, 32 }
  0xa5   :  { %p8871_p0 = scmp.ne.s32.totalorder %s10301_s19, %s8870_s6  ;;  %p8874_p1 = scmp.lt.u32.totalorder %s8870_s6, %s10301_s19 }
  0xa7   :  { %p8876_p2 = pnand %p8874_p1, %p8871_p0 }
  0xa9   :  { %8879 = shalt.err (!%p8876_p2)
}
  0xaa   :  { %s8880_s14 = scalar_lea.vmem %s228_s1, 32  ;;  %p8885_p4 = scmp.lt.s32.totalorder %s228_s1, %s228_s1 }
  0xab   :  { %p8881_p3 = scmp.ne.s32.totalorder %s228_s1, %s8880_s14  ;;  %p8886_p5 = scmp.lt.s32.totalorder %s8880_s14, %s8880_s14 }
  0xad   :  { %p8887_p6 = por %p8886_p5, %p8885_p4 }
  0xaf   :  { %p8888_p7 = pnand %p8887_p6, %p8881_p3 }
  0xb1   :  { %8891 = shalt.err (!%p8888_p7)
}
  0xb2   :  { %230 = dma.hbm_to_vmem [thread:$0]  %s10301_s19, 32, %s228_s1, [#allocation27]  }
  0xb3   :  { %s9236_s4 = smov [#allocation29]   ;;  %s8892_s13 = scalar_lea.hbm %s10303_s21, 48 }
  0xb4   :  { %s246_s5 = sshll.u32 %s9236_s4, 4  ;;  %p8893_p8 = scmp.ne.s32.totalorder %s10303_s21, %s8892_s13  ;;  %s247_s5 = int_to_ptr.vmem [resolvable:$true] %s246_s5 }
  0xb5   :  { %p8896_p9 = scmp.lt.u32.totalorder %s8892_s13, %s10303_s21 }
  0xb7   :  { %p8898_p10 = pnand %p8896_p9, %p8893_p8 }
  0xb9   :  { %8901 = shalt.err (!%p8898_p10)
}
  0xba   :  { %s8902_s6 = scalar_lea.vmem %s247_s5, 48  ;;  %s8906_s19 = scalar_lea.vmem %s247_s5, 64 }
  0xbb   :  { %p8903_p11 = scmp.ne.s32.totalorder %s247_s5, %s8902_s6  ;;  %p8907_p12 = scmp.lt.s32.totalorder %s247_s5, %s247_s5 }
  0xbc   :  { %p8908_p13 = scmp.lt.s32.totalorder %s8906_s19, %s8902_s6 }
  0xbe   :  { %p8909_p0 = por %p8908_p13, %p8907_p12 }
  0xc0   :  { %p8910_p1 = pnand %p8909_p0, %p8903_p11 }
  0xc2   :  { %8913 = shalt.err (!%p8910_p1)
}
  0xc3   :  { %s9237_s1 = smov 16   ;;  %s9238_s7 = smov 1  }
  0xc4   :  { %252 = dma.hbm_to_vmem [thread:$0]  %s10303_s21, 48, %s247_s5, [#allocation30], %s9237_s1, %s9237_s1, %s9238_s7  }
  0xc5   :  { %s9239_s8 = smov [#allocation32]   ;;  %s9240_s17 = smov [#allocation2]  }
  0xc6   :  { %s271_s14 = sshll.u32 %s9239_s8, 4  ;;  %s50_s27 = sshll.u32 %s9240_s17, 4  ;;  %s272_s14 = int_to_ptr.vmem [resolvable:$true] %s271_s14  ;;  %s51_s27 = int_to_ptr.vmem [resolvable:$true] %s50_s27 }
  0xc7   :  { %s8914_s9 = scalar_lea.hbm %s10305_s23, 16 }
  0xc8   :  { %p8915_p2 = scmp.ne.s32.totalorder %s10305_s23, %s8914_s9  ;;  %p8918_p3 = scmp.lt.u32.totalorder %s8914_s9, %s10305_s23 }
  0xca   :  { %p8920_p4 = pnand %p8918_p3, %p8915_p2 }
  0xcc   :  { %8923 = shalt.err (!%p8920_p4)
}
  0xcd   :  { %s8924_s21 = scalar_lea.vmem %s272_s14, 16  ;;  %s8928_s5 = scalar_lea.vmem %s272_s14, 32 }
  0xce   :  { %p8925_p5 = scmp.ne.s32.totalorder %s272_s14, %s8924_s21  ;;  %p8929_p6 = scmp.lt.s32.totalorder %s272_s14, %s272_s14 }
  0xcf   :  { %p8930_p7 = scmp.lt.s32.totalorder %s8928_s5, %s8924_s21 }
  0xd1   :  { %p8931_p8 = por %p8930_p7, %p8929_p6 }
  0xd3   :  { %p8932_p9 = pnand %p8931_p8, %p8925_p5 }
  0xd5   :  { %8935 = shalt.err (!%p8932_p9)
}
  0xd6   :  { %274 = dma.hbm_to_vmem [thread:$0]  %s10305_s23, 16, %s272_s14, [#allocation33]  }
  0xd7   :  { %s10344_s7 = sld [smem:[#allocation49_spill]] }
  0xdd   :  { %s8936_s28 = scalar_lea.hbm %s10344_s7, 3072 }
  0xde   :  { %p8937_p10 = scmp.ne.s32.totalorder %s10344_s7, %s8936_s28  ;;  %p8940_p11 = scmp.lt.u32.totalorder %s8936_s28, %s10344_s7 }
  0xe0   :  { %p8942_p12 = pnand %p8940_p11, %p8937_p10 }
  0xe2   :  { %8945 = shalt.err (!%p8942_p12)
}
  0xe3   :  { %s8946_s0 = scalar_lea.vmem %s51_s27, 3072  ;;  %p8951_p0 = scmp.lt.s32.totalorder %s51_s27, %s51_s27 }
  0xe4   :  { %p8947_p13 = scmp.ne.s32.totalorder %s51_s27, %s8946_s0  ;;  %p8952_p1 = scmp.lt.s32.totalorder %s8946_s0, %s8946_s0 }
  0xe6   :  { %p8953_p2 = por %p8952_p1, %p8951_p0 }
  0xe8   :  { %p8954_p3 = pnand %p8953_p2, %p8947_p13 }
  0xea   :  { %8957 = shalt.err (!%p8954_p3)
}
  0xeb   :  { %56 = dma.hbm_to_vmem [thread:$0]  %s10344_s7, 3072, %s51_s27, [#allocation3], %s9230_s29, %s9230_s29, %s9231_s3  }
  0xec   :  { %s9241_s9 = smov [#allocation7]   ;;  %s9242_s26 = smov [#allocation10]  }
  0xed   :  { %s74_s13 = sshll.u32 %s9241_s9, 4  ;;  %s98_s30 = sshll.u32 %s9242_s26, 4  ;;  %s75_s13 = int_to_ptr.vmem [resolvable:$true] %s74_s13  ;;  %s99_s30 = int_to_ptr.vmem [resolvable:$true] %s98_s30 }
  0xee   :  { %s10345_s5 = sld [smem:[#allocation51_spill]] }
  0xf4   :  { %s8958_s11 = scalar_lea.hbm %s10345_s5, 12288 }
  0xf5   :  { %p8959_p4 = scmp.ne.s32.totalorder %s10345_s5, %s8958_s11  ;;  %p8962_p5 = scmp.lt.u32.totalorder %s8958_s11, %s10345_s5 }
  0xf7   :  { %p8964_p6 = pnand %p8962_p5, %p8959_p4 }
  0xf9   :  { %8967 = shalt.err (!%p8964_p6)
}
  0xfa   :  { %s8968_s27 = scalar_lea.vmem %s75_s13, 12288  ;;  %p8973_p8 = scmp.lt.s32.totalorder %s75_s13, %s75_s13 }
  0xfb   :  { %p8969_p7 = scmp.ne.s32.totalorder %s75_s13, %s8968_s27  ;;  %p8974_p9 = scmp.lt.s32.totalorder %s8968_s27, %s8968_s27 }
  0xfd   :  { %p8975_p10 = por %p8974_p9, %p8973_p8 }
  0xff   :  { %p8976_p11 = pnand %p8975_p10, %p8969_p7 }
 0x101   :  { %8979 = shalt.err (!%p8976_p11)
}
 0x102   :  { %s10346_s7 = smov 128   ;;  %s10347_s0 = sld [smem:[#allocation53_spill]] }
 0x103   :  { %80 = dma.hbm_to_vmem [thread:$0]  %s10345_s5, 12288, %s75_s13, [#allocation6], %s10346_s7, %s10346_s7, %s9226_s10  }
 0x108   :  { %s8980_s23 = scalar_lea.hbm %s10347_s0, 18432 }
 0x109   :  { %p8981_p12 = scmp.ne.s32.totalorder %s10347_s0, %s8980_s23  ;;  %p8984_p13 = scmp.lt.u32.totalorder %s8980_s23, %s10347_s0 }
 0x10b   :  { %p8986_p0 = pnand %p8984_p13, %p8981_p12 }
 0x10d   :  { %8989 = shalt.err (!%p8986_p0)
}
 0x10e   :  { %s8990_s21 = scalar_lea.vmem %s99_s30, 18432  ;;  %p8995_p2 = scmp.lt.s32.totalorder %s99_s30, %s99_s30 }
 0x10f   :  { %p8991_p1 = scmp.ne.s32.totalorder %s99_s30, %s8990_s21  ;;  %p8996_p3 = scmp.lt.s32.totalorder %s8990_s21, %s8990_s21 }
 0x111   :  { %p8997_p4 = por %p8996_p3, %p8995_p2 }
 0x113   :  { %p8998_p5 = pnand %p8997_p4, %p8991_p1 }
 0x115   :  { %9001 = shalt.err (!%p8998_p5)
}
 0x116   :  { %s9243_s13 = smov 192   ;;  %s9244_s5 = smov 12  }
 0x117   :  { %104 = dma.hbm_to_vmem [thread:$0]  %s10347_s0, 18432, %s99_s30, [#allocation9], %s9243_s13, %s9243_s13, %s9244_s5  }
 0x118   :  { %s9245_s19 = smov [#allocation13]   ;;  %s9246_s28 = smov [#allocation16]  }
 0x119   :  { %s124_s1 = sshll.u32 %s9245_s19, 4  ;;  %s148_s27 = sshll.u32 %s9246_s28, 4  ;;  %s125_s1 = int_to_ptr.vmem [resolvable:$true] %s124_s1  ;;  %s149_s27 = int_to_ptr.vmem [resolvable:$true] %s148_s27 }
 0x11a   :  { %s10348_s17 = sld [smem:[#allocation56_spill]] }
 0x120   :  { %s9002_s4 = scalar_lea.hbm %s10348_s17, 384 }
 0x121   :  { %p9003_p6 = scmp.ne.s32.totalorder %s10348_s17, %s9002_s4  ;;  %p9006_p7 = scmp.lt.u32.totalorder %s9002_s4, %s10348_s17 }
 0x123   :  { %p9008_p8 = pnand %p9006_p7, %p9003_p6 }
 0x125   :  { %9011 = shalt.err (!%p9008_p8)
}
 0x126   :  { %s9012_s30 = scalar_lea.vmem %s125_s1, 384  ;;  %p9017_p10 = scmp.lt.s32.totalorder %s125_s1, %s125_s1 }
 0x127   :  { %p9013_p9 = scmp.ne.s32.totalorder %s125_s1, %s9012_s30  ;;  %p9018_p11 = scmp.lt.s32.totalorder %s9012_s30, %s9012_s30 }
 0x129   :  { %p9019_p12 = por %p9018_p11, %p9017_p10 }
 0x12b   :  { %p9020_p13 = pnand %p9019_p12, %p9013_p9 }
 0x12d   :  { %9023 = shalt.err (!%p9020_p13)
}
 0x12e   :  { %130 = dma.hbm_to_vmem [thread:$0]  %s10348_s17, 384, %s125_s1, [#allocation12], %s9230_s29, %s9230_s29, %s9231_s3  }
 0x12f   :  { %s10349_s5 = sld [smem:[#allocation58_spill]] }
 0x135   :  { %s9024_s11 = scalar_lea.hbm %s10349_s5, 192 }
 0x136   :  { %p9025_p0 = scmp.ne.s32.totalorder %s10349_s5, %s9024_s11  ;;  %p9028_p1 = scmp.lt.u32.totalorder %s9024_s11, %s10349_s5 }
 0x138   :  { %p9030_p2 = pnand %p9028_p1, %p9025_p0 }
 0x13a   :  { %9033 = shalt.err (!%p9030_p2)
}
 0x13b   :  { %s9034_s8 = scalar_lea.vmem %s149_s27, 192  ;;  %p9039_p4 = scmp.lt.s32.totalorder %s149_s27, %s149_s27 }
 0x13c   :  { %p9035_p3 = scmp.ne.s32.totalorder %s149_s27, %s9034_s8  ;;  %p9040_p5 = scmp.lt.s32.totalorder %s9034_s8, %s9034_s8 }
 0x13e   :  { %p9041_p6 = por %p9040_p5, %p9039_p4 }
 0x140   :  { %p9042_p7 = pnand %p9041_p6, %p9035_p3 }
 0x142   :  { %9045 = shalt.err (!%p9042_p7)
}
 0x143   :  { %154 = dma.hbm_to_vmem [thread:$0]  %s10349_s5, 192, %s149_s27, [#allocation15], %s9230_s29, %s9230_s29, %s9231_s3  }
 0x144   :  { %s9247_s4 = smov [#allocation19]   ;;  %s9248_s14 = smov [#allocation22]  }
 0x145   :  { %s171_s23 = sshll.u32 %s9247_s4, 4  ;;  %s195_s9 = sshll.u32 %s9248_s14, 4  ;;  %s172_s23 = int_to_ptr.vmem [resolvable:$true] %s171_s23  ;;  %s196_s9 = int_to_ptr.vmem [resolvable:$true] %s195_s9 }
 0x146   :  { %s9046_s0 = scalar_lea.hbm %s10294_s12, 32 }
 0x147   :  { %p9047_p8 = scmp.ne.s32.totalorder %s10294_s12, %s9046_s0  ;;  %p9050_p9 = scmp.lt.u32.totalorder %s9046_s0, %s10294_s12 }
 0x149   :  { %p9052_p10 = pnand %p9050_p9, %p9047_p8 }
 0x14b   :  { %9055 = shalt.err (!%p9052_p10)
}
 0x14c   :  { %s9056_s27 = scalar_lea.vmem %s172_s23, 32  ;;  %p9061_p12 = scmp.lt.s32.totalorder %s172_s23, %s172_s23 }
 0x14d   :  { %p9057_p11 = scmp.ne.s32.totalorder %s172_s23, %s9056_s27  ;;  %p9062_p13 = scmp.lt.s32.totalorder %s9056_s27, %s9056_s27 }
 0x14f   :  { %p9063_p0 = por %p9062_p13, %p9061_p12 }
 0x151   :  { %p9064_p1 = pnand %p9063_p0, %p9057_p11 }
 0x153   :  { %9067 = shalt.err (!%p9064_p1)
}
 0x154   :  { %174 = dma.hbm_to_vmem [thread:$0]  %s10294_s12, 32, %s172_s23, [#allocation18]  }
 0x155   :  { %s9068_s24 = scalar_lea.hbm %s10298_s16, 32 }
 0x156   :  { %p9069_p2 = scmp.ne.s32.totalorder %s10298_s16, %s9068_s24  ;;  %p9072_p3 = scmp.lt.u32.totalorder %s9068_s24, %s10298_s16 }
 0x158   :  { %p9074_p4 = pnand %p9072_p3, %p9069_p2 }
 0x15a   :  { %9077 = shalt.err (!%p9074_p4)
}
 0x15b   :  { %s9078_s14 = scalar_lea.vmem %s196_s9, 32  ;;  %p9083_p6 = scmp.lt.s32.totalorder %s196_s9, %s196_s9 }
 0x15c   :  { %p9079_p5 = scmp.ne.s32.totalorder %s196_s9, %s9078_s14  ;;  %p9084_p7 = scmp.lt.s32.totalorder %s9078_s14, %s9078_s14 }
 0x15e   :  { %p9085_p8 = por %p9084_p7, %p9083_p6 }
 0x160   :  { %p9086_p9 = pnand %p9085_p8, %p9079_p5 }
 0x162   :  { %9089 = shalt.err (!%p9086_p9)
}
 0x163   :  { %198 = dma.hbm_to_vmem [thread:$0]  %s10298_s16, 32, %s196_s9, [#allocation21]  }
 0x164   :  { %s9249_s26 = smov [#allocation25]   ;;  %s9250_s0 = smov [#allocation28]  }
 0x165   :  { %s214_s30 = sshll.u32 %s9249_s26, 4  ;;  %s237_s2 = sshll.u32 %s9250_s0, 4  ;;  %s215_s30 = int_to_ptr.vmem [resolvable:$true] %s214_s30  ;;  %s238_s2 = int_to_ptr.vmem [resolvable:$true] %s237_s2 }
 0x166   :  { %s9090_s11 = scalar_lea.hbm %s10300_s18, 4096 }
 0x167   :  { %p9091_p10 = scmp.ne.s32.totalorder %s10300_s18, %s9090_s11  ;;  %p9094_p11 = scmp.lt.u32.totalorder %s9090_s11, %s10300_s18 }
 0x169   :  { %p9096_p12 = pnand %p9094_p11, %p9091_p10 }
 0x16b   :  { %9099 = shalt.err (!%p9096_p12)
}
 0x16c   :  { %s9100_s16 = scalar_lea.vmem %s215_s30, 4096  ;;  %p9105_p0 = scmp.lt.s32.totalorder %s215_s30, %s215_s30 }
 0x16d   :  { %p9101_p13 = scmp.ne.s32.totalorder %s215_s30, %s9100_s16  ;;  %p9106_p1 = scmp.lt.s32.totalorder %s9100_s16, %s9100_s16 }
 0x16f   :  { %p9107_p2 = por %p9106_p1, %p9105_p0 }
 0x171   :  { %p9108_p3 = pnand %p9107_p2, %p9101_p13 }
 0x173   :  { %9111 = shalt.err (!%p9108_p3)
}
 0x174   :  { %220 = dma.hbm_to_vmem [thread:$0]  %s10300_s18, 4096, %s215_s30, [#allocation24], %s10346_s7, %s10346_s7, %s9226_s10  }
 0x175   :  { %s9112_s1 = scalar_lea.hbm %s10302_s20, 32 }
 0x176   :  { %p9113_p4 = scmp.ne.s32.totalorder %s10302_s20, %s9112_s1  ;;  %p9116_p5 = scmp.lt.u32.totalorder %s9112_s1, %s10302_s20 }
 0x178   :  { %p9118_p6 = pnand %p9116_p5, %p9113_p4 }
 0x17a   :  { %9121 = shalt.err (!%p9118_p6)
}
 0x17b   :  { %s9122_s23 = scalar_lea.vmem %s238_s2, 32  ;;  %p9127_p8 = scmp.lt.s32.totalorder %s238_s2, %s238_s2 }
 0x17c   :  { %p9123_p7 = scmp.ne.s32.totalorder %s238_s2, %s9122_s23  ;;  %p9128_p9 = scmp.lt.s32.totalorder %s9122_s23, %s9122_s23 }
 0x17e   :  { %p9129_p10 = por %p9128_p9, %p9127_p8 }
 0x180   :  { %p9130_p11 = pnand %p9129_p10, %p9123_p7 }
 0x182   :  { %9133 = shalt.err (!%p9130_p11)
}
 0x183   :  { %240 = dma.hbm_to_vmem [thread:$0]  %s10302_s20, 32, %s238_s2, [#allocation27]  }
 0x184   :  { %s9251_s7 = smov [#allocation31]   ;;  %s9252_s30 = smov [#allocation34]  }
 0x185   :  { %s258_s26 = sshll.u32 %s9251_s7, 4  ;;  %s283_s0 = sshll.u32 %s9252_s30, 4  ;;  %s259_s26 = int_to_ptr.vmem [resolvable:$true] %s258_s26  ;;  %s284_s0 = int_to_ptr.vmem [resolvable:$true] %s283_s0 }
 0x186   :  { %s9134_s11 = scalar_lea.hbm %s10304_s22, 9216 }
 0x187   :  { %p9135_p12 = scmp.ne.s32.totalorder %s10304_s22, %s9134_s11  ;;  %p9138_p13 = scmp.lt.u32.totalorder %s9134_s11, %s10304_s22 }
 0x189   :  { %p9140_p0 = pnand %p9138_p13, %p9135_p12 }
 0x18b   :  { %9143 = shalt.err (!%p9140_p0)
}
 0x18c   :  { %s9144_s20 = scalar_lea.vmem %s259_s26, 9216  ;;  %p9149_p2 = scmp.lt.s32.totalorder %s259_s26, %s259_s26 }
 0x18d   :  { %p9145_p1 = scmp.ne.s32.totalorder %s259_s26, %s9144_s20  ;;  %p9150_p3 = scmp.lt.s32.totalorder %s9144_s20, %s9144_s20 }
 0x18f   :  { %p9151_p4 = por %p9150_p3, %p9149_p2 }
 0x191   :  { %p9152_p5 = pnand %p9151_p4, %p9145_p1 }
 0x193   :  { %9155 = shalt.err (!%p9152_p5)
}
 0x194   :  { %264 = dma.hbm_to_vmem [thread:$0]  %s10304_s22, 9216, %s259_s26, [#allocation30], %s9230_s29, %s9230_s29, %s9231_s3  }
 0x195   :  { %s9156_s24 = scalar_lea.hbm %s10307_s25, 16 }
 0x196   :  { %p9157_p6 = scmp.ne.s32.totalorder %s10307_s25, %s9156_s24  ;;  %p9160_p7 = scmp.lt.u32.totalorder %s9156_s24, %s10307_s25 }
 0x198   :  { %p9162_p8 = pnand %p9160_p7, %p9157_p6 }
 0x19a   :  { %9165 = shalt.err (!%p9162_p8)
}
 0x19b   :  { %s9166_s14 = scalar_lea.vmem %s284_s0, 16  ;;  %s9170_s12 = scalar_lea.vmem %s284_s0, 32 }
 0x19c   :  { %p9167_p9 = scmp.ne.s32.totalorder %s284_s0, %s9166_s14  ;;  %p9171_p10 = scmp.lt.s32.totalorder %s284_s0, %s284_s0 }
 0x19d   :  { %p9172_p11 = scmp.lt.s32.totalorder %s9170_s12, %s9166_s14 }
 0x19f   :  { %p9173_p12 = por %p9172_p11, %p9171_p10 }
 0x1a1   :  { %p9174_p13 = pnand %p9173_p12, %p9167_p9 }
 0x1a3   :  { %9177 = shalt.err (!%p9174_p13)
}
 0x1a4   :  { %286 = dma.hbm_to_vmem [thread:$0]  %s10307_s25, 16, %s284_s0, [#allocation33]  }
 0x1a5   :  { %9200 = dma.done.wait [#allocation3], 3072  }
 0x1a6   :  { %9201 = vsyncadd [#allocation3], 4294964224 }
 0x1a7   :  { %9202 = dma.done.wait [#allocation6], 18432  }
 0x1a8   :  { %9203 = vsyncadd [#allocation6], 4294948864 }
 0x1a9   :  { %9204 = dma.done.wait [#allocation9], 30720  }
 0x1aa   :  { %9205 = vsyncadd [#allocation9], 4294936576 }
 0x1ab   :  { %9206 = dma.done.wait [#allocation12], 960  }
 0x1ac   :  { %9207 = vsyncadd [#allocation12], 4294966336 }
 0x1ad   :  { %9208 = dma.done.wait [#allocation15], 384  }
 0x1ae   :  { %9209 = vsyncadd [#allocation15], 4294966912 }
 0x1af   :  { %9210 = dma.done.wait [#allocation18], 48  }
 0x1b0   :  { %9211 = vsyncadd [#allocation18], 4294967248 }
 0x1b1   :  { %9212 = dma.done.wait [#allocation21], 64  }
 0x1b2   :  { %9213 = vsyncadd [#allocation21], 4294967232 }
 0x1b3   :  { %9214 = dma.done.wait [#allocation24], 4128  }
 0x1b4   :  { %9215 = vsyncadd [#allocation24], 4294963168 }
 0x1b5   :  { %9216 = dma.done.wait [#allocation27], 64  }
 0x1b6   :  { %9217 = vsyncadd [#allocation27], 4294967232 }
 0x1b7   :  { %9218 = dma.done.wait [#allocation30], 9264  }
 0x1b8   :  { %9219 = vsyncadd [#allocation30], 4294958032 }
 0x1b9   :  { %9220 = dma.done.wait [#allocation33], 32  }
 0x1ba   :  { %9221 = vsyncadd [#allocation33], 4294967264  ;;  %s10350_s23 = sld [smem:[#allocation48_spill]]  ;;  %vm393_vm0 = vcmask 457728   ;;  %s10351_s21 = sld [smem:[#allocation54_spill]]  ;;  %vm400_vm1 = vcmask 1043456  }
 0x1bb   :  { %v7947_v7 = vld [vmem:[#allocation2 + $0x40] sm:$0xff]   ;;  %v7949_v12 = vld [vmem:[#allocation2 + $0x48] sm:$0xff]   ;;  %v7951_v14 = vld [vmem:[#allocation2 + $0x50] sm:$0xff]   ;;  %vm913_vm2 = vcmask 244736   ;;  %vm920_vm3 = vcmask 1046528   ;;  %vm1597_vm4 = vcmask 1041408  }
 0x1bc   :  { %v7948_v11 = vld [vmem:[#allocation2] sm:$0xff]   ;;  %v7950_v13 = vld [vmem:[#allocation2 + $0x8] sm:$0xff]   ;;  %v7952_v15 = vld [vmem:[#allocation2 + $0x10] sm:$0xff]   ;;  %vm1877_vm5 = vcmask 1040384   ;;  %vm1873_vm6 = vcmask 146432   ;;  %vm2769_vm7 = vcmask 1045504  }
 0x1bd   :  { %v7953_v16 = vld [vmem:[#allocation2 + $0x58] sm:$0xff]   ;;  %v7956_v18 = vld [vmem:[#allocation2 + $0x80] sm:$0xff]   ;;  %v7959_v22 = vld [vmem:[#allocation2 + $0x88] sm:$0xff]   ;;  %vm2765_vm8 = vcmask 97280   ;;  %vm3958_vm9 = vcmask 64512   ;;  %s10353_s12 = sld [smem:[#allocation59_spill]] }
 0x1be   :  { %v7954_v17 = vld [vmem:[#allocation2 + $0x18] sm:$0xff]   ;;  %v7955_v19 = vld [vmem:[#allocation2 + $0x60] sm:$0xff]   ;;  %v7958_v23 = vld [vmem:[#allocation2 + $0x68] sm:$0xff]   ;;  %vm5338_vm10 = vcmask 1042432   ;;  %vm5334_vm11 = vcmask 48128   ;;  %vm9255_vm12 = vmmov 0  }
 0x1bf   :  { %v7957_v21 = vld [vmem:[#allocation2 + $0x20] sm:$0xff]   ;;  %v7960_v24 = vld [vmem:[#allocation2 + $0x28] sm:$0xff]   ;;  %v7962_v25 = vld [vmem:[#allocation2 + $0x90] sm:$0xff]   ;;  %s10354_s25 = sld [smem:[#allocation60_spill]]  ;;  %s9256_s19 = smov [#allocation35]   ;;  %vm6506_vm13 = vcmask 123904  }
 0x1c0   :  { %v7937_v0 = vld [vmem:[%s10350_s23] sm:$0xff]   ;;  %v7938_v1 = vld [vmem:[%s10350_s23 + $0x8] sm:$0xff]   ;;  %v7939_v2 = vld [vmem:[%s10350_s23 + $0x10] sm:$0xff]   ;;  %s6514_s20 = sshll.u32 %s9256_s19, 4  ;;  %s6515_s20 = int_to_ptr.vmem [resolvable:$true] %s6514_s20 }
 0x1c1   :  { %7336 = vmatprep.subr.bf16.mxu0 %v7937_v0  ;;  %7348 = vmatprep.subr.bf16.mxu1 %v7937_v0  ;;  %v7941_v3 = vld [vmem:[%s10351_s21] sm:$0xff]   ;;  %v7942_v4 = vld [vmem:[%s10351_s21 + $0x10] sm:$0xff]   ;;  %v7940_v5 = vld [vmem:[%s10350_s23 + $0x18] ss:$0 sps:$4 sm:$0xff]   ;;  %s9178_s2 = scalar_lea.vmem %s6515_s20, 32  ;;  %p9183_p1 = scmp.lt.s32.totalorder %s6515_s20, %s6515_s20 }
 0x1c2   :  { %7337 = vmatpush3.bf16.msra.mxu0 %v7937_v0  ;;  %7349 = vmatpush3.bf16.msra.mxu1 %v7937_v0  ;;  %v402_v6 = vsel %vm400_vm1, %v7940_v5, 0  ;;  %v7943_v8 = vld [vmem:[%s10351_s21 + $0x8] sm:$0x7f]   ;;  %v7944_v9 = vld [vmem:[%s10351_s21 + $0x18] sm:$0x7f]   ;;  %v7945_v10 = vld [vmem:[%s10351_s21 + $0x20] sm:$0xff]   ;;  %p9179_p0 = scmp.ne.s32.totalorder %s6515_s20, %s9178_s2  ;;  %p9184_p2 = scmp.lt.s32.totalorder %s9178_s2, %s9178_s2 }
 0x1c3   :  { %7338 = vmatprep.subr.bf16.mxu0 %v7938_v1  ;;  %7350 = vmatprep.subr.bf16.mxu1 %v7938_v1  ;;  %v7946_v20 = vld [vmem:[%s10351_s21 + $0x28] sm:$0x7f]   ;;  %v7961_v26 = vld [vmem:[#allocation2 + $0x70] sm:$0xff]   ;;  %v7964_v28 = vld [vmem:[#allocation2 + $0x78] sm:$0xff]  }
 0x1c4   :  { %7344 = vmatprep.mubr.msk.bf16.mxu0 %vm393_vm0, %v7941_v3  ;;  %7356 = vmatprep.mubr.msk.bf16.mxu1 %vm393_vm0, %v7942_v4  ;;  %v7963_v27 = vld [vmem:[#allocation2 + $0x30] sm:$0xff]   ;;  %v7965_v29 = vld [vmem:[#allocation2 + $0x98] sm:$0xff]   ;;  %v7967_v31 = vld [vmem:[#allocation2 + $0xa0] sm:$0xff]   ;;  %p9185_p3 = por %p9184_p2, %p9183_p1 }
 0x1c5   :  { %v7966_v30 = vld [vmem:[#allocation2 + $0x38] sm:$0xff]   ;;  %v7968_v32 = vld [vmem:[#allocation2 + $0xa8] sm:$0xff]   ;;  %v7969_v33 = vld [vmem:[#allocation2 + $0xb0] sm:$0xff]  }
 0x1c6   :  { %7339 = vmatpush3.bf16.msra.mxu0 %v7938_v1  ;;  %7351 = vmatpush3.bf16.msra.mxu1 %v7938_v1  ;;  %v7970_v34 = vld [vmem:[#allocation2 + $0xb8] sm:$0xff]   ;;  %v7971_v53 = vld [vmem:[#allocation11] sm:$0xff]   ;;  %v6557_v3 = vld [vmem:[#allocation17] ss:$0 sm:$0xff]  ;;  %p9186_p4 = pnand %p9185_p3, %p9179_p0 }
 0x1c7   :  { %7340 = vmatprep.subr.bf16.mxu0 %v7939_v2  ;;  %7352 = vmatprep.subr.bf16.mxu1 %v7939_v2  ;;  %v7975_v54 = vld [vmem:[#allocation11 + $0x18] sm:$0xff]  }
 0x1ca   :  { %7341 = vmatpush3.bf16.msra.mxu0 %v7939_v2  ;;  %7353 = vmatpush3.bf16.msra.mxu1 %v7939_v2 }
 0x1cb   :  { %7770 = vmatprep.subr.msk.bf16.mxu0 %vm400_vm1, %v7940_v5  ;;  %7771 = vmatprep.subr.msk.bf16.mxu1 %vm400_vm1, %v7940_v5 }
 0x1ce   :  { %7343 = vmatpush3.bf16.msra.mxu0 %v402_v6  ;;  %7355 = vmatpush3.bf16.msra.mxu1 %v402_v6 }
 0x1cf   :  { %7360 = vmatprep.subr.bf16.mxu0 %v7937_v0  ;;  %7108 = vmatprep.subr.bf16.mxu1 %v7947_v7 }
 0x1d1   :  { %7345 = vmatmul.mubr.msk.bf16.vlgmr.msra.gmra.mrb[0].mxu0 %vm393_vm0, %v7943_v8  ;;  %7357 = vmatmul.mubr.msk.bf16.vlgmr.msra.gmra.mrb[0].mxu1 %vm393_vm0, %v7944_v9 }
 0x1d2   :  { %7361 = vmatpush3.bf16.msra.mxu0 %v7937_v0  ;;  %7368 = vmatprep.mubr.msk.bf16.mxu0 %vm393_vm0, %v7945_v10 }
 0x1d3   :  { %7362 = vmatprep.subr.bf16.mxu0 %v7938_v1  ;;  %7109 = vmatpush3.bf16.msra.mxu1 %v7948_v11 }
 0x1d4   :  { %7110 = vmatprep.subr.bf16.mxu1 %v7949_v12 }
 0x1d6   :  { %7363 = vmatpush3.bf16.msra.mxu0 %v7938_v1 }
 0x1d7   :  { %7364 = vmatprep.subr.bf16.mxu0 %v7939_v2  ;;  %7111 = vmatpush3.bf16.msra.mxu1 %v7950_v13 }
 0x1d8   :  { %7112 = vmatprep.subr.bf16.mxu1 %v7951_v14 }
 0x1da   :  { %7365 = vmatpush3.bf16.msra.mxu0 %v7939_v2 }
 0x1db   :  { %7772 = vmatprep.subr.msk.bf16.mxu0 %vm400_vm1, %v7940_v5  ;;  %7113 = vmatpush3.bf16.msra.mxu1 %v7952_v15 }
 0x1dc   :  { %7114 = vmatprep.subr.bf16.mxu1 %v7953_v16 }
 0x1de   :  { %7367 = vmatpush3.bf16.msra.mxu0 %v402_v6 }
 0x1df   :  { %7115 = vmatpush3.bf16.msra.mxu1 %v7954_v17  ;;  %7372 = vmatprep.subr.bf16.mxu0 %v7956_v18 }
 0x1e0   :  { %7116 = vmatprep.subr.bf16.mxu1 %v7955_v19 }
 0x1e1   :  { %7369 = vmatmul.mubr.msk.bf16.vlgmr.msra.gmra.mrb[4].mxu0 %vm393_vm0, %v7946_v20 }
 0x1e2   :  { %7373 = vmatpush3.bf16.msra.mxu0 %v7956_v18 }
 0x1e3   :  { %7117 = vmatpush3.bf16.msra.mxu1 %v7957_v21  ;;  %7374 = vmatprep.subr.bf16.mxu0 %v7959_v22 }
 0x1e4   :  { %7118 = vmatprep.subr.bf16.mxu1 %v7958_v23 }
 0x1e6   :  { %7375 = vmatpush3.bf16.msra.mxu0 %v7959_v22  ;;  %v7972_v22 = vld [vmem:[#allocation11 + $0x8] ss:$0 sps:$4 sm:$0x11]  }
 0x1e7   :  { %7119 = vmatpush3.bf16.msra.mxu1 %v7960_v24  ;;  %7376 = vmatprep.subr.bf16.mxu0 %v7962_v25  ;;  %v7976_v24 = vld [vmem:[#allocation11 + $0x20] ss:$0 sps:$4 sm:$0x11]  }
 0x1e8   :  { %7120 = vmatprep.subr.bf16.mxu1 %v7961_v26  ;;  %v7979_v26 = vld [vmem:[#allocation5 + $0x4] ss:$8 sps:$4 sm:$0xff]  }
 0x1ea   :  { %7377 = vmatpush3.bf16.msra.mxu0 %v7962_v25  ;;  %v7973_v25 = vld [vmem:[#allocation11 + $0xc] sm:$0xff]  }
 0x1eb   :  { %7121 = vmatpush3.bf16.msra.mxu1 %v7963_v27  ;;  %7378 = vmatprep.subr.bf16.mxu0 %v7965_v29  ;;  %v7974_v27 = vld [vmem:[#allocation11 + $0x14] ss:$0 sps:$4 sm:$0x11]  }
 0x1ec   :  { %7122 = vmatprep.subr.bf16.mxu1 %v7964_v28  ;;  %v7977_v28 = vld [vmem:[#allocation5] ss:$8 sps:$4 sm:$0xff]  }
 0x1ee   :  { %7379 = vmatpush3.bf16.msra.mxu0 %v7965_v29  ;;  %v7982_v29 = vld [vmem:[#allocation5 + $0x14] ss:$8 sps:$4 sm:$0xff]  }
 0x1ef   :  { %7123 = vmatpush3.bf16.msra.mxu1 %v7966_v30  ;;  %7380 = vmatprep.subr.bf16.mxu0 %v7967_v31  ;;  %v7980_v30 = vld [vmem:[#allocation5 + $0x10] ss:$8 sps:$4 sm:$0xff]  }
 0x1f2   :  { %7381 = vmatpush3.bf16.msra.mxu0 %v7967_v31  ;;  %v7985_v31 = vld [vmem:[#allocation5 + $0x24] ss:$8 sps:$4 sm:$0xff]  }
 0x1f3   :  { %7382 = vmatprep.subr.bf16.mxu0 %v7968_v32 }
 0x1f6   :  { %7383 = vmatpush3.bf16.msra.mxu0 %v7968_v32  ;;  %v7983_v32 = vld [vmem:[#allocation5 + $0x20] ss:$8 sps:$4 sm:$0xff]  }
 0x1f7   :  { %7384 = vmatprep.subr.bf16.mxu0 %v7969_v33 }
 0x1fa   :  { %7385 = vmatpush3.bf16.msra.mxu0 %v7969_v33  ;;  %v7988_v33 = vld [vmem:[#allocation5 + $0x34] ss:$8 sps:$4 sm:$0xff]  }
 0x1fb   :  { %7386 = vmatprep.subr.bf16.mxu0 %v7970_v34 }
 0x1fe   :  { %7387 = vmatpush3.bf16.msra.mxu0 %v7970_v34  ;;  %v7986_v34 = vld [vmem:[#allocation5 + $0x30] ss:$8 sps:$4 sm:$0xff]  }
 0x2a4   :  { %v7346_v35 = vpop.f32.mrb[0].mxu0  ;;  %v7358_v36 = vpop.f32.mrb[0].mxu1 }
 0x2a5   :  { %v438_v37 = vpop.f32.mrb[1].mxu0  ;;  %v510_v38 = vpop.f32.mrb[1].mxu1 }
 0x2a6   :  { %v7347_v39 = vpop.f32.mrb[2].mxu0  ;;  %v7359_v40 = vpop.f32.mrb[2].mxu1 }
 0x2a7   :  { %v454_v41 = vpack.c.bf16 %v7347_v39, %v7346_v35  ;;  %v526_v42 = vpack.c.bf16 %v7359_v40, %v7358_v36  ;;  %v441_v43 = vpop.f32.mrb[3].mxu0  ;;  %v513_v44 = vpop.f32.mrb[3].mxu1  ;;  %v7991_v35 = vld [vmem:[#allocation5 + $0x44] ss:$8 sps:$4 sm:$0xff]   ;;  %v7989_v36 = vld [vmem:[#allocation5 + $0x40] ss:$8 sps:$4 sm:$0xff]  }
 0x2a8   :  { %v453_v45 = vpack.c.bf16 %v441_v43, %v438_v37  ;;  %v525_v46 = vpack.c.bf16 %v513_v44, %v510_v38  ;;  %v7994_v37 = vld [vmem:[#allocation5 + $0x54] ss:$8 sps:$4 sm:$0xff]   ;;  %v7992_v38 = vld [vmem:[#allocation5 + $0x50] ss:$8 sps:$4 sm:$0xff]   ;;  %v7997_v39 = vld [vmem:[#allocation5 + $0x64] ss:$8 sps:$4 sm:$0xff]  }
 0x2a9   :  { %v7995_v40 = vld [vmem:[#allocation5 + $0x60] ss:$8 sps:$4 sm:$0xff]   ;;  %v8003_v43 = vld [vmem:[#allocation5 + $0x84] ss:$8 sps:$4 sm:$0xff]  }
 0x2aa   :  { %830 = vmatprep.mubr.bf16.mxu1 %v525_v46  ;;  %v8001_v44 = vld [vmem:[#allocation5 + $0x80] ss:$8 sps:$4 sm:$0xff]   ;;  %v8004_v46 = vld [vmem:[#allocation5 + $0x90] ss:$8 sps:$4 sm:$0xff]  }
 0x2ab   :  { %831 = vmatmul.mubr.bf16.vlgmr.msra.gmra.mrb[4].mxu1 %v453_v45  ;;  %v8006_v45 = vld [vmem:[#allocation5 + $0x94] ss:$8 sps:$4 sm:$0xff]  }
 0x2ac   :  { %838 = vmatprep.mubr.bf16.mxu1 %v526_v42  ;;  %v7998_v42 = vld [vmem:[#allocation5 + $0x70] ss:$8 sps:$4 sm:$0xff]  }
 0x2b3   :  { %839 = vmatmul.mubr.bf16.gmra.mrb[8].mxu1 %v454_v41  ;;  %v8000_v41 = vld [vmem:[#allocation5 + $0x74] ss:$8 sps:$4 sm:$0xff]  }
 0x2b4   :  { %v7370_v47 = vpop.f32.mrb[4].mxu0  ;;  %7412 = vmatprep.mubr.msk.bf16.mxu1 %vm913_vm2, %v7975_v54  ;;  %v8016_v54 = vld [vmem:[#allocation5 + $0xd0] ss:$8 sps:$4 sm:$0xff]  }
 0x2b5   :  { %v582_v48 = vpop.f32.mrb[5].mxu0 }
 0x2b6   :  { %v7371_v49 = vpop.f32.mrb[6].mxu0 }
 0x2b7   :  { %v598_v50 = vpack.c.bf16 %v7371_v49, %v7370_v47  ;;  %v585_v51 = vpop.f32.mrb[7].mxu0  ;;  %v8009_v47 = vld [vmem:[#allocation5 + $0xa4] ss:$8 sps:$4 sm:$0xff]   ;;  %v8012_v49 = vld [vmem:[#allocation5 + $0xb4] ss:$8 sps:$4 sm:$0xff]  }
 0x2b8   :  { %v597_v52 = vpack.c.bf16 %v585_v51, %v582_v48  ;;  %v8007_v48 = vld [vmem:[#allocation5 + $0xa0] ss:$8 sps:$4 sm:$0xff]   ;;  %v8015_v51 = vld [vmem:[#allocation5 + $0xc4] ss:$8 sps:$4 sm:$0xff]  }
 0x2ba   :  { %7388 = vmatprep.mubr.bf16.mxu0 %v597_v52  ;;  %v8013_v52 = vld [vmem:[#allocation5 + $0xc0] ss:$8 sps:$4 sm:$0xff]  }
 0x2bb   :  { %7389 = vmatmul.mubr.bf16.vlgmr.msra.gmra.mrb[8].mxu0 %v598_v50  ;;  %v8010_v50 = vld [vmem:[#allocation5 + $0xb0] ss:$8 sps:$4 sm:$0xff]  }
 0x2bc   :  { %7396 = vmatprep.mubr.msk.bf16.mxu0 %vm913_vm2, %v7971_v53  ;;  %v8018_v53 = vld [vmem:[#allocation5 + $0xd4] ss:$8 sps:$4 sm:$0xff]  }
 0x37e   :  { %v7124_v55 = vpop.f32.mrb[4].mxu1 }
 0x37f   :  { %v7125_v56 = vpop.f32.mrb[5].mxu1 }
 0x380   :  { %v7126_v57 = vadd.f32 %v7125_v56, %v7124_v55  ;;  %v7127_v58 = vpop.f32.mrb[6].mxu1  ;;  %v8019_v55 = vld [vmem:[#allocation5 + $0xe0] ss:$8 sps:$4 sm:$0xff]   ;;  %v8021_v56 = vld [vmem:[#allocation5 + $0xe4] ss:$8 sps:$4 sm:$0xff]  }
 0x381   :  { %v7128_v59 = vpop.f32.mrb[7].mxu1 }
 0x382   :  { %v7129_v60 = vadd.f32 %v7128_v59, %v7127_v58  ;;  %v833_v6 = vadd.f32 %v7126_v57, %v6557_v3  ;;  %v8024_v57 = vld [vmem:[#allocation5 + $0xf4] ss:$8 sps:$4 sm:$0xff]   ;;  %v8022_v58 = vld [vmem:[#allocation5 + $0xf0] ss:$8 sps:$4 sm:$0xff]   ;;  %v8027_v59 = vld [vmem:[#allocation5 + $0x104] ss:$8 sps:$4 sm:$0xff]  }
 0x384   :  { %v836_v12 = vadd.f32 %v7129_v60, %v6557_v3  ;;  %v9730_v60 = vld [vmem:[%s10297_s15 + $0x4] ss:$8 sps:$4 sm:$0xff]  }
 0x386   :  { %v7130_v61 = vpop.f32.mrb[8].mxu1 }
 0x387   :  { %v7131_v62 = vpop.f32.mrb[9].mxu1 }
 0x388   :  { %v7132_v63 = vadd.f32 %v7131_v62, %v7130_v61  ;;  %v7133_v0 = vpop.f32.mrb[10].mxu1  ;;  %v9735_v61 = vld [vmem:[%s10297_s15] ss:$8 sps:$4 sm:$0xff]   ;;  %v9740_v62 = vld [vmem:[%s10297_s15 + $0x14] ss:$8 sps:$4 sm:$0xff]  }
 0x389   :  { %v7134_v1 = vpop.f32.mrb[11].mxu1 }
 0x38a   :  { %v7135_v2 = vadd.f32 %v7134_v1, %v7133_v0  ;;  %v841_v4 = vadd.f32 %v7132_v63, %v6557_v3  ;;  %v9747_v63 = vld [vmem:[%s10297_s15 + $0x10] ss:$8 sps:$4 sm:$0xff]   ;;  %v9753_v0 = vld [vmem:[%s10297_s15 + $0x24] ss:$8 sps:$4 sm:$0xff]   ;;  %v9759_v1 = vld [vmem:[%s10297_s15 + $0x20] ss:$8 sps:$4 sm:$0xff]  }
 0x38c   :  { %v844_v9 = vadd.f32 %v7135_v2, %v6557_v3  ;;  %v9765_v2 = vld [vmem:[%s10297_s15 + $0x34] ss:$8 sps:$4 sm:$0xff]   ;;  %v9771_v3 = vld [vmem:[%s10297_s15 + $0x30] ss:$8 sps:$4 sm:$0xff]  }
 0x38e   :  { %v7390_v5 = vpop.f32.mrb[8].mxu0 }
 0x38f   :  { %v890_v7 = vadd.f32 %v7390_v5, %v841_v4  ;;  %v881_v8 = vpop.f32.mrb[9].mxu0  ;;  %v9777_v4 = vld [vmem:[%s10297_s15 + $0x44] ss:$8 sps:$4 sm:$0xff]   ;;  %v9783_v5 = vld [vmem:[%s10297_s15 + $0x40] ss:$8 sps:$4 sm:$0xff]  }
 0x390   :  { %v882_v10 = vadd.f32 %v881_v8, %v833_v6  ;;  %v7391_v11 = vpop.f32.mrb[10].mxu0  ;;  %v9789_v6 = vld [vmem:[%s10297_s15 + $0x54] ss:$8 sps:$4 sm:$0xff]   ;;  %v9801_v8 = vld [vmem:[%s10297_s15 + $0x64] ss:$8 sps:$4 sm:$0xff]  }
 0x391   :  { %v893_v13 = vadd.f32 %v7391_v11, %v844_v9  ;;  %v884_v14 = vpop.f32.mrb[11].mxu0  ;;  %v898_v16 = vmax.f32 %v890_v7, 0.0  ;;  %v9795_v7 = vld [vmem:[%s10297_s15 + $0x50] ss:$8 sps:$4 sm:$0xff]   ;;  %v9807_v9 = vld [vmem:[%s10297_s15 + $0x60] ss:$8 sps:$4 sm:$0xff]  }
 0x392   :  { %v885_v15 = vadd.f32 %v884_v14, %v836_v12  ;;  %v896_v18 = vmax.f32 %v882_v10, 0.0  ;;  %v9813_v10 = vld [vmem:[%s10297_s15 + $0x74] ss:$8 sps:$4 sm:$0xff]   ;;  %v9819_v11 = vld [vmem:[%s10297_s15 + $0x70] ss:$8 sps:$4 sm:$0xff]  }
 0x393   :  { %v899_v17 = vmax.f32 %v893_v13, 0.0  ;;  %v9825_v12 = vld [vmem:[%s10297_s15 + $0x84] ss:$8 sps:$4 sm:$0xff]   ;;  %v9831_v13 = vld [vmem:[%s10297_s15 + $0x80] ss:$8 sps:$4 sm:$0xff]  }
 0x394   :  { %v897_v19 = vmax.f32 %v885_v15, 0.0  ;;  %v9837_v14 = vld [vmem:[%s10297_s15 + $0x94] ss:$8 sps:$4 sm:$0xff]   ;;  %v9843_v15 = vld [vmem:[%s10297_s15 + $0x90] ss:$8 sps:$4 sm:$0xff]  }
 0x395   :  { %v901_v20 = vpack.c.bf16 %v899_v17, %v898_v16 }
 0x396   :  { %v900_v21 = vpack.c.bf16 %v897_v19, %v896_v18 }
 0x397   :  { %v922_v23 = vsel %vm920_vm3, %v901_v20, 0 }
 0x398   :  { %7392 = vmatprep.subr.bf16.mxu0 %v900_v21  ;;  %7408 = vmatprep.subr.bf16.mxu1 %v900_v21 }
 0x399   :  { %7393 = vmatpush3.bf16.msra.mxu0 %v900_v21  ;;  %7409 = vmatpush3.bf16.msra.mxu1 %v900_v21 }
 0x39a   :  { %7773 = vmatprep.subr.msk.bf16.mxu0 %vm920_vm3, %v901_v20  ;;  %7775 = vmatprep.subr.msk.bf16.mxu1 %vm920_vm3, %v901_v20 }
 0x39d   :  { %7395 = vmatpush3.bf16.msra.mxu0 %v922_v23  ;;  %7411 = vmatpush3.bf16.msra.mxu1 %v922_v23 }
 0x39e   :  { %7400 = vmatprep.subr.bf16.mxu0 %v900_v21  ;;  %7475 = vmatprep.subr.bf16.mxu1 %v9730_v60 }
 0x3a0   :  { %7397 = vmatmul.mubr.msk.bf16.vlgmr.msra.gmra.mrb[12].mxu0 %vm913_vm2, %v7972_v22  ;;  %7413 = vmatmul.mubr.msk.bf16.vlgmr.msra.gmra.mrb[12].mxu1 %vm913_vm2, %v7976_v24 }
 0x3a1   :  { %7401 = vmatpush3.bf16.msra.mxu0 %v900_v21  ;;  %7404 = vmatprep.mubr.msk.bf16.mxu0 %vm913_vm2, %v7973_v25 }
 0x3a2   :  { %7774 = vmatprep.subr.msk.bf16.mxu0 %vm920_vm3, %v901_v20  ;;  %7477 = vmatpush1.bf16.msra.mxu1 %v9735_v61 }
 0x3a3   :  { %7479 = vmatprep.subr.bf16.mxu1 %v9740_v62 }
 0x3a5   :  { %7403 = vmatpush3.bf16.msra.mxu0 %v922_v23 }
 0x3a6   :  { %1398 = vmatprep.subr.bf16.mxu0 %v7979_v26  ;;  %7481 = vmatpush1.bf16.msra.mxu1 %v9747_v63 }
 0x3a7   :  { %7483 = vmatprep.subr.bf16.mxu1 %v9753_v0 }
 0x3a8   :  { %7405 = vmatmul.mubr.msk.bf16.vlgmr.msra.gmra.mrb[16].mxu0 %vm913_vm2, %v7974_v27 }
 0x3a9   :  { %1399 = vmatpush1.bf16.msra.mxu0 %v7977_v28 }
 0x3aa   :  { %1400 = vmatprep.subr.bf16.mxu0 %v7982_v29  ;;  %7485 = vmatpush1.bf16.msra.mxu1 %v9759_v1 }
 0x3ab   :  { %7487 = vmatprep.subr.bf16.mxu1 %v9765_v2 }
 0x3ad   :  { %1401 = vmatpush1.bf16.msra.mxu0 %v7980_v30 }
 0x3ae   :  { %1402 = vmatprep.subr.bf16.mxu0 %v7985_v31  ;;  %7489 = vmatpush1.bf16.msra.mxu1 %v9771_v3  ;;  %v8025_v31 = vld [vmem:[#allocation5 + $0x100] ss:$8 sps:$4 sm:$0xff]  }
 0x3af   :  { %7491 = vmatprep.subr.bf16.mxu1 %v9777_v4 }
 0x3b1   :  { %1403 = vmatpush1.bf16.msra.mxu0 %v7983_v32  ;;  %v8030_v32 = vld [vmem:[#allocation5 + $0x114] ss:$8 sps:$4 sm:$0xff]  }
 0x3b2   :  { %1404 = vmatprep.subr.bf16.mxu0 %v7988_v33  ;;  %7493 = vmatpush1.bf16.msra.mxu1 %v9783_v5 }
 0x3b3   :  { %7495 = vmatprep.subr.bf16.mxu1 %v9789_v6 }
 0x3b5   :  { %1405 = vmatpush1.bf16.msra.mxu0 %v7986_v34  ;;  %v8028_v34 = vld [vmem:[#allocation5 + $0x110] ss:$8 sps:$4 sm:$0xff]  }
 0x3b6   :  { %1406 = vmatprep.subr.bf16.mxu0 %v7991_v35  ;;  %7497 = vmatpush1.bf16.msra.mxu1 %v9795_v7  ;;  %v8033_v35 = vld [vmem:[#allocation5 + $0x124] ss:$8 sps:$4 sm:$0xff]  }
 0x3b7   :  { %7499 = vmatprep.subr.bf16.mxu1 %v9801_v8 }
 0x3b9   :  { %1407 = vmatpush1.bf16.msra.mxu0 %v7989_v36  ;;  %v8031_v36 = vld [vmem:[#allocation5 + $0x120] ss:$8 sps:$4 sm:$0xff]  }
 0x3ba   :  { %1408 = vmatprep.subr.bf16.mxu0 %v7994_v37  ;;  %7501 = vmatpush1.bf16.msra.mxu1 %v9807_v9 }
 0x3bb   :  { %7503 = vmatprep.subr.bf16.mxu1 %v9813_v10 }
 0x3bd   :  { %1409 = vmatpush1.bf16.msra.mxu0 %v7992_v38  ;;  %v8036_v38 = vld [vmem:[#allocation5 + $0x134] ss:$8 sps:$4 sm:$0xff]  }
 0x3be   :  { %1410 = vmatprep.subr.bf16.mxu0 %v7997_v39  ;;  %7505 = vmatpush1.bf16.msra.mxu1 %v9819_v11  ;;  %v8034_v39 = vld [vmem:[#allocation5 + $0x130] ss:$8 sps:$4 sm:$0xff]  }
 0x3bf   :  { %7507 = vmatprep.subr.bf16.mxu1 %v9825_v12 }
 0x3c1   :  { %1411 = vmatpush1.bf16.msra.mxu0 %v7995_v40  ;;  %v10324_v40 = vmov 0  }
 0x3c2   :  { %1412 = vmatprep.subr.bf16.mxu0 %v8000_v41  ;;  %7509 = vmatpush1.bf16.msra.mxu1 %v9831_v13  ;;  %v8039_v41 = vld [vmem:[#allocation5 + $0x144] ss:$8 sps:$4 sm:$0xff]  }
 0x3c3   :  { %7511 = vmatprep.subr.bf16.mxu1 %v9837_v14 }
 0x3c5   :  { %1413 = vmatpush1.bf16.msra.mxu0 %v7998_v42  ;;  %v8037_v42 = vld [vmem:[#allocation5 + $0x140] ss:$8 sps:$4 sm:$0xff]  }
 0x3c6   :  { %1414 = vmatprep.subr.bf16.mxu0 %v8003_v43  ;;  %7513 = vmatpush1.bf16.msra.mxu1 %v9843_v15  ;;  %v8042_v43 = vld [vmem:[#allocation5 + $0x154] ss:$8 sps:$4 sm:$0xff]  }
 0x3c9   :  { %1415 = vmatpush1.bf16.msra.mxu0 %v8001_v44  ;;  %v8040_v44 = vld [vmem:[#allocation5 + $0x150] ss:$8 sps:$4 sm:$0xff]  }
 0x3ca   :  { %1416 = vmatprep.subr.bf16.mxu0 %v8006_v45  ;;  %v8045_v45 = vld [vmem:[#allocation5 + $0x164] ss:$8 sps:$4 sm:$0xff]  }
 0x3cd   :  { %1417 = vmatpush1.bf16.msra.mxu0 %v8004_v46  ;;  %v8043_v46 = vld [vmem:[#allocation5 + $0x160] ss:$8 sps:$4 sm:$0xff]  }
 0x3ce   :  { %1418 = vmatprep.subr.bf16.mxu0 %v8009_v47  ;;  %v8048_v47 = vld [vmem:[#allocation5 + $0x174] ss:$8 sps:$4 sm:$0xff]  }
 0x3d1   :  { %1419 = vmatpush1.bf16.msra.mxu0 %v8007_v48  ;;  %v8046_v48 = vld [vmem:[#allocation5 + $0x170] ss:$8 sps:$4 sm:$0xff]  }
 0x3d2   :  { %1420 = vmatprep.subr.bf16.mxu0 %v8012_v49 }
 0x3d5   :  { %1421 = vmatpush1.bf16.msra.mxu0 %v8010_v50  ;;  %v9853_v50 = vld [vmem:[%s10297_s15 + $0xa4] ss:$8 sps:$4 sm:$0xff]  }
 0x3d6   :  { %1422 = vmatprep.subr.bf16.mxu0 %v8015_v51  ;;  %v9858_v51 = vld [vmem:[%s10297_s15 + $0xa0] ss:$8 sps:$4 sm:$0xff]   ;;  %7515 = vmatprep.subr.bf16.mxu1 %v9853_v50 }
 0x3d7   :  { %7517 = vmatpush1.bf16.msra.mxu1 %v9858_v51 }
 0x3d9   :  { %1423 = vmatpush1.bf16.msra.mxu0 %v8013_v52  ;;  %v9865_v52 = vld [vmem:[%s10297_s15 + $0xb4] ss:$8 sps:$4 sm:$0xff]  }
 0x3da   :  { %1424 = vmatprep.subr.bf16.mxu0 %v8018_v53  ;;  %v9870_v53 = vld [vmem:[%s10297_s15 + $0xb0] ss:$8 sps:$4 sm:$0xff]   ;;  %7519 = vmatprep.subr.bf16.mxu1 %v9865_v52 }
 0x3db   :  { %7521 = vmatpush1.bf16.msra.mxu1 %v9870_v53 }
 0x3dd   :  { %1425 = vmatpush1.bf16.msra.mxu0 %v8016_v54  ;;  %v9877_v54 = vld [vmem:[%s10297_s15 + $0xc4] ss:$8 sps:$4 sm:$0xff]  }
 0x3de   :  { %1426 = vmatprep.subr.bf16.mxu0 %v8021_v56  ;;  %7523 = vmatprep.subr.bf16.mxu1 %v9877_v54  ;;  %v9889_v56 = vld [vmem:[%s10297_s15 + $0xd4] ss:$8 sps:$4 sm:$0xff]  }
 0x3e1   :  { %1427 = vmatpush1.bf16.msra.mxu0 %v8019_v55  ;;  %v9882_v55 = vld [vmem:[%s10297_s15 + $0xc0] ss:$8 sps:$4 sm:$0xff]  }
 0x3e2   :  { %1428 = vmatprep.subr.bf16.mxu0 %v8024_v57  ;;  %7525 = vmatpush1.bf16.msra.mxu1 %v9882_v55  ;;  %v9894_v57 = vld [vmem:[%s10297_s15 + $0xd0] ss:$8 sps:$4 sm:$0xff]  }
 0x3e3   :  { %7527 = vmatprep.subr.bf16.mxu1 %v9889_v56 }
 0x3e5   :  { %1429 = vmatpush1.bf16.msra.mxu0 %v8022_v58  ;;  %v9901_v58 = vld [vmem:[%s10297_s15 + $0xe4] ss:$8 sps:$4 sm:$0xff]  }
 0x3e6   :  { %1449 = vmatprep.subr.bf16.mxu0 %v8027_v59  ;;  %7529 = vmatpush1.bf16.msra.mxu1 %v9894_v57  ;;  %v9906_v59 = vld [vmem:[%s10297_s15 + $0xe0] ss:$8 sps:$4 sm:$0xff]  }
 0x3e7   :  { %7531 = vmatprep.subr.bf16.mxu1 %v9901_v58 }
 0x3ea   :  { %7533 = vmatpush1.bf16.msra.mxu1 %v9906_v59 }
 0x473   :  { %v7398_v16 = vpop.f32.mrb[12].mxu0  ;;  %v7414_v17 = vpop.f32.mrb[12].mxu1 }
 0x474   :  { %v958_v18 = vpop.f32.mrb[13].mxu0  ;;  %v1094_v19 = vpop.f32.mrb[13].mxu1  ;;  %v973_v37 = vpack.c.bf16 %v7398_v16, %v7398_v16  ;;  %v1109_v49 = vpack.c.bf16 %v7414_v17, %v7414_v17  ;;  %v9913_v16 = vld [vmem:[%s10297_s15 + $0xf4] ss:$8 sps:$4 sm:$0xff]   ;;  %v9918_v17 = vld [vmem:[%s10297_s15 + $0xf0] ss:$8 sps:$4 sm:$0xff]  }
 0x475   :  { %v7399_v20 = vpop.f32.mrb[14].mxu0  ;;  %v7415_v21 = vpop.f32.mrb[14].mxu1  ;;  %7535 = vmatprep.subr.bf16.mxu1 %v9913_v16 }
 0x476   :  { %v961_v22 = vpop.f32.mrb[15].mxu0  ;;  %v1097_v23 = vpop.f32.mrb[15].mxu1  ;;  %7537 = vmatpush1.bf16.msra.mxu1 %v9918_v17 }
 0x477   :  { %v972_v24 = vpack.c.bf16 %v961_v22, %v958_v18  ;;  %v1108_v25 = vpack.c.bf16 %v1097_v23, %v1094_v19  ;;  %7539 = vmatprep.subr.bf16.mxu1 %v9730_v60 }
 0x47b   :  { %v7406_v26 = vpop.f32.mrb[16].mxu0 }
 0x47c   :  { %v1026_v27 = vpop.f32.mrb[17].mxu0  ;;  %v1041_v33 = vpack.c.bf16 %v7406_v26, %v7406_v26 }
 0x47d   :  { %v7407_v28 = vpop.f32.mrb[18].mxu0 }
 0x47e   :  { %v1029_v29 = vpop.f32.mrb[19].mxu0 }
 0x47f   :  { %v1040_v30 = vpack.c.bf16 %v1029_v29, %v1026_v27 }
 0x481   :  { %1430 = vmatprep.mubr.bf16.mxu0 %v1040_v30 }
 0x482   :  { %1431 = vmatmul.mubr.bf16.vlgmr.msra.gmra.mrb[20].mxu0 %v972_v24 }
 0x483   :  { %1450 = vmatpush1.bf16.msra.mxu0 %v8025_v31  ;;  %1440 = vmatprep.mubr.bf16.mxu0 %v1041_v33 }
 0x484   :  { %1451 = vmatprep.subr.bf16.mxu0 %v8030_v32 }
 0x487   :  { %1452 = vmatpush1.bf16.msra.mxu0 %v8028_v34 }
 0x488   :  { %1453 = vmatprep.subr.bf16.mxu0 %v8033_v35 }
 0x48a   :  { %1441 = vmatmul.mubr.bf16.gmra.mrb[24].mxu0 %v973_v37 }
 0x48b   :  { %1454 = vmatpush1.bf16.msra.mxu0 %v8031_v36  ;;  %1481 = vmatprep.mubr.bf16.mxu0 %v10324_v40 }
 0x48c   :  { %1455 = vmatprep.subr.bf16.mxu0 %v8036_v38 }
 0x48f   :  { %1456 = vmatpush1.bf16.msra.mxu0 %v8034_v39 }
 0x490   :  { %1457 = vmatprep.subr.bf16.mxu0 %v8039_v41 }
 0x493   :  { %1458 = vmatpush1.bf16.msra.mxu0 %v8037_v42 }
 0x494   :  { %1459 = vmatprep.subr.bf16.mxu0 %v8042_v43 }
 0x497   :  { %1460 = vmatpush1.bf16.msra.mxu0 %v8040_v44 }
 0x498   :  { %1461 = vmatprep.subr.bf16.mxu0 %v8045_v45 }
 0x49b   :  { %1462 = vmatpush1.bf16.msra.mxu0 %v8043_v46 }
 0x49c   :  { %1463 = vmatprep.subr.bf16.mxu0 %v8048_v47 }
 0x49f   :  { %1464 = vmatpush1.bf16.msra.mxu0 %v8046_v48 }
 0x4a2   :  { %1482 = vmatmul.mubr.bf16.vlgmr.msra.gmra.mrb[20].mxu0 %v1108_v25 }
 0x4a3   :  { %1491 = vmatprep.mubr.bf16.mxu0 %v10324_v40 }
 0x4aa   :  { %1492 = vmatmul.mubr.bf16.gmra.mrb[24].mxu0 %v1109_v49 }
 0x4ab   :  { %1916 = vmatprep.mubr.bf16.mxu0 %v10324_v40 }
 0x575   :  { %v9923_v18 = vpop.f32.mrb[20].mxu0 }
 0x576   :  { %v9925_v19 = vpop.f32.mrb[21].mxu0  ;;  %v1615_v21 = vmul.f32 %v9923_v18, %v9923_v18 }
 0x577   :  { %v9927_v20 = vpop.f32.mrb[22].mxu0  ;;  %v1616_v60 = vmul.f32 %v9925_v19, %v9925_v19 }
 0x578   :  { %v1596_v22 = vadd.f32 %v9927_v20, %v9923_v18  ;;  %v1617_v23 = vmul.f32 %v9927_v20, %v9927_v20  ;;  %v9935_v24 = vpop.f32.mrb[23].mxu0 }
 0x579   :  { %v1606_v25 = vadd.f32 %v9935_v24, %v9925_v19  ;;  %v1618_v26 = vmul.f32 %v9935_v24, %v9935_v24 }
 0x57a   :  { %v1621_v27 = vadd.f32 %v1617_v23, %v1615_v21 }
 0x57b   :  { %v1630_v28 = vadd.f32 %v1618_v26, %v1616_v60 }
 0x57d   :  { %v9943_v29 = vpop.f32.mrb[24].mxu0 }
 0x57e   :  { %v1598_v30 = vsel %vm1597_vm4, %v9943_v29, 0.0  ;;  %v1619_v31 = vmul.f32 %v9943_v29, %v9943_v29  ;;  %v9948_v32 = vpop.f32.mrb[25].mxu0 }
 0x57f   :  { %v1599_v33 = vadd.f32 %v1598_v30, %v1596_v22  ;;  %v1607_v34 = vsel %vm1597_vm4, %v9948_v32, 0.0  ;;  %v1620_v35 = vmul.f32 %v9948_v32, %v9948_v32  ;;  %v1497_v36 = vpop.f32.mrb[26].mxu0 }
 0x580   :  { %v1622_v37 = vsel %vm1597_vm4, %v1619_v31, 0.0  ;;  %v1608_v38 = vadd.f32 %v1607_v34, %v1606_v25  ;;  %v1498_v39 = vpop.f32.mrb[27].mxu0 }
 0x581   :  { %v1600_v41 = vrot.slane %v1599_v33, 4  ;;  %v1623_v42 = vadd.f32 %v1622_v37, %v1621_v27  ;;  %v1631_v43 = vsel %vm1597_vm4, %v1620_v35, 0.0 }
 0x582   :  { %v1609_v44 = vrot.slane %v1608_v38, 4  ;;  %v1632_v45 = vadd.f32 %v1631_v43, %v1630_v28  ;;  %v1810_v28 = vld [vmem:[#allocation22] sm:$0x3] }
 0x583   :  { %v1601_v46 = vadd.f32 %v1600_v41, %v1599_v33  ;;  %v1838_v33 = vld [vmem:[#allocation23] sm:$0x3] }
 0x584   :  { %v1610_v47 = vadd.f32 %v1609_v44, %v1608_v38  ;;  %v1633_v48 = vrot.slane %v1632_v45, 4 }
 0x585   :  { %v1602_v49 = vrot.slane %v1601_v46, 2 }
 0x586   :  { %v1611_v21 = vrot.slane %v1610_v47, 2  ;;  %v1634_v22 = vadd.f32 %v1633_v48, %v1632_v45 }
 0x587   :  { %v1603_v23 = vadd.f32 %v1602_v49, %v1601_v46 }
 0x588   :  { %v1612_v60 = vadd.f32 %v1611_v21, %v1610_v47  ;;  %v1635_v26 = vrot.slane %v1634_v22, 2 }
 0x589   :  { %v1604_v30 = vrot.slane %v1603_v23, 1 }
 0x58a   :  { %v1613_v40 = vrot.slane %v1612_v60, 1  ;;  %v1636_v36 = vadd.f32 %v1635_v26, %v1634_v22 }
 0x58b   :  { %v1605_v34 = vadd.f32 %v1604_v30, %v1603_v23 }
 0x58c   :  { %v1614_v31 = vadd.f32 %v1613_v40, %v1612_v60  ;;  %v1637_v25 = vrot.slane %v1636_v36, 1 }
 0x58e   :  { %1703 = vmatprep.mubr.f32.mxu1 %v1614_v31  ;;  %v1638_v27 = vadd.f32 %v1637_v25, %v1636_v36 }
 0x58f   :  { %1704 = vmatmul.mubr.f32.vlgmr.msra.gmra.mrb[16].mxu1 %v1605_v34 }
 0x590   :  { %7541 = vmatpush1.bf16.msra.mxu1 %v9735_v61  ;;  %1777 = vmatprep.mubr.f32.mxu1 %v1638_v27  ;;  %v1624_v61 = vrot.slane %v1623_v42, 4 }
 0x591   :  { %7543 = vmatprep.subr.bf16.mxu1 %v9740_v62 }
 0x592   :  { %v1625_v62 = vadd.f32 %v1624_v61, %v1623_v42 }
 0x594   :  { %7545 = vmatpush1.bf16.msra.mxu1 %v9747_v63  ;;  %v1626_v63 = vrot.slane %v1625_v62, 2 }
 0x595   :  { %7547 = vmatprep.subr.bf16.mxu1 %v9753_v0 }
 0x596   :  { %v1627_v0 = vadd.f32 %v1626_v63, %v1625_v62 }
 0x598   :  { %7549 = vmatpush1.bf16.msra.mxu1 %v9759_v1  ;;  %v1628_v1 = vrot.slane %v1627_v0, 1 }
 0x599   :  { %7551 = vmatprep.subr.bf16.mxu1 %v9765_v2 }
 0x59a   :  { %v1629_v2 = vadd.f32 %v1628_v1, %v1627_v0 }
 0x59c   :  { %7553 = vmatpush1.bf16.msra.mxu1 %v9771_v3  ;;  %v10352_v3 = vmov 0  }
 0x59d   :  { %7555 = vmatprep.subr.bf16.mxu1 %v9777_v4  ;;  %v1796_v4 = vlaneseq }
 0x5a0   :  { %7557 = vmatpush1.bf16.msra.mxu1 %v9783_v5  ;;  %v9985_v5 = vshrl.u32 %v1796_v4, 7  ;;  %v8097_v4 = vld [vmem:[#allocation13] sm:$0x3f]  }
 0x5a1   :  { %7559 = vmatprep.subr.bf16.mxu1 %v9789_v6 }
 0x5a2   :  { %v9988_v6 = vsub.s32 0, %v9985_v5 }
 0x5a4   :  { %7561 = vmatpush1.bf16.msra.mxu1 %v9795_v7  ;;  %v1843_v39 = vrot.slane %v1838_v33, %v9988_v6 }
 0x5a5   :  { %7563 = vmatprep.subr.bf16.mxu1 %v9801_v8 }
 0x5a8   :  { %7565 = vmatpush1.bf16.msra.mxu1 %v9807_v9 }
 0x5a9   :  { %7567 = vmatprep.subr.bf16.mxu1 %v9813_v10 }
 0x5ac   :  { %7569 = vmatpush1.bf16.msra.mxu1 %v9819_v11 }
 0x5ad   :  { %7571 = vmatprep.subr.bf16.mxu1 %v9825_v12 }
 0x5b0   :  { %7573 = vmatpush1.bf16.msra.mxu1 %v9831_v13 }
 0x5b1   :  { %7575 = vmatprep.subr.bf16.mxu1 %v9837_v14 }
 0x5b4   :  { %7577 = vmatpush1.bf16.msra.mxu1 %v9843_v15 }
 0x5b5   :  { %7579 = vmatprep.subr.bf16.mxu1 %v9853_v50 }
 0x5b8   :  { %7581 = vmatpush1.bf16.msra.mxu1 %v9858_v51 }
 0x5b9   :  { %7583 = vmatprep.subr.bf16.mxu1 %v9865_v52 }
 0x5bc   :  { %7585 = vmatpush1.bf16.msra.mxu1 %v9870_v53 }
 0x5bd   :  { %7587 = vmatprep.subr.bf16.mxu1 %v9877_v54 }
 0x5c0   :  { %7589 = vmatpush1.bf16.msra.mxu1 %v9882_v55 }
 0x5c1   :  { %7591 = vmatprep.subr.bf16.mxu1 %v9889_v56 }
 0x5c4   :  { %7593 = vmatpush1.bf16.msra.mxu1 %v9894_v57 }
 0x5c5   :  { %7595 = vmatprep.subr.bf16.mxu1 %v9901_v58 }
 0x5c8   :  { %7597 = vmatpush1.bf16.msra.mxu1 %v9906_v59 }
 0x5c9   :  { %7599 = vmatprep.subr.bf16.mxu1 %v9913_v16 }
 0x5cc   :  { %7601 = vmatpush1.bf16.msra.mxu1 %v9918_v17 }
 0x5cf   :  { %1778 = vmatmul.mubr.f32.vlgmr.msra.gmra.mrb[18].mxu1 %v1629_v2 }
 0x5d0   :  { %2808 = vmatprep.mubr.bf16.mxu1 %v10352_v3 }
 0x662   :  { %v1705_v7 = vpop.f32.mrb[16].mxu1 }
 0x663   :  { %v1711_v8 = vmul.f32 0.0061728396, %v1705_v7  ;;  %v1707_v9 = vpop.f32.mrb[17].mxu1  ;;  %v8098_v7 = vld [vmem:[#allocation13 + $0x8] sm:$0x3f]  }
 0x664   :  { %v1712_v10 = vmul.f32 0.0061728396, %v1707_v9  ;;  %v8099_v9 = vld [vmem:[#allocation13 + $0x10] sm:$0x3f]  }
 0x665   :  { %v1799_v11 = vrot.slane %v1711_v8, %v9988_v6  ;;  %v1786_v53 = vmul.f32 %v1711_v8, %v1711_v8  ;;  %v8102_v8 = vld [vmem:[#allocation7 + $0x4] ss:$8 sps:$4 sm:$0xff]  }
 0x666   :  { %v1803_v12 = vrot.slane %v1712_v10, %v9988_v6  ;;  %v1787_v56 = vmul.f32 %v1712_v10, %v1712_v10  ;;  %v8100_v10 = vld [vmem:[#allocation7] ss:$8 sps:$4 sm:$0xff]  }
 0x667   :  { %v1804_v13 = vsub.f32 %v9923_v18, %v1799_v11  ;;  %v1806_v14 = vsub.f32 %v9927_v20, %v1799_v11  ;;  %v1808_v15 = vsub.f32 %v9943_v29, %v1799_v11  ;;  %v8105_v11 = vld [vmem:[#allocation7 + $0x14] ss:$8 sps:$4 sm:$0xff]  }
 0x668   :  { %v1805_v40 = vsub.f32 %v9925_v19, %v1803_v12  ;;  %v1807_v50 = vsub.f32 %v9935_v24, %v1803_v12  ;;  %v1809_v51 = vsub.f32 %v9948_v32, %v1803_v12  ;;  %v9999_v19 = vsub.s32 1, %v9985_v5  ;;  %v8103_v12 = vld [vmem:[#allocation7 + $0x10] ss:$8 sps:$4 sm:$0xff]  }
 0x669   :  { %v1815_v24 = vrot.slane %v1810_v28, %v9988_v6 }
 0x66a   :  { %v1819_v29 = vrot.slane %v1810_v28, %v9999_v19  ;;  %v1847_v43 = vrot.slane %v1838_v33, %v9999_v19  ;;  %v8135_v28 = vld [vmem:[#allocation7 + $0xb4] ss:$8 sps:$4 sm:$0xff]  }
 0x66b   :  { %v8141_v33 = vld [vmem:[#allocation7 + $0xd4] ss:$8 sps:$4 sm:$0xff]  }
 0x6a2   :  { %v1779_v52 = vpop.f32.mrb[18].mxu1 }
 0x6a3   :  { %v1784_v54 = vmul.f32 0.0061728396, %v1779_v52  ;;  %v1781_v55 = vpop.f32.mrb[19].mxu1  ;;  %v8117_v52 = vld [vmem:[#allocation7 + $0x54] ss:$8 sps:$4 sm:$0xff]  }
 0x6a4   :  { %v1785_v57 = vmul.f32 0.0061728396, %v1781_v55  ;;  %v8118_v55 = vld [vmem:[#allocation7 + $0x60] ss:$8 sps:$4 sm:$0xff]  }
 0x6a5   :  { %v1788_v58 = vsub.f32 %v1784_v54, %v1786_v53  ;;  %v8115_v53 = vld [vmem:[#allocation7 + $0x50] ss:$8 sps:$4 sm:$0xff]   ;;  %v8120_v54 = vld [vmem:[#allocation7 + $0x64] ss:$8 sps:$4 sm:$0xff]  }
 0x6a6   :  { %v1789_v59 = vsub.f32 %v1785_v57, %v1787_v56  ;;  %v8123_v56 = vld [vmem:[#allocation7 + $0x74] ss:$8 sps:$4 sm:$0xff]   ;;  %v8121_v57 = vld [vmem:[#allocation7 + $0x70] ss:$8 sps:$4 sm:$0xff]  }
 0x6a7   :  { %v1790_v16 = vmax.f32 %v1788_v58, 0.0  ;;  %v8126_v58 = vld [vmem:[#allocation7 + $0x84] ss:$8 sps:$4 sm:$0xff]  }
 0x6a8   :  { %v1791_v17 = vmax.f32 %v1789_v59, 0.0  ;;  %v8124_v59 = vld [vmem:[#allocation7 + $0x80] ss:$8 sps:$4 sm:$0xff]  }
 0x6a9   :  { %v1792_v18 = vadd.f32 1e-05, %v1790_v16  ;;  %v8129_v16 = vld [vmem:[#allocation7 + $0x94] ss:$8 sps:$4 sm:$0xff]  }
 0x6aa   :  { %v1793_v20 = vadd.f32 1e-05, %v1791_v17  ;;  %v8127_v17 = vld [vmem:[#allocation7 + $0x90] ss:$8 sps:$4 sm:$0xff]  }
 0x6ab   :  { %8708 = vrsqrt.f32 %v1792_v18  ;;  %v8132_v18 = vld [vmem:[#allocation7 + $0xa4] ss:$8 sps:$4 sm:$0xff]  }
 0x6ac   :  { %8710 = vrsqrt.f32 %v1793_v20  ;;  %v8130_v20 = vld [vmem:[#allocation7 + $0xa0] ss:$8 sps:$4 sm:$0xff]  }
 0x6b5   :  { %v8709_v32 = vpop.eup %8708 }
 0x6b6   :  { %v8711_v35 = vpop.eup %8710  ;;  %v1822_v37 = vmul.f32 %v8709_v32, %v1815_v24  ;;  %v8133_v24 = vld [vmem:[#allocation7 + $0xb0] ss:$8 sps:$4 sm:$0xff]   ;;  %v8136_v32 = vld [vmem:[#allocation7 + $0xc0] ss:$8 sps:$4 sm:$0xff]  }
 0x6b7   :  { %v1823_v38 = vmul.f32 %v8711_v35, %v1819_v29  ;;  %v8138_v29 = vld [vmem:[#allocation7 + $0xc4] ss:$8 sps:$4 sm:$0xff]   ;;  %v8139_v35 = vld [vmem:[#allocation7 + $0xd0] ss:$8 sps:$4 sm:$0xff]  }
 0x6b8   :  { %v1827_v41 = vrot.slane %v1822_v37, %v9988_v6  ;;  %v8144_v37 = vld [vmem:[#allocation7 + $0xe4] ss:$8 sps:$4 sm:$0xff]  }
 0x6b9   :  { %v1831_v42 = vrot.slane %v1823_v38, %v9988_v6  ;;  %v8142_v38 = vld [vmem:[#allocation7 + $0xe0] ss:$8 sps:$4 sm:$0xff]  }
 0x6ba   :  { %v1832_v44 = vmul.f32 %v1827_v41, %v1804_v13  ;;  %v1834_v45 = vmul.f32 %v1827_v41, %v1806_v14  ;;  %v1836_v46 = vmul.f32 %v1827_v41, %v1808_v15  ;;  %v8108_v13 = vld [vmem:[#allocation7 + $0x24] ss:$8 sps:$4 sm:$0xff]   ;;  %v8106_v14 = vld [vmem:[#allocation7 + $0x20] ss:$8 sps:$4 sm:$0xff]   ;;  %v8111_v15 = vld [vmem:[#allocation7 + $0x34] ss:$8 sps:$4 sm:$0xff]  }
 0x6bb   :  { %v1833_v47 = vmul.f32 %v1831_v42, %v1805_v40  ;;  %v1835_v48 = vmul.f32 %v1831_v42, %v1807_v50  ;;  %v1837_v49 = vmul.f32 %v1831_v42, %v1809_v51  ;;  %v8109_v40 = vld [vmem:[#allocation7 + $0x30] ss:$8 sps:$4 sm:$0xff]   ;;  %v8114_v50 = vld [vmem:[#allocation7 + $0x44] ss:$8 sps:$4 sm:$0xff]   ;;  %v8112_v51 = vld [vmem:[#allocation7 + $0x40] ss:$8 sps:$4 sm:$0xff]  }
 0x6bc   :  { %v1850_v21 = vadd.f32 %v1843_v39, %v1832_v44  ;;  %v1852_v22 = vadd.f32 %v1843_v39, %v1834_v45  ;;  %v1854_v23 = vadd.f32 %v1843_v39, %v1836_v46  ;;  %v8147_v39 = vld [vmem:[#allocation7 + $0xf4] ss:$8 sps:$4 sm:$0xff]   ;;  %v8145_v41 = vld [vmem:[#allocation7 + $0xf0] ss:$8 sps:$4 sm:$0xff]   ;;  %v8150_v42 = vld [vmem:[#allocation7 + $0x104] ss:$8 sps:$4 sm:$0xff]  }
 0x6bd   :  { %v1851_v60 = vadd.f32 %v1847_v43, %v1833_v47  ;;  %v1853_v26 = vadd.f32 %v1847_v43, %v1835_v48  ;;  %v1855_v30 = vadd.f32 %v1847_v43, %v1837_v49  ;;  %v8148_v49 = vld [vmem:[#allocation7 + $0x100] ss:$8 sps:$4 sm:$0xff]  }
 0x6be   :  { %v1856_v36 = vmax.f32 %v1850_v21, 0.0  ;;  %v1858_v31 = vmax.f32 %v1852_v22, 0.0  ;;  %v1860_v61 = vmax.f32 %v1854_v23, 0.0  ;;  %v8153_v21 = vld [vmem:[#allocation7 + $0x114] ss:$8 sps:$4 sm:$0xff]  }
 0x6bf   :  { %v1857_v25 = vmax.f32 %v1851_v60, 0.0  ;;  %v1859_v34 = vmax.f32 %v1853_v26, 0.0  ;;  %v1861_v27 = vmax.f32 %v1855_v30, 0.0  ;;  %v8151_v22 = vld [vmem:[#allocation7 + $0x110] ss:$8 sps:$4 sm:$0xff]  }
 0x6c0   :  { %v1862_v62 = vpack.c.bf16 %v1858_v31, %v1856_v36  ;;  %v1864_v1 = vpack.c.bf16 %v1860_v61, %v1860_v61  ;;  %v8156_v60 = vld [vmem:[#allocation7 + $0x124] ss:$8 sps:$4 sm:$0xff]   ;;  %v8157_v61 = vld [vmem:[#allocation7 + $0x130] ss:$8 sps:$4 sm:$0xff]  }
 0x6c1   :  { %v1863_v63 = vpack.c.bf16 %v1859_v34, %v1857_v25  ;;  %v1865_v0 = vpack.c.bf16 %v1861_v27, %v1861_v27  ;;  %v8154_v25 = vld [vmem:[#allocation7 + $0x120] ss:$8 sps:$4 sm:$0xff]   ;;  %v8159_v27 = vld [vmem:[#allocation7 + $0x134] ss:$8 sps:$4 sm:$0xff]  }
 0x6c2   :  { %v1879_v2 = vsel %vm1877_vm5, %v1864_v1, 0 }
 0x6c3   :  { %1884 = vmatprep.subr.bf16.mxu0 %v1863_v63 }
 0x6c4   :  { %1885 = vmatpush1.bf16.msra.mxu0 %v1862_v62 }
 0x6c5   :  { %6643 = vmatprep.subr.msk.bf16.mxu0 %vm1877_vm5, %v1865_v0 }
 0x6c8   :  { %1887 = vmatpush1.bf16.msra.mxu0 %v1879_v2 }
 0x6c9   :  { %1940 = vmatprep.subr.bf16.mxu0 %v1863_v63 }
 0x6cb   :  { %6644 = vmatmul.mubr.msk.bf16.vlgmr.msra.gmra.mrb[28].mxu0 %vm1873_vm6, %v8097_v4 }
 0x6cc   :  { %1941 = vmatpush1.bf16.msra.mxu0 %v1862_v62  ;;  %1972 = vmatprep.mubr.bf16.mxu0 %v10352_v3 }
 0x6cd   :  { %6646 = vmatprep.subr.msk.bf16.mxu0 %vm1877_vm5, %v1865_v0 }
 0x6d0   :  { %1943 = vmatpush1.bf16.msra.mxu0 %v1879_v2 }
 0x6d1   :  { %1996 = vmatprep.subr.bf16.mxu0 %v1863_v63  ;;  %v8162_v63 = vld [vmem:[#allocation7 + $0x144] ss:$8 sps:$4 sm:$0xff]  }
 0x6d3   :  { %6647 = vmatmul.mubr.msk.bf16.vlgmr.msra.gmra.mrb[32].mxu0 %vm1873_vm6, %v8098_v7  ;;  %v8160_v7 = vld [vmem:[#allocation7 + $0x140] ss:$8 sps:$4 sm:$0xff]  }
 0x6d4   :  { %1997 = vmatpush1.bf16.msra.mxu0 %v1862_v62  ;;  %2028 = vmatprep.mubr.bf16.mxu0 %v10352_v3 }
 0x6d5   :  { %6649 = vmatprep.subr.msk.bf16.mxu0 %vm1877_vm5, %v1865_v0 }
 0x6d8   :  { %1999 = vmatpush1.bf16.msra.mxu0 %v1879_v2 }
 0x6d9   :  { %2629 = vmatprep.subr.bf16.mxu0 %v8102_v8 }
 0x6db   :  { %6650 = vmatmul.mubr.msk.bf16.vlgmr.msra.gmra.mrb[36].mxu0 %vm1873_vm6, %v8099_v9  ;;  %v8165_v9 = vld [vmem:[#allocation7 + $0x154] ss:$8 sps:$4 sm:$0xff]  }
 0x6dc   :  { %2630 = vmatpush1.bf16.msra.mxu0 %v8100_v10  ;;  %v8163_v10 = vld [vmem:[#allocation7 + $0x150] ss:$8 sps:$4 sm:$0xff]  }
 0x6dd   :  { %2631 = vmatprep.subr.bf16.mxu0 %v8105_v11  ;;  %v8168_v11 = vld [vmem:[#allocation7 + $0x164] ss:$8 sps:$4 sm:$0xff]  }
 0x6e0   :  { %2632 = vmatpush1.bf16.msra.mxu0 %v8103_v12  ;;  %v8166_v12 = vld [vmem:[#allocation7 + $0x160] ss:$8 sps:$4 sm:$0xff]  }
 0x6e1   :  { %2633 = vmatprep.subr.bf16.mxu0 %v8108_v13  ;;  %v8171_v13 = vld [vmem:[#allocation7 + $0x174] ss:$8 sps:$4 sm:$0xff]  }
 0x6e4   :  { %2634 = vmatpush1.bf16.msra.mxu0 %v8106_v14  ;;  %v8169_v14 = vld [vmem:[#allocation7 + $0x170] ss:$8 sps:$4 sm:$0xff]  }
 0x6e5   :  { %2635 = vmatprep.subr.bf16.mxu0 %v8111_v15  ;;  %v8174_v15 = vld [vmem:[#allocation7 + $0x184] ss:$8 sps:$4 sm:$0xff]  }
 0x6e8   :  { %2636 = vmatpush1.bf16.msra.mxu0 %v8109_v40  ;;  %v8172_v40 = vld [vmem:[#allocation7 + $0x180] ss:$8 sps:$4 sm:$0xff]  }
 0x6e9   :  { %2637 = vmatprep.subr.bf16.mxu0 %v8114_v50  ;;  %v8177_v50 = vld [vmem:[#allocation7 + $0x194] ss:$8 sps:$4 sm:$0xff]  }
 0x6ec   :  { %2638 = vmatpush1.bf16.msra.mxu0 %v8112_v51  ;;  %v8175_v51 = vld [vmem:[#allocation7 + $0x190] ss:$8 sps:$4 sm:$0xff]  }
 0x6ed   :  { %2639 = vmatprep.subr.bf16.mxu0 %v8117_v52  ;;  %v8180_v52 = vld [vmem:[#allocation7 + $0x1a4] ss:$8 sps:$4 sm:$0xff]  }
 0x6f0   :  { %2640 = vmatpush1.bf16.msra.mxu0 %v8115_v53  ;;  %v8178_v53 = vld [vmem:[#allocation7 + $0x1a0] ss:$8 sps:$4 sm:$0xff]  }
 0x6f1   :  { %2641 = vmatprep.subr.bf16.mxu0 %v8120_v54  ;;  %v8183_v54 = vld [vmem:[#allocation7 + $0x1b4] ss:$8 sps:$4 sm:$0xff]  }
 0x6f4   :  { %2642 = vmatpush1.bf16.msra.mxu0 %v8118_v55  ;;  %v8181_v55 = vld [vmem:[#allocation7 + $0x1b0] ss:$8 sps:$4 sm:$0xff]  }
 0x6f5   :  { %2643 = vmatprep.subr.bf16.mxu0 %v8123_v56  ;;  %v8186_v56 = vld [vmem:[#allocation7 + $0x1c4] ss:$8 sps:$4 sm:$0xff]  }
 0x6f8   :  { %2644 = vmatpush1.bf16.msra.mxu0 %v8121_v57  ;;  %v8184_v57 = vld [vmem:[#allocation7 + $0x1c0] ss:$8 sps:$4 sm:$0xff]  }
 0x6f9   :  { %2645 = vmatprep.subr.bf16.mxu0 %v8126_v58  ;;  %v8189_v58 = vld [vmem:[#allocation7 + $0x1d4] ss:$8 sps:$4 sm:$0xff]  }
 0x6fc   :  { %2646 = vmatpush1.bf16.msra.mxu0 %v8124_v59  ;;  %v8187_v59 = vld [vmem:[#allocation7 + $0x1d0] ss:$8 sps:$4 sm:$0xff]  }
 0x6fd   :  { %2647 = vmatprep.subr.bf16.mxu0 %v8129_v16  ;;  %v8192_v16 = vld [vmem:[#allocation7 + $0x1e4] ss:$8 sps:$4 sm:$0xff]  }
 0x700   :  { %2648 = vmatpush1.bf16.msra.mxu0 %v8127_v17  ;;  %v8190_v17 = vld [vmem:[#allocation7 + $0x1e0] ss:$8 sps:$4 sm:$0xff]  }
 0x701   :  { %2649 = vmatprep.subr.bf16.mxu0 %v8132_v18  ;;  %v8195_v18 = vld [vmem:[#allocation7 + $0x1f4] ss:$8 sps:$4 sm:$0xff]  }
 0x704   :  { %2650 = vmatpush1.bf16.msra.mxu0 %v8130_v20  ;;  %v8193_v20 = vld [vmem:[#allocation7 + $0x1f0] ss:$8 sps:$4 sm:$0xff]  }
 0x705   :  { %2651 = vmatprep.subr.bf16.mxu0 %v8135_v28  ;;  %v8198_v28 = vld [vmem:[#allocation7 + $0x204] ss:$8 sps:$4 sm:$0xff]  }
 0x708   :  { %2652 = vmatpush1.bf16.msra.mxu0 %v8133_v24  ;;  %v8196_v24 = vld [vmem:[#allocation7 + $0x200] ss:$8 sps:$4 sm:$0xff]  }
 0x709   :  { %2653 = vmatprep.subr.bf16.mxu0 %v8138_v29  ;;  %v8201_v29 = vld [vmem:[#allocation7 + $0x214] ss:$8 sps:$4 sm:$0xff]  }
 0x70c   :  { %2654 = vmatpush1.bf16.msra.mxu0 %v8136_v32  ;;  %v8199_v32 = vld [vmem:[#allocation7 + $0x210] ss:$8 sps:$4 sm:$0xff]  }
 0x70d   :  { %2655 = vmatprep.subr.bf16.mxu0 %v8141_v33  ;;  %v8204_v33 = vld [vmem:[#allocation7 + $0x224] ss:$8 sps:$4 sm:$0xff]  }
 0x710   :  { %2656 = vmatpush1.bf16.msra.mxu0 %v8139_v35  ;;  %v8202_v35 = vld [vmem:[#allocation7 + $0x220] ss:$8 sps:$4 sm:$0xff]  }
 0x711   :  { %2657 = vmatprep.subr.bf16.mxu0 %v8144_v37  ;;  %v8207_v37 = vld [vmem:[#allocation7 + $0x234] ss:$8 sps:$4 sm:$0xff]  }
 0x714   :  { %2658 = vmatpush1.bf16.msra.mxu0 %v8142_v38  ;;  %v8205_v38 = vld [vmem:[#allocation7 + $0x230] ss:$8 sps:$4 sm:$0xff]  }
 0x715   :  { %2659 = vmatprep.subr.bf16.mxu0 %v8147_v39  ;;  %v8210_v39 = vld [vmem:[#allocation7 + $0x244] ss:$8 sps:$4 sm:$0xff]  }
 0x718   :  { %2660 = vmatpush1.bf16.msra.mxu0 %v8145_v41  ;;  %v8208_v41 = vld [vmem:[#allocation7 + $0x240] ss:$8 sps:$4 sm:$0xff]  }
 0x719   :  { %2672 = vmatprep.subr.bf16.mxu0 %v8150_v42  ;;  %v8213_v42 = vld [vmem:[#allocation7 + $0x254] ss:$8 sps:$4 sm:$0xff]  }
 0x79e   :  { %v1918_v43 = vpop.f32.mrb[28].mxu0 }
 0x79f   :  { %v1920_v44 = vpop.f32.mrb[29].mxu0 }
 0x7a0   :  { %v1922_v45 = vpop.f32.mrb[30].mxu0 }
 0x7a1   :  { %v1927_v46 = vpack.c.bf16 %v1922_v45, %v1918_v43  ;;  %v1924_v47 = vpop.f32.mrb[31].mxu0  ;;  %v8211_v43 = vld [vmem:[#allocation7 + $0x250] ss:$8 sps:$4 sm:$0xff]   ;;  %v8214_v45 = vld [vmem:[#allocation7 + $0x260] ss:$8 sps:$4 sm:$0xff]  }
 0x7a2   :  { %v1928_v48 = vpack.c.bf16 %v1924_v47, %v1920_v44  ;;  %v8216_v44 = vld [vmem:[#allocation7 + $0x264] ss:$8 sps:$4 sm:$0xff]   ;;  %v8217_v47 = vld [vmem:[#allocation7 + $0x270] ss:$8 sps:$4 sm:$0xff]  }
 0x7a4   :  { %2661 = vmatprep.mubr.bf16.mxu0 %v1928_v48  ;;  %v8222_v48 = vld [vmem:[#allocation7 + $0x284] ss:$8 sps:$4 sm:$0xff]  }
 0x7a5   :  { %2662 = vmatmul.mubr.bf16.vlgmr.msra.gmra.mrb[40].mxu0 %v1927_v46  ;;  %v8219_v46 = vld [vmem:[#allocation7 + $0x274] ss:$8 sps:$4 sm:$0xff]  }
 0x7a6   :  { %2673 = vmatpush1.bf16.msra.mxu0 %v8148_v49  ;;  %v10016_v23 = vpop.f32.mrb[32].mxu0  ;;  %v8220_v49 = vld [vmem:[#allocation7 + $0x280] ss:$8 sps:$4 sm:$0xff]  }
 0x7a7   :  { %2674 = vmatprep.subr.bf16.mxu0 %v8153_v21  ;;  %v1976_v26 = vpop.f32.mrb[33].mxu0  ;;  %v8225_v21 = vld [vmem:[#allocation7 + $0x294] ss:$8 sps:$4 sm:$0xff]  }
 0x7a8   :  { %v10018_v30 = vpop.f32.mrb[34].mxu0 }
 0x7a9   :  { %v1983_v36 = vpack.c.bf16 %v10018_v30, %v10016_v23  ;;  %v1980_v31 = vpop.f32.mrb[35].mxu0  ;;  %v8228_v23 = vld [vmem:[#allocation7 + $0x2a4] ss:$8 sps:$4 sm:$0xff]   ;;  %v8229_v30 = vld [vmem:[#allocation7 + $0x2b0] ss:$8 sps:$4 sm:$0xff]  }
 0x7aa   :  { %2675 = vmatpush1.bf16.msra.mxu0 %v8151_v22  ;;  %v1984_v34 = vpack.c.bf16 %v1980_v31, %v1976_v26  ;;  %v8223_v22 = vld [vmem:[#allocation7 + $0x290] ss:$8 sps:$4 sm:$0xff]   ;;  %v8231_v26 = vld [vmem:[#allocation7 + $0x2b4] ss:$8 sps:$4 sm:$0xff]   ;;  %v8232_v31 = vld [vmem:[#allocation7 + $0x2c0] ss:$8 sps:$4 sm:$0xff]  }
 0x7ab   :  { %2676 = vmatprep.subr.bf16.mxu0 %v8156_v60  ;;  %v8226_v60 = vld [vmem:[#allocation7 + $0x2a0] ss:$8 sps:$4 sm:$0xff]  }
 0x7ac   :  { %2704 = vmatprep.mubr.bf16.mxu0 %v1984_v34  ;;  %v8235_v34 = vld [vmem:[#allocation7 + $0x2d0] ss:$8 sps:$4 sm:$0xff]  }
 0x7ae   :  { %2677 = vmatpush1.bf16.msra.mxu0 %v8154_v25  ;;  %v10022_v62 = vpop.f32.mrb[36].mxu0  ;;  %v8237_v25 = vld [vmem:[#allocation7 + $0x2d4] ss:$8 sps:$4 sm:$0xff]  }
 0x7af   :  { %2678 = vmatprep.subr.bf16.mxu0 %v8159_v27  ;;  %v2032_v0 = vpop.f32.mrb[37].mxu0  ;;  %v8240_v27 = vld [vmem:[#allocation7 + $0x2e4] ss:$8 sps:$4 sm:$0xff]  }
 0x7b0   :  { %v10024_v1 = vpop.f32.mrb[38].mxu0 }
 0x7b1   :  { %v2039_v2 = vpack.c.bf16 %v10024_v1, %v10022_v62  ;;  %v2036_v4 = vpop.f32.mrb[39].mxu0 }
 0x7b2   :  { %2679 = vmatpush1.bf16.msra.mxu0 %v8157_v61  ;;  %v2040_v8 = vpack.c.bf16 %v2036_v4, %v2032_v0  ;;  %v8238_v61 = vld [vmem:[#allocation7 + $0x2e0] ss:$8 sps:$4 sm:$0xff]   ;;  %v8241_v0 = vld [vmem:[#allocation7 + $0x2f0] ss:$8 sps:$4 sm:$0xff]   ;;  %v2137_v4 = vld [vmem:[#allocation19] sm:$0x3] }
 0x7b3   :  { %2680 = vmatprep.subr.bf16.mxu0 %v8162_v63  ;;  %v8243_v63 = vld [vmem:[#allocation7 + $0x2f4] ss:$8 sps:$4 sm:$0xff]  }
 0x7b6   :  { %2681 = vmatpush1.bf16.msra.mxu0 %v8160_v7  ;;  %v2142_v7 = vrot.slane %v2137_v4, %v9988_v6 }
 0x7b7   :  { %2682 = vmatprep.subr.bf16.mxu0 %v8165_v9 }
 0x7ba   :  { %2683 = vmatpush1.bf16.msra.mxu0 %v8163_v10 }
 0x7bb   :  { %2684 = vmatprep.subr.bf16.mxu0 %v8168_v11 }
 0x7be   :  { %2685 = vmatpush1.bf16.msra.mxu0 %v8166_v12 }
 0x7bf   :  { %2686 = vmatprep.subr.bf16.mxu0 %v8171_v13 }
 0x7c2   :  { %2687 = vmatpush1.bf16.msra.mxu0 %v8169_v14 }
 0x7c3   :  { %2688 = vmatprep.subr.bf16.mxu0 %v8174_v15 }
 0x7c6   :  { %2689 = vmatpush1.bf16.msra.mxu0 %v8172_v40 }
 0x7c7   :  { %2690 = vmatprep.subr.bf16.mxu0 %v8177_v50 }
 0x7ca   :  { %2691 = vmatpush1.bf16.msra.mxu0 %v8175_v51 }
 0x7cb   :  { %2692 = vmatprep.subr.bf16.mxu0 %v8180_v52 }
 0x7ce   :  { %2693 = vmatpush1.bf16.msra.mxu0 %v8178_v53 }
 0x7cf   :  { %2694 = vmatprep.subr.bf16.mxu0 %v8183_v54  ;;  %v2764_v54 = vld [vmem:[#allocation14] sm:$0xf] }
 0x7d2   :  { %2695 = vmatpush1.bf16.msra.mxu0 %v8181_v55  ;;  %v2820_v55 = vld [vmem:[#allocation14 + $0x4] sm:$0xf] }
 0x7d3   :  { %2696 = vmatprep.subr.bf16.mxu0 %v8186_v56  ;;  %v8246_v56 = vld [vmem:[#allocation8 + $0x4] ss:$8 sps:$4 sm:$0xff]  }
 0x7d6   :  { %2697 = vmatpush1.bf16.msra.mxu0 %v8184_v57  ;;  %v2868_v57 = vld [vmem:[#allocation14 + $0x8] sm:$0xf] }
 0x7d7   :  { %2698 = vmatprep.subr.bf16.mxu0 %v8189_v58  ;;  %v8244_v58 = vld [vmem:[#allocation8] ss:$8 sps:$4 sm:$0xff]  }
 0x7da   :  { %2699 = vmatpush1.bf16.msra.mxu0 %v8187_v59  ;;  %v8249_v59 = vld [vmem:[#allocation8 + $0x14] ss:$8 sps:$4 sm:$0xff]  }
 0x7db   :  { %2700 = vmatprep.subr.bf16.mxu0 %v8192_v16  ;;  %v8247_v16 = vld [vmem:[#allocation8 + $0x10] ss:$8 sps:$4 sm:$0xff]  }
 0x7de   :  { %2701 = vmatpush1.bf16.msra.mxu0 %v8190_v17  ;;  %v8252_v17 = vld [vmem:[#allocation8 + $0x24] ss:$8 sps:$4 sm:$0xff]  }
 0x7df   :  { %2702 = vmatprep.subr.bf16.mxu0 %v8195_v18  ;;  %v8250_v18 = vld [vmem:[#allocation8 + $0x20] ss:$8 sps:$4 sm:$0xff]  }
 0x7e2   :  { %2703 = vmatpush1.bf16.msra.mxu0 %v8193_v20  ;;  %v8255_v20 = vld [vmem:[#allocation8 + $0x34] ss:$8 sps:$4 sm:$0xff]  }
 0x7e3   :  { %2715 = vmatprep.subr.bf16.mxu0 %v8198_v28  ;;  %v8253_v28 = vld [vmem:[#allocation8 + $0x30] ss:$8 sps:$4 sm:$0xff]  }
 0x7e5   :  { %2705 = vmatmul.mubr.bf16.vlgmr.msra.gmra.mrb[40].mxu0 %v1983_v36  ;;  %v8234_v36 = vld [vmem:[#allocation7 + $0x2c4] ss:$8 sps:$4 sm:$0xff]  }
 0x7e6   :  { %2716 = vmatpush1.bf16.msra.mxu0 %v8196_v24  ;;  %2747 = vmatprep.mubr.bf16.mxu0 %v2040_v8  ;;  %v2146_v8 = vrot.slane %v2137_v4, %v9999_v19  ;;  %v8258_v24 = vld [vmem:[#allocation8 + $0x44] ss:$8 sps:$4 sm:$0xff]  }
 0x7e7   :  { %2717 = vmatprep.subr.bf16.mxu0 %v8201_v29  ;;  %v8256_v29 = vld [vmem:[#allocation8 + $0x40] ss:$8 sps:$4 sm:$0xff]  }
 0x7ea   :  { %2718 = vmatpush1.bf16.msra.mxu0 %v8199_v32  ;;  %v8261_v32 = vld [vmem:[#allocation8 + $0x54] ss:$8 sps:$4 sm:$0xff]  }
 0x7eb   :  { %2719 = vmatprep.subr.bf16.mxu0 %v8204_v33  ;;  %v8259_v33 = vld [vmem:[#allocation8 + $0x50] ss:$8 sps:$4 sm:$0xff]  }
 0x7ee   :  { %2720 = vmatpush1.bf16.msra.mxu0 %v8202_v35  ;;  %v8264_v35 = vld [vmem:[#allocation8 + $0x64] ss:$8 sps:$4 sm:$0xff]  }
 0x7ef   :  { %2721 = vmatprep.subr.bf16.mxu0 %v8207_v37  ;;  %v8262_v37 = vld [vmem:[#allocation8 + $0x60] ss:$8 sps:$4 sm:$0xff]  }
 0x7f2   :  { %2722 = vmatpush1.bf16.msra.mxu0 %v8205_v38  ;;  %v8267_v38 = vld [vmem:[#allocation8 + $0x74] ss:$8 sps:$4 sm:$0xff]  }
 0x7f3   :  { %2723 = vmatprep.subr.bf16.mxu0 %v8210_v39  ;;  %v8265_v39 = vld [vmem:[#allocation8 + $0x70] ss:$8 sps:$4 sm:$0xff]  }
 0x7f6   :  { %2724 = vmatpush1.bf16.msra.mxu0 %v8208_v41  ;;  %v8270_v41 = vld [vmem:[#allocation8 + $0x84] ss:$8 sps:$4 sm:$0xff]  }
 0x7f7   :  { %2725 = vmatprep.subr.bf16.mxu0 %v8213_v42  ;;  %v8268_v42 = vld [vmem:[#allocation8 + $0x80] ss:$8 sps:$4 sm:$0xff]  }
 0x7fa   :  { %2726 = vmatpush1.bf16.msra.mxu0 %v8211_v43  ;;  %v8273_v43 = vld [vmem:[#allocation8 + $0x94] ss:$8 sps:$4 sm:$0xff]  }
 0x7fb   :  { %2727 = vmatprep.subr.bf16.mxu0 %v8216_v44  ;;  %v8271_v44 = vld [vmem:[#allocation8 + $0x90] ss:$8 sps:$4 sm:$0xff]  }
 0x7fe   :  { %2728 = vmatpush1.bf16.msra.mxu0 %v8214_v45  ;;  %v8276_v45 = vld [vmem:[#allocation8 + $0xa4] ss:$8 sps:$4 sm:$0xff]  }
 0x7ff   :  { %2729 = vmatprep.subr.bf16.mxu0 %v8219_v46  ;;  %v8274_v46 = vld [vmem:[#allocation8 + $0xa0] ss:$8 sps:$4 sm:$0xff]  }
 0x802   :  { %2730 = vmatpush1.bf16.msra.mxu0 %v8217_v47  ;;  %v8279_v47 = vld [vmem:[#allocation8 + $0xb4] ss:$8 sps:$4 sm:$0xff]  }
 0x803   :  { %2731 = vmatprep.subr.bf16.mxu0 %v8222_v48  ;;  %v8277_v48 = vld [vmem:[#allocation8 + $0xb0] ss:$8 sps:$4 sm:$0xff]  }
 0x806   :  { %2732 = vmatpush1.bf16.msra.mxu0 %v8220_v49  ;;  %v8282_v49 = vld [vmem:[#allocation8 + $0xc4] ss:$8 sps:$4 sm:$0xff]  }
 0x807   :  { %2733 = vmatprep.subr.bf16.mxu0 %v8225_v21  ;;  %v8280_v21 = vld [vmem:[#allocation8 + $0xc0] ss:$8 sps:$4 sm:$0xff]  }
 0x80a   :  { %2734 = vmatpush1.bf16.msra.mxu0 %v8223_v22  ;;  %v8285_v22 = vld [vmem:[#allocation8 + $0xd4] ss:$8 sps:$4 sm:$0xff]  }
 0x80b   :  { %2735 = vmatprep.subr.bf16.mxu0 %v8228_v23  ;;  %v8283_v23 = vld [vmem:[#allocation8 + $0xd0] ss:$8 sps:$4 sm:$0xff]  }
 0x80e   :  { %2736 = vmatpush1.bf16.msra.mxu0 %v8226_v60  ;;  %v8288_v60 = vld [vmem:[#allocation8 + $0xe4] ss:$8 sps:$4 sm:$0xff]  }
 0x80f   :  { %2737 = vmatprep.subr.bf16.mxu0 %v8231_v26  ;;  %v8286_v26 = vld [vmem:[#allocation8 + $0xe0] ss:$8 sps:$4 sm:$0xff]  }
 0x812   :  { %2738 = vmatpush1.bf16.msra.mxu0 %v8229_v30  ;;  %v8291_v30 = vld [vmem:[#allocation8 + $0xf4] ss:$8 sps:$4 sm:$0xff]  }
 0x813   :  { %2739 = vmatprep.subr.bf16.mxu0 %v8234_v36  ;;  %v8289_v36 = vld [vmem:[#allocation8 + $0xf0] ss:$8 sps:$4 sm:$0xff]  }
 0x816   :  { %2740 = vmatpush1.bf16.msra.mxu0 %v8232_v31  ;;  %v8294_v31 = vld [vmem:[#allocation8 + $0x104] ss:$8 sps:$4 sm:$0xff]  }
 0x817   :  { %2741 = vmatprep.subr.bf16.mxu0 %v8237_v25 }
 0x81a   :  { %2742 = vmatpush1.bf16.msra.mxu0 %v8235_v34 }
 0x81b   :  { %2743 = vmatprep.subr.bf16.mxu0 %v8240_v27 }
 0x81e   :  { %2744 = vmatpush1.bf16.msra.mxu0 %v8238_v61 }
 0x81f   :  { %2745 = vmatprep.subr.bf16.mxu0 %v8243_v63  ;;  %v8292_v63 = vld [vmem:[#allocation8 + $0x100] ss:$8 sps:$4 sm:$0xff]  }
 0x822   :  { %2746 = vmatpush1.bf16.msra.mxu0 %v8241_v0 }
 0x825   :  { %2748 = vmatmul.mubr.bf16.vlgmr.msra.gmra.mrb[40].mxu0 %v2039_v2 }
 0x8f8   :  { %v2749_v9 = vpop.f32.mrb[40].mxu0 }
 0x8f9   :  { %v7730_v10 = vadd.f32 %v2749_v9, %v2142_v7  ;;  %v2751_v11 = vpop.f32.mrb[41].mxu0  ;;  %v10040_v9 = vld [vmem:[#allocation25] ss:$8 sps:$4 sm:$0xff]  }
 0x8fa   :  { %v7731_v12 = vadd.f32 %v2751_v11, %v2146_v8  ;;  %v2753_v13 = vpop.f32.mrb[42].mxu0  ;;  %v10042_v11 = vld [vmem:[#allocation25 + $0x14] ss:$8 sps:$4 sm:$0xff]  }
 0x8fb   :  { %v7732_v14 = vadd.f32 %v2753_v13, %v2142_v7  ;;  %v2755_v15 = vpop.f32.mrb[43].mxu0  ;;  %v2758_v50 = vmax.f32 %v7730_v10, 0.0  ;;  %v8297_v7 = vld [vmem:[#allocation8 + $0x114] ss:$8 sps:$4 sm:$0xff]   ;;  %v8295_v10 = vld [vmem:[#allocation8 + $0x110] ss:$8 sps:$4 sm:$0xff]  }
 0x8fc   :  { %v7733_v40 = vadd.f32 %v2755_v15, %v2146_v8  ;;  %v2759_v52 = vmax.f32 %v7731_v12, 0.0  ;;  %v10038_v8 = vld [vmem:[#allocation25 + $0x4] ss:$8 sps:$4 sm:$0xff]  }
 0x8fd   :  { %v2760_v51 = vmax.f32 %v7732_v14, 0.0  ;;  %v8300_v12 = vld [vmem:[#allocation8 + $0x124] ss:$8 sps:$4 sm:$0xff]   ;;  %7603 = vmatprep.subr.bf16.mxu0 %v10038_v8 }
 0x8fe   :  { %v2761_v53 = vmax.f32 %v7733_v40, 0.0  ;;  %7605 = vmatpush1.bf16.msra.mxu0 %v10040_v9  ;;  %v10048_v14 = vld [vmem:[#allocation25 + $0x10] ss:$8 sps:$4 sm:$0xff]   ;;  %v8298_v40 = vld [vmem:[#allocation8 + $0x120] ss:$8 sps:$4 sm:$0xff]  }
 0x8ff   :  { %v2762_v62 = vpack.c.bf16 %v2760_v51, %v2758_v50  ;;  %7607 = vmatprep.subr.bf16.mxu0 %v10042_v11 }
 0x900   :  { %v2763_v1 = vpack.c.bf16 %v2761_v53, %v2759_v52  ;;  %v10051_v52 = vld [vmem:[#allocation25 + $0x24] ss:$8 sps:$4 sm:$0xff]   ;;  %v8303_v53 = vld [vmem:[#allocation8 + $0x134] ss:$8 sps:$4 sm:$0xff]  }
 0x901   :  { %v2771_v2 = vsel %vm2769_vm7, %v2762_v62, 0 }
 0x902   :  { %6747 = vmatprep.subr.msk.bf16.mxu1 %vm2769_vm7, %v2763_v1  ;;  %7609 = vmatpush1.bf16.msra.mxu0 %v10048_v14 }
 0x903   :  { %2777 = vmatpush1.bf16.msra.mxu1 %v2771_v2  ;;  %7611 = vmatprep.subr.bf16.mxu0 %v10051_v52 }
 0x904   :  { %6749 = vmatprep.subr.msk.bf16.mxu1 %vm2769_vm7, %v2763_v1 }
 0x906   :  { %6748 = vmatmul.mubr.msk.bf16.vlgmr.msra.gmra.mrb[20].mxu1 %vm2765_vm8, %v2764_v54  ;;  %v10057_v54 = vld [vmem:[#allocation25 + $0x34] ss:$8 sps:$4 sm:$0xff]  }
 0x907   :  { %2825 = vmatpush1.bf16.msra.mxu1 %v2771_v2  ;;  %2856 = vmatprep.mubr.bf16.mxu1 %v10352_v3 }
 0x908   :  { %6751 = vmatprep.subr.msk.bf16.mxu1 %vm2769_vm7, %v2763_v1  ;;  %v10054_v1 = vld [vmem:[#allocation25 + $0x20] ss:$8 sps:$4 sm:$0xff]  }
 0x909   :  { %7613 = vmatpush1.bf16.msra.mxu0 %v10054_v1 }
 0x90a   :  { %7615 = vmatprep.subr.bf16.mxu0 %v10057_v54 }
 0x90e   :  { %6750 = vmatmul.mubr.msk.bf16.vlgmr.msra.gmra.mrb[24].mxu1 %vm2765_vm8, %v2820_v55  ;;  %v8306_v55 = vld [vmem:[#allocation8 + $0x144] ss:$8 sps:$4 sm:$0xff]  }
 0x90f   :  { %2873 = vmatpush1.bf16.msra.mxu1 %v2771_v2  ;;  %2904 = vmatprep.mubr.bf16.mxu1 %v10352_v3  ;;  %v8301_v2 = vld [vmem:[#allocation8 + $0x130] ss:$8 sps:$4 sm:$0xff]  }
 0x910   :  { %3503 = vmatprep.subr.bf16.mxu1 %v8246_v56 }
 0x916   :  { %6752 = vmatmul.mubr.msk.bf16.vlgmr.msra.gmra.mrb[28].mxu1 %vm2765_vm8, %v2868_v57  ;;  %v10062_v57 = vld [vmem:[#allocation25 + $0x30] ss:$8 sps:$4 sm:$0xff]  }
 0x917   :  { %3504 = vmatpush1.bf16.msra.mxu1 %v8244_v58  ;;  %7617 = vmatpush1.bf16.msra.mxu0 %v10062_v57 }
 0x918   :  { %3505 = vmatprep.subr.bf16.mxu1 %v8249_v59  ;;  %v8304_v59 = vld [vmem:[#allocation8 + $0x140] ss:$8 sps:$4 sm:$0xff]  }
 0x91b   :  { %3506 = vmatpush1.bf16.msra.mxu1 %v8247_v16 }
 0x91c   :  { %3507 = vmatprep.subr.bf16.mxu1 %v8252_v17  ;;  %v10067_v17 = vld [vmem:[#allocation25 + $0x44] ss:$8 sps:$4 sm:$0xff]  }
 0x91d   :  { %7619 = vmatprep.subr.bf16.mxu0 %v10067_v17 }
 0x91f   :  { %3508 = vmatpush1.bf16.msra.mxu1 %v8250_v18  ;;  %v8309_v18 = vld [vmem:[#allocation8 + $0x154] ss:$8 sps:$4 sm:$0xff]  }
 0x920   :  { %3509 = vmatprep.subr.bf16.mxu1 %v8255_v20 }
 0x923   :  { %3510 = vmatpush1.bf16.msra.mxu1 %v8253_v28  ;;  %v10070_v28 = vld [vmem:[#allocation25 + $0x40] ss:$8 sps:$4 sm:$0xff]  }
 0x924   :  { %3511 = vmatprep.subr.bf16.mxu1 %v8258_v24  ;;  %v8307_v24 = vld [vmem:[#allocation8 + $0x150] ss:$8 sps:$4 sm:$0xff]   ;;  %7621 = vmatpush1.bf16.msra.mxu0 %v10070_v28 }
 0x927   :  { %3512 = vmatpush1.bf16.msra.mxu1 %v8256_v29  ;;  %v10073_v29 = vld [vmem:[#allocation25 + $0x54] ss:$8 sps:$4 sm:$0xff]  }
 0x928   :  { %3513 = vmatprep.subr.bf16.mxu1 %v8261_v32  ;;  %v8312_v32 = vld [vmem:[#allocation8 + $0x164] ss:$8 sps:$4 sm:$0xff]   ;;  %7623 = vmatprep.subr.bf16.mxu0 %v10073_v29 }
 0x92b   :  { %3514 = vmatpush1.bf16.msra.mxu1 %v8259_v33  ;;  %v10076_v33 = vld [vmem:[#allocation25 + $0x50] ss:$8 sps:$4 sm:$0xff]  }
 0x92c   :  { %3515 = vmatprep.subr.bf16.mxu1 %v8264_v35  ;;  %v8310_v35 = vld [vmem:[#allocation8 + $0x160] ss:$8 sps:$4 sm:$0xff]   ;;  %7625 = vmatpush1.bf16.msra.mxu0 %v10076_v33 }
 0x92f   :  { %3516 = vmatpush1.bf16.msra.mxu1 %v8262_v37  ;;  %v10079_v37 = vld [vmem:[#allocation25 + $0x64] ss:$8 sps:$4 sm:$0xff]  }
 0x930   :  { %3517 = vmatprep.subr.bf16.mxu1 %v8267_v38  ;;  %v8315_v38 = vld [vmem:[#allocation8 + $0x174] ss:$8 sps:$4 sm:$0xff]   ;;  %7627 = vmatprep.subr.bf16.mxu0 %v10079_v37 }
 0x933   :  { %3518 = vmatpush1.bf16.msra.mxu1 %v8265_v39  ;;  %v10082_v39 = vld [vmem:[#allocation25 + $0x60] ss:$8 sps:$4 sm:$0xff]  }
 0x934   :  { %3519 = vmatprep.subr.bf16.mxu1 %v8270_v41  ;;  %v8313_v41 = vld [vmem:[#allocation8 + $0x170] ss:$8 sps:$4 sm:$0xff]   ;;  %7629 = vmatpush1.bf16.msra.mxu0 %v10082_v39 }
 0x937   :  { %3520 = vmatpush1.bf16.msra.mxu1 %v8268_v42  ;;  %v10085_v42 = vld [vmem:[#allocation25 + $0x74] ss:$8 sps:$4 sm:$0xff]  }
 0x938   :  { %3521 = vmatprep.subr.bf16.mxu1 %v8273_v43  ;;  %v8318_v43 = vld [vmem:[#allocation8 + $0x184] ss:$8 sps:$4 sm:$0xff]   ;;  %7631 = vmatprep.subr.bf16.mxu0 %v10085_v42 }
 0x93b   :  { %3522 = vmatpush1.bf16.msra.mxu1 %v8271_v44  ;;  %v10088_v44 = vld [vmem:[#allocation25 + $0x70] ss:$8 sps:$4 sm:$0xff]  }
 0x93c   :  { %3523 = vmatprep.subr.bf16.mxu1 %v8276_v45  ;;  %v8316_v45 = vld [vmem:[#allocation8 + $0x180] ss:$8 sps:$4 sm:$0xff]   ;;  %7633 = vmatpush1.bf16.msra.mxu0 %v10088_v44 }
 0x93f   :  { %3524 = vmatpush1.bf16.msra.mxu1 %v8274_v46  ;;  %v10091_v46 = vld [vmem:[#allocation25 + $0x84] ss:$8 sps:$4 sm:$0xff]  }
 0x940   :  { %3525 = vmatprep.subr.bf16.mxu1 %v8279_v47  ;;  %v8321_v47 = vld [vmem:[#allocation8 + $0x194] ss:$8 sps:$4 sm:$0xff]   ;;  %7635 = vmatprep.subr.bf16.mxu0 %v10091_v46 }
 0x943   :  { %3526 = vmatpush1.bf16.msra.mxu1 %v8277_v48  ;;  %v10094_v48 = vld [vmem:[#allocation25 + $0x80] ss:$8 sps:$4 sm:$0xff]  }
 0x944   :  { %3527 = vmatprep.subr.bf16.mxu1 %v8282_v49  ;;  %v8319_v49 = vld [vmem:[#allocation8 + $0x190] ss:$8 sps:$4 sm:$0xff]   ;;  %7637 = vmatpush1.bf16.msra.mxu0 %v10094_v48 }
 0x947   :  { %3528 = vmatpush1.bf16.msra.mxu1 %v8280_v21  ;;  %v10097_v21 = vld [vmem:[#allocation25 + $0x94] ss:$8 sps:$4 sm:$0xff]  }
 0x948   :  { %3529 = vmatprep.subr.bf16.mxu1 %v8285_v22  ;;  %v8324_v22 = vld [vmem:[#allocation8 + $0x1a4] ss:$8 sps:$4 sm:$0xff]   ;;  %7639 = vmatprep.subr.bf16.mxu0 %v10097_v21 }
 0x94b   :  { %3530 = vmatpush1.bf16.msra.mxu1 %v8283_v23  ;;  %v10100_v23 = vld [vmem:[#allocation25 + $0x90] ss:$8 sps:$4 sm:$0xff]  }
 0x94c   :  { %3531 = vmatprep.subr.bf16.mxu1 %v8288_v60  ;;  %v8322_v60 = vld [vmem:[#allocation8 + $0x1a0] ss:$8 sps:$4 sm:$0xff]   ;;  %7641 = vmatpush1.bf16.msra.mxu0 %v10100_v23 }
 0x94f   :  { %3532 = vmatpush1.bf16.msra.mxu1 %v8286_v26  ;;  %v10103_v26 = vld [vmem:[#allocation25 + $0xa4] ss:$8 sps:$4 sm:$0xff]  }
 0x950   :  { %3533 = vmatprep.subr.bf16.mxu1 %v8291_v30  ;;  %v8327_v30 = vld [vmem:[#allocation8 + $0x1b4] ss:$8 sps:$4 sm:$0xff]   ;;  %7643 = vmatprep.subr.bf16.mxu0 %v10103_v26 }
 0x953   :  { %3534 = vmatpush1.bf16.msra.mxu1 %v8289_v36  ;;  %v10106_v36 = vld [vmem:[#allocation25 + $0xa0] ss:$8 sps:$4 sm:$0xff]  }
 0x954   :  { %3544 = vmatprep.subr.bf16.mxu1 %v8294_v31  ;;  %v8325_v31 = vld [vmem:[#allocation8 + $0x1b0] ss:$8 sps:$4 sm:$0xff]   ;;  %7645 = vmatpush1.bf16.msra.mxu0 %v10106_v36 }
 0x9d9   :  { %v2810_v25 = vpop.f32.mrb[20].mxu1 }
 0x9da   :  { %v2812_v34 = vpop.f32.mrb[21].mxu1  ;;  %v2817_v0 = vpack.c.bf16 %v2810_v25, %v2810_v25  ;;  %v10109_v25 = vld [vmem:[#allocation25 + $0xb4] ss:$8 sps:$4 sm:$0xff]  }
 0x9db   :  { %v2818_v27 = vpack.c.bf16 %v2812_v34, %v2812_v34  ;;  %v2814_v61 = vpop.f32.mrb[22].mxu1  ;;  %v8330_v34 = vld [vmem:[#allocation8 + $0x1c4] ss:$8 sps:$4 sm:$0xff]   ;;  %7647 = vmatprep.subr.bf16.mxu0 %v10109_v25 }
 0x9dc   :  { %v2815_v4 = vpop.f32.mrb[23].mxu1  ;;  %v8328_v61 = vld [vmem:[#allocation8 + $0x1c0] ss:$8 sps:$4 sm:$0xff]  }
 0x9dd   :  { %3535 = vmatprep.mubr.bf16.mxu1 %v2818_v27  ;;  %v10112_v27 = vld [vmem:[#allocation25 + $0xb0] ss:$8 sps:$4 sm:$0xff]  }
 0x9de   :  { %3536 = vmatmul.mubr.bf16.vlgmr.msra.gmra.mrb[32].mxu1 %v2817_v0  ;;  %7649 = vmatpush1.bf16.msra.mxu0 %v10112_v27  ;;  %v8331_v0 = vld [vmem:[#allocation8 + $0x1d0] ss:$8 sps:$4 sm:$0xff]   ;;  %v8336_v4 = vld [vmem:[#allocation8 + $0x1e4] ss:$8 sps:$4 sm:$0xff]  }
 0x9df   :  { %3545 = vmatpush1.bf16.msra.mxu1 %v8292_v63  ;;  %v8333_v63 = vld [vmem:[#allocation8 + $0x1d4] ss:$8 sps:$4 sm:$0xff]  }
 0x9e0   :  { %3546 = vmatprep.subr.bf16.mxu1 %v8297_v7  ;;  %v8334_v7 = vld [vmem:[#allocation8 + $0x1e0] ss:$8 sps:$4 sm:$0xff]  }
 0x9e1   :  { %v10045_v13 = vpop.f32.mrb[24].mxu1 }
 0x9e2   :  { %v2860_v15 = vpop.f32.mrb[25].mxu1 }
 0x9e3   :  { %3547 = vmatpush1.bf16.msra.mxu1 %v8295_v10  ;;  %v2866_v50 = vpack.c.bf16 %v2860_v15, %v2860_v15  ;;  %v2862_v51 = vpop.f32.mrb[26].mxu1  ;;  %v8339_v10 = vld [vmem:[#allocation8 + $0x1f4] ss:$8 sps:$4 sm:$0xff]   ;;  %v8342_v15 = vld [vmem:[#allocation8 + $0x204] ss:$8 sps:$4 sm:$0xff]  }
 0x9e4   :  { %3548 = vmatprep.subr.bf16.mxu1 %v8300_v12  ;;  %v2863_v62 = vpop.f32.mrb[27].mxu1  ;;  %v8337_v12 = vld [vmem:[#allocation8 + $0x1f0] ss:$8 sps:$4 sm:$0xff]  }
 0x9e5   :  { %3576 = vmatprep.mubr.bf16.mxu1 %v2866_v50  ;;  %v8340_v50 = vld [vmem:[#allocation8 + $0x200] ss:$8 sps:$4 sm:$0xff]   ;;  %v8343_v62 = vld [vmem:[#allocation8 + $0x210] ss:$8 sps:$4 sm:$0xff]  }
 0x9e7   :  { %3549 = vmatpush1.bf16.msra.mxu1 %v8298_v40  ;;  %v2865_v40 = vpack.c.bf16 %v10045_v13, %v10045_v13  ;;  %v8354_v13 = vld [vmem:[#allocation8 + $0x244] ss:$8 sps:$4 sm:$0xff]  }
 0x9e8   :  { %3550 = vmatprep.subr.bf16.mxu1 %v8303_v53  ;;  %v8345_v53 = vld [vmem:[#allocation8 + $0x214] ss:$8 sps:$4 sm:$0xff]  }
 0x9e9   :  { %v10059_v56 = vpop.f32.mrb[28].mxu1 }
 0x9ea   :  { %v10064_v58 = vpop.f32.mrb[29].mxu1 }
 0x9eb   :  { %3551 = vmatpush1.bf16.msra.mxu1 %v8301_v2  ;;  %v2910_v16 = vpop.f32.mrb[30].mxu1  ;;  %v2914_v51 = vpack.c.bf16 %v10064_v58, %v10064_v58  ;;  %v8348_v2 = vld [vmem:[#allocation8 + $0x224] ss:$8 sps:$4 sm:$0xff]   ;;  %v8357_v58 = vld [vmem:[#allocation8 + $0x254] ss:$8 sps:$4 sm:$0xff]  }
 0x9ec   :  { %3552 = vmatprep.subr.bf16.mxu1 %v8306_v55  ;;  %v2911_v20 = vpop.f32.mrb[31].mxu1  ;;  %v8346_v55 = vld [vmem:[#allocation8 + $0x220] ss:$8 sps:$4 sm:$0xff]   ;;  %v8349_v16 = vld [vmem:[#allocation8 + $0x230] ss:$8 sps:$4 sm:$0xff]  }
 0x9ed   :  { %v8355_v20 = vld [vmem:[#allocation8 + $0x250] ss:$8 sps:$4 sm:$0xff]  }
 0x9ef   :  { %3553 = vmatpush1.bf16.msra.mxu1 %v8304_v59  ;;  %v8351_v59 = vld [vmem:[#allocation8 + $0x234] ss:$8 sps:$4 sm:$0xff]  }
 0x9f0   :  { %3554 = vmatprep.subr.bf16.mxu1 %v8309_v18  ;;  %v8352_v18 = vld [vmem:[#allocation8 + $0x240] ss:$8 sps:$4 sm:$0xff]  }
 0x9f3   :  { %3555 = vmatpush1.bf16.msra.mxu1 %v8307_v24  ;;  %v8360_v24 = vld [vmem:[#allocation8 + $0x264] ss:$8 sps:$4 sm:$0xff]  }
 0x9f4   :  { %3556 = vmatprep.subr.bf16.mxu1 %v8312_v32  ;;  %v8358_v32 = vld [vmem:[#allocation8 + $0x260] ss:$8 sps:$4 sm:$0xff]  }
 0x9f7   :  { %3557 = vmatpush1.bf16.msra.mxu1 %v8310_v35  ;;  %v8363_v35 = vld [vmem:[#allocation8 + $0x274] ss:$8 sps:$4 sm:$0xff]  }
 0x9f8   :  { %3558 = vmatprep.subr.bf16.mxu1 %v8315_v38  ;;  %v8361_v38 = vld [vmem:[#allocation8 + $0x270] ss:$8 sps:$4 sm:$0xff]  }
 0x9fb   :  { %3559 = vmatpush1.bf16.msra.mxu1 %v8313_v41  ;;  %v8366_v41 = vld [vmem:[#allocation8 + $0x284] ss:$8 sps:$4 sm:$0xff]  }
 0x9fc   :  { %3560 = vmatprep.subr.bf16.mxu1 %v8318_v43  ;;  %v8364_v43 = vld [vmem:[#allocation8 + $0x280] ss:$8 sps:$4 sm:$0xff]  }
 0x9ff   :  { %3561 = vmatpush1.bf16.msra.mxu1 %v8316_v45  ;;  %v8369_v45 = vld [vmem:[#allocation8 + $0x294] ss:$8 sps:$4 sm:$0xff]  }
 0xa00   :  { %3562 = vmatprep.subr.bf16.mxu1 %v8321_v47  ;;  %v8367_v47 = vld [vmem:[#allocation8 + $0x290] ss:$8 sps:$4 sm:$0xff]  }
 0xa03   :  { %3563 = vmatpush1.bf16.msra.mxu1 %v8319_v49  ;;  %v8372_v49 = vld [vmem:[#allocation8 + $0x2a4] ss:$8 sps:$4 sm:$0xff]  }
 0xa04   :  { %3564 = vmatprep.subr.bf16.mxu1 %v8324_v22  ;;  %v8370_v22 = vld [vmem:[#allocation8 + $0x2a0] ss:$8 sps:$4 sm:$0xff]  }
 0xa07   :  { %3565 = vmatpush1.bf16.msra.mxu1 %v8322_v60  ;;  %v8375_v60 = vld [vmem:[#allocation8 + $0x2b4] ss:$8 sps:$4 sm:$0xff]  }
 0xa08   :  { %3566 = vmatprep.subr.bf16.mxu1 %v8327_v30  ;;  %v8373_v30 = vld [vmem:[#allocation8 + $0x2b0] ss:$8 sps:$4 sm:$0xff]  }
 0xa0b   :  { %3567 = vmatpush1.bf16.msra.mxu1 %v8325_v31  ;;  %v8378_v31 = vld [vmem:[#allocation8 + $0x2c4] ss:$8 sps:$4 sm:$0xff]  }
 0xa0c   :  { %3568 = vmatprep.subr.bf16.mxu1 %v8330_v34  ;;  %v8376_v34 = vld [vmem:[#allocation8 + $0x2c0] ss:$8 sps:$4 sm:$0xff]  }
 0xa0f   :  { %3569 = vmatpush1.bf16.msra.mxu1 %v8328_v61  ;;  %v8381_v61 = vld [vmem:[#allocation8 + $0x2d4] ss:$8 sps:$4 sm:$0xff]  }
 0xa10   :  { %3570 = vmatprep.subr.bf16.mxu1 %v8333_v63  ;;  %v8379_v63 = vld [vmem:[#allocation8 + $0x2d0] ss:$8 sps:$4 sm:$0xff]  }
 0xa13   :  { %3571 = vmatpush1.bf16.msra.mxu1 %v8331_v0  ;;  %v8384_v0 = vld [vmem:[#allocation8 + $0x2e4] ss:$8 sps:$4 sm:$0xff]  }
 0xa14   :  { %3572 = vmatprep.subr.bf16.mxu1 %v8336_v4  ;;  %v8382_v4 = vld [vmem:[#allocation8 + $0x2e0] ss:$8 sps:$4 sm:$0xff]  }
 0xa17   :  { %3573 = vmatpush1.bf16.msra.mxu1 %v8334_v7  ;;  %v8387_v7 = vld [vmem:[#allocation8 + $0x2f4] ss:$8 sps:$4 sm:$0xff]  }
 0xa18   :  { %3574 = vmatprep.subr.bf16.mxu1 %v8339_v10  ;;  %v8385_v10 = vld [vmem:[#allocation8 + $0x2f0] ss:$8 sps:$4 sm:$0xff]  }
 0xa1b   :  { %3575 = vmatpush1.bf16.msra.mxu1 %v8337_v12  ;;  %v2913_v12 = vpack.c.bf16 %v10059_v56, %v10059_v56  ;;  %v8435_v56 = vld [vmem:[#allocation25 + $0xf0] ss:$8 sps:$4 sm:$0xff]  }
 0xa1c   :  { %3585 = vmatprep.subr.bf16.mxu1 %v8342_v15 }
 0xa1e   :  { %3577 = vmatmul.mubr.bf16.vlgmr.msra.gmra.mrb[32].mxu1 %v2865_v40 }
 0xa1f   :  { %3586 = vmatpush1.bf16.msra.mxu1 %v8340_v50  ;;  %3617 = vmatprep.mubr.bf16.mxu1 %v2914_v51 }
 0xa20   :  { %3587 = vmatprep.subr.bf16.mxu1 %v8345_v53 }
 0xa23   :  { %3588 = vmatpush1.bf16.msra.mxu1 %v8343_v62 }
 0xa24   :  { %3589 = vmatprep.subr.bf16.mxu1 %v8348_v2 }
 0xa27   :  { %3590 = vmatpush1.bf16.msra.mxu1 %v8346_v55 }
 0xa28   :  { %3591 = vmatprep.subr.bf16.mxu1 %v8351_v59 }
 0xa2b   :  { %3592 = vmatpush1.bf16.msra.mxu1 %v8349_v16 }
 0xa2c   :  { %3593 = vmatprep.subr.bf16.mxu1 %v8354_v13 }
 0xa2f   :  { %3594 = vmatpush1.bf16.msra.mxu1 %v8352_v18 }
 0xa30   :  { %3595 = vmatprep.subr.bf16.mxu1 %v8357_v58 }
 0xa33   :  { %3596 = vmatpush1.bf16.msra.mxu1 %v8355_v20 }
 0xa34   :  { %3597 = vmatprep.subr.bf16.mxu1 %v8360_v24 }
 0xa37   :  { %3598 = vmatpush1.bf16.msra.mxu1 %v8358_v32 }
 0xa38   :  { %3599 = vmatprep.subr.bf16.mxu1 %v8363_v35 }
 0xa3b   :  { %3600 = vmatpush1.bf16.msra.mxu1 %v8361_v38 }
 0xa3c   :  { %3601 = vmatprep.subr.bf16.mxu1 %v8366_v41 }
 0xa3f   :  { %3602 = vmatpush1.bf16.msra.mxu1 %v8364_v43 }
 0xa40   :  { %3603 = vmatprep.subr.bf16.mxu1 %v8369_v45  ;;  %v8463_v45 = vld [vmem:[#allocation10 + $0xc8] ss:$12 sps:$4 sm:$0xff]  }
 0xa43   :  { %3604 = vmatpush1.bf16.msra.mxu1 %v8367_v47  ;;  %v8464_v47 = vld [vmem:[#allocation10 + $0x8] ss:$12 sps:$4 sm:$0xff]  }
 0xa44   :  { %3605 = vmatprep.subr.bf16.mxu1 %v8372_v49  ;;  %v8468_v49 = vld [vmem:[#allocation10 + $0xe0] ss:$12 sps:$4 sm:$0xff]  }
 0xa47   :  { %3606 = vmatpush1.bf16.msra.mxu1 %v8370_v22  ;;  %v8469_v22 = vld [vmem:[#allocation10 + $0x20] ss:$12 sps:$4 sm:$0xff]  }
 0xa48   :  { %3607 = vmatprep.subr.bf16.mxu1 %v8375_v60  ;;  %v8473_v60 = vld [vmem:[#allocation10 + $0xf8] ss:$12 sps:$4 sm:$0xff]  }
 0xa4b   :  { %3608 = vmatpush1.bf16.msra.mxu1 %v8373_v30  ;;  %v8474_v30 = vld [vmem:[#allocation10 + $0x38] ss:$12 sps:$4 sm:$0xff]  }
 0xa4c   :  { %3609 = vmatprep.subr.bf16.mxu1 %v8378_v31  ;;  %v8478_v31 = vld [vmem:[#allocation10 + $0x110] ss:$12 sps:$4 sm:$0xff]  }
 0xa4f   :  { %3610 = vmatpush1.bf16.msra.mxu1 %v8376_v34  ;;  %v8479_v34 = vld [vmem:[#allocation10 + $0x50] ss:$12 sps:$4 sm:$0xff]  }
 0xa50   :  { %3611 = vmatprep.subr.bf16.mxu1 %v8381_v61  ;;  %v8483_v61 = vld [vmem:[#allocation10 + $0x128] ss:$12 sps:$4 sm:$0xff]  }
 0xa53   :  { %3612 = vmatpush1.bf16.msra.mxu1 %v8379_v63  ;;  %v8484_v63 = vld [vmem:[#allocation10 + $0x68] ss:$12 sps:$4 sm:$0xff]  }
 0xa54   :  { %3613 = vmatprep.subr.bf16.mxu1 %v8384_v0  ;;  %v8488_v0 = vld [vmem:[#allocation10 + $0x140] ss:$12 sps:$4 sm:$0xff]  }
 0xa57   :  { %3614 = vmatpush1.bf16.msra.mxu1 %v8382_v4  ;;  %v8489_v4 = vld [vmem:[#allocation10 + $0x80] ss:$12 sps:$4 sm:$0xff]  }
 0xa58   :  { %3615 = vmatprep.subr.bf16.mxu1 %v8387_v7  ;;  %v8493_v7 = vld [vmem:[#allocation10 + $0x158] ss:$12 sps:$4 sm:$0xff]  }
 0xa5b   :  { %3616 = vmatpush1.bf16.msra.mxu1 %v8385_v10  ;;  %v8494_v10 = vld [vmem:[#allocation10 + $0x98] ss:$12 sps:$4 sm:$0xff]  }
 0xa5c   :  { %7667 = vmatprep.subr.bf16.mxu1 %v10038_v8  ;;  %v8424_v8 = vld [vmem:[#allocation25 + $0xc4] ss:$8 sps:$4 sm:$0xff]  }
 0xa5d   :  { %7651 = vmatprep.subr.bf16.mxu0 %v8424_v8 }
 0xa5e   :  { %3618 = vmatmul.mubr.bf16.vlgmr.msra.gmra.mrb[32].mxu1 %v2913_v12 }
 0xa5f   :  { %7669 = vmatpush1.bf16.msra.mxu1 %v10040_v9  ;;  %v8426_v9 = vld [vmem:[#allocation25 + $0xc0] ss:$8 sps:$4 sm:$0xff]  }
 0xa60   :  { %7671 = vmatprep.subr.bf16.mxu1 %v10042_v11  ;;  %7653 = vmatpush1.bf16.msra.mxu0 %v8426_v9  ;;  %v8427_v11 = vld [vmem:[#allocation25 + $0xd4] ss:$8 sps:$4 sm:$0xff]  }
 0xa61   :  { %7655 = vmatprep.subr.bf16.mxu0 %v8427_v11 }
 0xa63   :  { %7673 = vmatpush1.bf16.msra.mxu1 %v10048_v14  ;;  %v8429_v14 = vld [vmem:[#allocation25 + $0xd0] ss:$8 sps:$4 sm:$0xff]  }
 0xa64   :  { %7675 = vmatprep.subr.bf16.mxu1 %v10051_v52  ;;  %7657 = vmatpush1.bf16.msra.mxu0 %v8429_v14  ;;  %v8430_v52 = vld [vmem:[#allocation25 + $0xe4] ss:$8 sps:$4 sm:$0xff]  }
 0xa65   :  { %7659 = vmatprep.subr.bf16.mxu0 %v8430_v52 }
 0xa67   :  { %7677 = vmatpush1.bf16.msra.mxu1 %v10054_v1  ;;  %v8432_v1 = vld [vmem:[#allocation25 + $0xe0] ss:$8 sps:$4 sm:$0xff]  }
 0xa68   :  { %7679 = vmatprep.subr.bf16.mxu1 %v10057_v54  ;;  %v8433_v54 = vld [vmem:[#allocation25 + $0xf4] ss:$8 sps:$4 sm:$0xff]   ;;  %7661 = vmatpush1.bf16.msra.mxu0 %v8432_v1 }
 0xa69   :  { %7663 = vmatprep.subr.bf16.mxu0 %v8433_v54 }
 0xa6b   :  { %7681 = vmatpush1.bf16.msra.mxu1 %v10062_v57  ;;  %v3011_v57 = vld [vmem:[#allocation20] sm:$0x3] }
 0xa6c   :  { %7683 = vmatprep.subr.bf16.mxu1 %v10067_v17  ;;  %7665 = vmatpush1.bf16.msra.mxu0 %v8435_v56  ;;  %v3016_v17 = vrot.slane %v3011_v57, %v9988_v6 }
 0xa6f   :  { %7685 = vmatpush1.bf16.msra.mxu1 %v10070_v28  ;;  %v3020_v28 = vrot.slane %v3011_v57, %v9999_v19 }
 0xa70   :  { %7687 = vmatprep.subr.bf16.mxu1 %v10073_v29 }
 0xa73   :  { %7689 = vmatpush1.bf16.msra.mxu1 %v10076_v33 }
 0xa74   :  { %7691 = vmatprep.subr.bf16.mxu1 %v10079_v37 }
 0xa77   :  { %7693 = vmatpush1.bf16.msra.mxu1 %v10082_v39 }
 0xa78   :  { %7695 = vmatprep.subr.bf16.mxu1 %v10085_v42 }
 0xa7b   :  { %7697 = vmatpush1.bf16.msra.mxu1 %v10088_v44 }
 0xa7c   :  { %7699 = vmatprep.subr.bf16.mxu1 %v10091_v46 }
 0xa7f   :  { %7701 = vmatpush1.bf16.msra.mxu1 %v10094_v48 }
 0xa80   :  { %7703 = vmatprep.subr.bf16.mxu1 %v10097_v21 }
 0xa83   :  { %7705 = vmatpush1.bf16.msra.mxu1 %v10100_v23 }
 0xa84   :  { %7707 = vmatprep.subr.bf16.mxu1 %v10103_v26 }
 0xa87   :  { %7709 = vmatpush1.bf16.msra.mxu1 %v10106_v36 }
 0xa88   :  { %7711 = vmatprep.subr.bf16.mxu1 %v10109_v25 }
 0xa8b   :  { %7713 = vmatpush1.bf16.msra.mxu1 %v10112_v27 }
 0xa8c   :  { %7715 = vmatprep.subr.bf16.mxu1 %v8424_v8 }
 0xa8f   :  { %7717 = vmatpush1.bf16.msra.mxu1 %v8426_v9 }
 0xa90   :  { %7719 = vmatprep.subr.bf16.mxu1 %v8427_v11 }
 0xa93   :  { %7721 = vmatpush1.bf16.msra.mxu1 %v8429_v14 }
 0xa94   :  { %7723 = vmatprep.subr.bf16.mxu1 %v8430_v52 }
 0xa97   :  { %7725 = vmatpush1.bf16.msra.mxu1 %v8432_v1 }
 0xa98   :  { %7727 = vmatprep.subr.bf16.mxu1 %v8433_v54 }
 0xa9b   :  { %7729 = vmatpush1.bf16.msra.mxu1 %v8435_v56 }
 0xa9c   :  { %7158 = vmatprep.subr.bf16.mxu1 %v8463_v45  ;;  %v8444_v45 = vld [vmem:[#allocation10 + $0x34] ss:$12 sps:$4 sm:$0xff]  }
 0xb31   :  { %v3619_v29 = vpop.f32.mrb[32].mxu1 }
 0xb32   :  { %v7734_v33 = vadd.f32 %v3619_v29, %v3016_v17  ;;  %v3621_v37 = vpop.f32.mrb[33].mxu1 }
 0xb33   :  { %v7735_v39 = vadd.f32 %v3621_v37, %v3020_v28  ;;  %v3623_v42 = vpop.f32.mrb[34].mxu1 }
 0xb34   :  { %v10148_v44 = vmax.f32 %v7734_v33, 0.0  ;;  %v3624_v46 = vpop.f32.mrb[35].mxu1  ;;  %v3917_v42 = vld [vmem:[#allocation26] sm:$0x3] }
 0xb35   :  { %v10150_v48 = vmax.f32 %v7735_v39, 0.0  ;;  %v3922_v46 = vrot.slane %v3917_v42, %v9988_v6 }
 0xb36   :  { %v3724_v21 = vrot.slane %v10148_v44, 4  ;;  %v3736_v23 = vmul.f32 %v10148_v44, %v10148_v44 }
 0xb37   :  { %v3730_v26 = vrot.slane %v10150_v48, 4  ;;  %v3737_v36 = vmul.f32 %v10150_v48, %v10150_v48 }
 0xb38   :  { %v3725_v25 = vadd.f32 %v3724_v21, %v10148_v44  ;;  %v3738_v27 = vrot.slane %v3736_v23, 4  ;;  %v3926_v21 = vrot.slane %v3917_v42, %v9999_v19  ;;  %v8502_v42 = vld [vmem:[#allocation10 + $0x184] ss:$12 sps:$4 sm:$0xff]  }
 0xb39   :  { %v3731_v15 = vadd.f32 %v3730_v26, %v10150_v48  ;;  %v3744_v40 = vrot.slane %v3737_v36, 4 }
 0xb3a   :  { %v3726_v50 = vrot.slane %v3725_v25, 2  ;;  %v3739_v51 = vadd.f32 %v3738_v27, %v3736_v23 }
 0xb3b   :  { %v3732_v53 = vrot.slane %v3731_v15, 2  ;;  %v3745_v62 = vadd.f32 %v3744_v40, %v3737_v36 }
 0xb3c   :  { %v3727_v2 = vadd.f32 %v3726_v50, %v3725_v25  ;;  %v3740_v55 = vrot.slane %v3739_v51, 2  ;;  %v3941_v25 = vld [vmem:[#allocation28] sm:$0x3] }
 0xb3d   :  { %v3733_v59 = vadd.f32 %v3732_v53, %v3731_v15  ;;  %v3746_v16 = vrot.slane %v3745_v62, 2  ;;  %v3946_v53 = vrot.slane %v3941_v25, %v9988_v6 }
 0xb3e   :  { %v3728_v13 = vrot.slane %v3727_v2, 1  ;;  %v3741_v18 = vadd.f32 %v3740_v55, %v3739_v51  ;;  %v3950_v55 = vrot.slane %v3941_v25, %v9999_v19  ;;  %v8500_v25 = vld [vmem:[#allocation10 + $0x180] ss:$12 sps:$4 sm:$0xff]  }
 0xb3f   :  { %v3734_v58 = vrot.slane %v3733_v59, 1  ;;  %v3747_v20 = vadd.f32 %v3746_v16, %v3745_v62 }
 0xb40   :  { %v3742_v24 = vrot.slane %v3741_v18, 1  ;;  %v3729_v38 = vadd.f32 %v3728_v13, %v3727_v2 }
 0xb41   :  { %v3735_v32 = vadd.f32 %v3734_v58, %v3733_v59  ;;  %v3748_v35 = vrot.slane %v3747_v20, 1 }
 0xb42   :  { %v3743_v43 = vadd.f32 %v3742_v24, %v3741_v18 }
 0xb43   :  { %3814 = vmatprep.mubr.f32.mxu0 %v3735_v32  ;;  %v3749_v41 = vadd.f32 %v3748_v35, %v3747_v20  ;;  %v8438_v32 = vld [vmem:[#allocation10 + $0x4] ss:$12 sps:$4 sm:$0xff]  }
 0xb44   :  { %3815 = vmatmul.mubr.f32.vlgmr.msra.gmra.mrb[44].mxu0 %v3729_v38  ;;  %v4060_v35 = vld [vmem:[#allocation16 + $0x8] sm:$0x7]  ;;  %v8436_v38 = vld [vmem:[#allocation10] ss:$12 sps:$4 sm:$0xff]  }
 0xb45   :  { %3888 = vmatprep.mubr.f32.mxu1 %v3749_v41  ;;  %4000 = vmatprep.mubr.bf16.mxu0 %v10352_v3  ;;  %v8441_v41 = vld [vmem:[#allocation10 + $0x1c] ss:$12 sps:$4 sm:$0xff]  }
 0xb46   :  { %3889 = vmatmul.mubr.f32.vlgmr.msra.gmra.mrb[36].mxu1 %v3743_v43  ;;  %v8439_v43 = vld [vmem:[#allocation10 + $0x18] ss:$12 sps:$4 sm:$0xff]  }
 0xb47   :  { %7159 = vmatpush3.bf16.msra.mxu1 %v8464_v47  ;;  %v8442_v47 = vld [vmem:[#allocation10 + $0x30] ss:$12 sps:$4 sm:$0xff]  }
 0xb48   :  { %7160 = vmatprep.subr.bf16.mxu1 %v8468_v49  ;;  %v8447_v49 = vld [vmem:[#allocation10 + $0x4c] ss:$12 sps:$4 sm:$0xff]  }
 0xb4b   :  { %7161 = vmatpush3.bf16.msra.mxu1 %v8469_v22  ;;  %v8445_v22 = vld [vmem:[#allocation10 + $0x48] ss:$12 sps:$4 sm:$0xff]  }
 0xb4c   :  { %7162 = vmatprep.subr.bf16.mxu1 %v8473_v60  ;;  %v8450_v60 = vld [vmem:[#allocation10 + $0x64] ss:$12 sps:$4 sm:$0xff]  }
 0xb4f   :  { %7163 = vmatpush3.bf16.msra.mxu1 %v8474_v30  ;;  %v8448_v30 = vld [vmem:[#allocation10 + $0x60] ss:$12 sps:$4 sm:$0xff]  }
 0xb50   :  { %7164 = vmatprep.subr.bf16.mxu1 %v8478_v31  ;;  %v8453_v31 = vld [vmem:[#allocation10 + $0x7c] ss:$12 sps:$4 sm:$0xff]  }
 0xb53   :  { %7165 = vmatpush3.bf16.msra.mxu1 %v8479_v34  ;;  %v8451_v34 = vld [vmem:[#allocation10 + $0x78] ss:$12 sps:$4 sm:$0xff]  }
 0xb54   :  { %7166 = vmatprep.subr.bf16.mxu1 %v8483_v61  ;;  %v8456_v61 = vld [vmem:[#allocation10 + $0x94] ss:$12 sps:$4 sm:$0xff]  }
 0xb57   :  { %7167 = vmatpush3.bf16.msra.mxu1 %v8484_v63  ;;  %v8454_v63 = vld [vmem:[#allocation10 + $0x90] ss:$12 sps:$4 sm:$0xff]  }
 0xb58   :  { %7168 = vmatprep.subr.bf16.mxu1 %v8488_v0  ;;  %v8459_v0 = vld [vmem:[#allocation10 + $0xac] ss:$12 sps:$4 sm:$0xff]  }
 0xb5b   :  { %7169 = vmatpush3.bf16.msra.mxu1 %v8489_v4  ;;  %v8457_v4 = vld [vmem:[#allocation10 + $0xa8] ss:$12 sps:$4 sm:$0xff]  }
 0xb5c   :  { %7170 = vmatprep.subr.bf16.mxu1 %v8493_v7  ;;  %v8462_v7 = vld [vmem:[#allocation10 + $0xc4] ss:$12 sps:$4 sm:$0xff]  }
 0xb5f   :  { %7171 = vmatpush3.bf16.msra.mxu1 %v8494_v10  ;;  %v8460_v10 = vld [vmem:[#allocation10 + $0xc0] ss:$12 sps:$4 sm:$0xff]  }
 0xc17   :  { %v3816_v12 = vpop.f32.mrb[44].mxu0 }
 0xc18   :  { %v3822_v8 = vmul.f32 0.03125, %v3816_v12  ;;  %v3818_v9 = vpop.f32.mrb[45].mxu0  ;;  %v8467_v12 = vld [vmem:[#allocation10 + $0xdc] ss:$12 sps:$4 sm:$0xff]  }
 0xc19   :  { %v3823_v11 = vmul.f32 0.03125, %v3818_v9  ;;  %v3890_v14 = vpop.f32.mrb[36].mxu1  ;;  %v8472_v9 = vld [vmem:[#allocation10 + $0xf4] ss:$12 sps:$4 sm:$0xff]  }
 0xc1a   :  { %v3897_v52 = vmul.f32 %v3822_v8, %v3822_v8  ;;  %v3895_v1 = vmul.f32 0.03125, %v3890_v14  ;;  %v3892_v54 = vpop.f32.mrb[37].mxu1  ;;  %v3910_v23 = vrot.slane %v3822_v8, %v9988_v6  ;;  %v8465_v8 = vld [vmem:[#allocation10 + $0xd8] ss:$12 sps:$4 sm:$0xff]  }
 0xc1b   :  { %v3898_v56 = vmul.f32 %v3823_v11, %v3823_v11  ;;  %v3896_v57 = vmul.f32 0.03125, %v3892_v54  ;;  %v3914_v36 = vrot.slane %v3823_v11, %v9988_v6  ;;  %v8470_v11 = vld [vmem:[#allocation10 + $0xf0] ss:$12 sps:$4 sm:$0xff]   ;;  %v8477_v14 = vld [vmem:[#allocation10 + $0x10c] ss:$12 sps:$4 sm:$0xff]  }
 0xc1c   :  { %v3899_v17 = vsub.f32 %v3895_v1, %v3897_v52  ;;  %v3915_v50 = vsub.f32 %v10148_v44, %v3910_v23  ;;  %v3957_v44 = vld [vmem:[#allocation16] sm:$0x7]  ;;  %v8482_v1 = vld [vmem:[#allocation10 + $0x124] ss:$12 sps:$4 sm:$0xff]   ;;  %v8480_v54 = vld [vmem:[#allocation10 + $0x120] ss:$12 sps:$4 sm:$0xff]  }
 0xc1d   :  { %v3900_v28 = vsub.f32 %v3896_v57, %v3898_v56  ;;  %v3916_v62 = vsub.f32 %v10150_v48, %v3914_v36  ;;  %v4012_v48 = vld [vmem:[#allocation16 + $0x4] sm:$0x7]  ;;  %v8475_v52 = vld [vmem:[#allocation10 + $0x108] ss:$12 sps:$4 sm:$0xff]   ;;  %v8485_v57 = vld [vmem:[#allocation10 + $0x138] ss:$12 sps:$4 sm:$0xff]  }
 0xc1e   :  { %v3901_v29 = vmax.f32 %v3899_v17, 0.0  ;;  %v8487_v56 = vld [vmem:[#allocation10 + $0x13c] ss:$12 sps:$4 sm:$0xff]   ;;  %v8492_v17 = vld [vmem:[#allocation10 + $0x154] ss:$12 sps:$4 sm:$0xff]  }
 0xc1f   :  { %v3902_v33 = vmax.f32 %v3900_v28, 0.0  ;;  %v8490_v28 = vld [vmem:[#allocation10 + $0x150] ss:$12 sps:$4 sm:$0xff]  }
 0xc20   :  { %v3903_v37 = vadd.f32 1e-05, %v3901_v29  ;;  %v8497_v29 = vld [vmem:[#allocation10 + $0x16c] ss:$12 sps:$4 sm:$0xff]  }
 0xc21   :  { %v3904_v39 = vadd.f32 1e-05, %v3902_v33  ;;  %v8498_v33 = vld [vmem:[#allocation10 + $0x170] ss:$12 sps:$4 sm:$0xff]  }
 0xc22   :  { %8712 = vrsqrt.f32 %v3903_v37  ;;  %v8495_v37 = vld [vmem:[#allocation10 + $0x168] ss:$12 sps:$4 sm:$0xff]   ;;  %7172 = vmatprep.subr.bf16.mxu1 %v8498_v33 }
 0xc23   :  { %8714 = vrsqrt.f32 %v3904_v39  ;;  %v8499_v39 = vld [vmem:[#allocation10 + $0xb0] ss:$12 sps:$4 sm:$0xff]   ;;  %v8552_v33 = vld [vmem:[#allocation10 + $0x274] ss:$12 sps:$4 sm:$0xff]  }
 0xc24   :  { %7173 = vmatpush3.bf16.msra.mxu1 %v8499_v39  ;;  %v8550_v39 = vld [vmem:[#allocation10 + $0x270] ss:$12 sps:$4 sm:$0xff]  }
 0xc2c   :  { %v8713_v26 = vpop.eup %8712 }
 0xc2d   :  { %v8715_v27 = vpop.eup %8714  ;;  %v3929_v15 = vmul.f32 %v8713_v26, %v3922_v46  ;;  %v8503_v46 = vld [vmem:[#allocation10 + $0x248] ss:$12 sps:$4 sm:$0xff]  }
 0xc2e   :  { %v3930_v40 = vmul.f32 %v8715_v27, %v3926_v21  ;;  %7180 = vmatprep.subr.bf16.mxu1 %v8503_v46  ;;  %v8504_v27 = vld [vmem:[#allocation10 + $0x188] ss:$12 sps:$4 sm:$0xff]   ;;  %v8557_v46 = vld [vmem:[#allocation10 + $0x28c] ss:$12 sps:$4 sm:$0xff]  }
 0xc2f   :  { %v3934_v51 = vrot.slane %v3929_v15, %v9988_v6 }
 0xc30   :  { %v3938_v2 = vrot.slane %v3930_v40, %v9988_v6 }
 0xc31   :  { %v3939_v59 = vmul.f32 %v3934_v51, %v3915_v50  ;;  %v8507_v50 = vld [vmem:[#allocation10 + $0x19c] ss:$12 sps:$4 sm:$0xff]   ;;  %v8508_v51 = vld [vmem:[#allocation10 + $0x260] ss:$12 sps:$4 sm:$0xff]  }
 0xc32   :  { %v3940_v16 = vmul.f32 %v3938_v2, %v3916_v62  ;;  %v8509_v62 = vld [vmem:[#allocation10 + $0x1a0] ss:$12 sps:$4 sm:$0xff]  }
 0xc33   :  { %v3953_v13 = vadd.f32 %v3946_v53, %v3939_v59  ;;  %v8505_v53 = vld [vmem:[#allocation10 + $0x198] ss:$12 sps:$4 sm:$0xff]   ;;  %v8512_v2 = vld [vmem:[#allocation10 + $0x1b4] ss:$12 sps:$4 sm:$0xff]  }
 0xc34   :  { %v3954_v18 = vadd.f32 %v3950_v55, %v3940_v16  ;;  %v8513_v55 = vld [vmem:[#allocation10 + $0x278] ss:$12 sps:$4 sm:$0xff]  }
 0xc35   :  { %v3955_v58 = vpack.c.bf16 %v3953_v13, %v3953_v13  ;;  %v8510_v13 = vld [vmem:[#allocation10 + $0x1b0] ss:$12 sps:$4 sm:$0xff]  }
 0xc36   :  { %v3956_v20 = vpack.c.bf16 %v3954_v18, %v3954_v18  ;;  %v8514_v18 = vld [vmem:[#allocation10 + $0x1b8] ss:$12 sps:$4 sm:$0xff]  }
 0xc37   :  { %v3963_v24 = vsel %vm400_vm1, %v3955_v58, 0 }
 0xc38   :  { %6849 = vmatprep.subr.msk.bf16.mxu0 %vm400_vm1, %v3956_v20 }
 0xc39   :  { %3969 = vmatpush1.bf16.msra.mxu0 %v3963_v24 }
 0xc3a   :  { %6851 = vmatprep.subr.msk.bf16.mxu0 %vm400_vm1, %v3956_v20 }
 0xc3c   :  { %6850 = vmatmul.mubr.msk.bf16.vlgmr.msra.gmra.mrb[48].mxu0 %vm3958_vm9, %v3957_v44  ;;  %v8518_v44 = vld [vmem:[#allocation10 + $0x290] ss:$12 sps:$4 sm:$0xff]  }
 0xc3d   :  { %4017 = vmatpush1.bf16.msra.mxu0 %v3963_v24  ;;  %4048 = vmatprep.mubr.bf16.mxu0 %v10352_v3 }
 0xc3e   :  { %6853 = vmatprep.subr.msk.bf16.mxu0 %vm400_vm1, %v3956_v20 }
 0xc44   :  { %6852 = vmatmul.mubr.msk.bf16.vlgmr.msra.gmra.mrb[52].mxu0 %vm3958_vm9, %v4012_v48 }
 0xc45   :  { %4065 = vmatpush1.bf16.msra.mxu0 %v3963_v24  ;;  %4096 = vmatprep.mubr.bf16.mxu0 %v10352_v3  ;;  %v8517_v24 = vld [vmem:[#allocation10 + $0x1cc] ss:$12 sps:$4 sm:$0xff]  }
 0xc46   :  { %5084 = vmatprep.subr.bf16.mxu0 %v8438_v32  ;;  %v8515_v32 = vld [vmem:[#allocation10 + $0x1c8] ss:$12 sps:$4 sm:$0xff]  }
 0xc4c   :  { %6854 = vmatmul.mubr.msk.bf16.vlgmr.msra.gmra.mrb[56].mxu0 %vm3958_vm9, %v4060_v35  ;;  %v8519_v35 = vld [vmem:[#allocation10 + $0x1d0] ss:$12 sps:$4 sm:$0xff]  }
 0xc4d   :  { %5085 = vmatpush1.bf16.msra.mxu0 %v8436_v38  ;;  %v8522_v38 = vld [vmem:[#allocation10 + $0x1e4] ss:$12 sps:$4 sm:$0xff]  }
 0xc4e   :  { %5086 = vmatprep.subr.bf16.mxu0 %v8441_v41  ;;  %v8523_v41 = vld [vmem:[#allocation10 + $0x2a8] ss:$12 sps:$4 sm:$0xff]  }
 0xc51   :  { %5087 = vmatpush1.bf16.msra.mxu0 %v8439_v43 }
 0xc52   :  { %5088 = vmatprep.subr.bf16.mxu0 %v8444_v45 }
 0xc55   :  { %5089 = vmatpush1.bf16.msra.mxu0 %v8442_v47  ;;  %v8520_v47 = vld [vmem:[#allocation10 + $0x1e0] ss:$12 sps:$4 sm:$0xff]  }
 0xc56   :  { %5090 = vmatprep.subr.bf16.mxu0 %v8447_v49  ;;  %v8524_v49 = vld [vmem:[#allocation10 + $0x1e8] ss:$12 sps:$4 sm:$0xff]  }
 0xc59   :  { %5091 = vmatpush1.bf16.msra.mxu0 %v8445_v22 }
 0xc5a   :  { %5092 = vmatprep.subr.bf16.mxu0 %v8450_v60  ;;  %v8527_v60 = vld [vmem:[#allocation10 + $0x1fc] ss:$12 sps:$4 sm:$0xff]  }
 0xc5d   :  { %5093 = vmatpush1.bf16.msra.mxu0 %v8448_v30  ;;  %v8528_v30 = vld [vmem:[#allocation10 + $0x2c0] ss:$12 sps:$4 sm:$0xff]  }
 0xc5e   :  { %5094 = vmatprep.subr.bf16.mxu0 %v8453_v31 }
 0xc61   :  { %5095 = vmatpush1.bf16.msra.mxu0 %v8451_v34  ;;  %v8525_v34 = vld [vmem:[#allocation10 + $0x1f8] ss:$12 sps:$4 sm:$0xff]  }
 0xc62   :  { %5096 = vmatprep.subr.bf16.mxu0 %v8456_v61  ;;  %v8529_v61 = vld [vmem:[#allocation10 + $0x200] ss:$12 sps:$4 sm:$0xff]  }
 0xc65   :  { %5097 = vmatpush1.bf16.msra.mxu0 %v8454_v63  ;;  %v8532_v63 = vld [vmem:[#allocation10 + $0x214] ss:$12 sps:$4 sm:$0xff]  }
 0xc66   :  { %5098 = vmatprep.subr.bf16.mxu0 %v8459_v0  ;;  %v8533_v0 = vld [vmem:[#allocation10 + $0x2d8] ss:$12 sps:$4 sm:$0xff]  }
 0xc69   :  { %5099 = vmatpush1.bf16.msra.mxu0 %v8457_v4  ;;  %v8530_v4 = vld [vmem:[#allocation10 + $0x210] ss:$12 sps:$4 sm:$0xff]  }
 0xc6a   :  { %5100 = vmatprep.subr.bf16.mxu0 %v8462_v7  ;;  %v8534_v7 = vld [vmem:[#allocation10 + $0x218] ss:$12 sps:$4 sm:$0xff]  }
 0xc6d   :  { %5101 = vmatpush1.bf16.msra.mxu0 %v8460_v10  ;;  %v8537_v10 = vld [vmem:[#allocation10 + $0x22c] ss:$12 sps:$4 sm:$0xff]  }
 0xc6e   :  { %5102 = vmatprep.subr.bf16.mxu0 %v8467_v12  ;;  %v8538_v12 = vld [vmem:[#allocation10 + $0x2f0] ss:$12 sps:$4 sm:$0xff]  }
 0xc71   :  { %5103 = vmatpush1.bf16.msra.mxu0 %v8465_v8  ;;  %v8535_v8 = vld [vmem:[#allocation10 + $0x228] ss:$12 sps:$4 sm:$0xff]  }
 0xc72   :  { %5104 = vmatprep.subr.bf16.mxu0 %v8472_v9  ;;  %v8539_v9 = vld [vmem:[#allocation10 + $0x230] ss:$12 sps:$4 sm:$0xff]  }
 0xc75   :  { %5105 = vmatpush1.bf16.msra.mxu0 %v8470_v11  ;;  %v8542_v11 = vld [vmem:[#allocation10 + $0x244] ss:$12 sps:$4 sm:$0xff]  }
 0xc76   :  { %5106 = vmatprep.subr.bf16.mxu0 %v8477_v14  ;;  %v8543_v14 = vld [vmem:[#allocation10 + $0x3c8] ss:$12 sps:$4 sm:$0xff]  }
 0xc79   :  { %5107 = vmatpush1.bf16.msra.mxu0 %v8475_v52 }
 0xc7a   :  { %5108 = vmatprep.subr.bf16.mxu0 %v8482_v1  ;;  %v8540_v1 = vld [vmem:[#allocation10 + $0x240] ss:$12 sps:$4 sm:$0xff]  }
 0xc7d   :  { %5109 = vmatpush1.bf16.msra.mxu0 %v8480_v54  ;;  %v8544_v54 = vld [vmem:[#allocation10 + $0x308] ss:$12 sps:$4 sm:$0xff]  }
 0xc7e   :  { %5110 = vmatprep.subr.bf16.mxu0 %v8487_v56  ;;  %v8547_v56 = vld [vmem:[#allocation10 + $0x25c] ss:$12 sps:$4 sm:$0xff]  }
 0xc81   :  { %5111 = vmatpush1.bf16.msra.mxu0 %v8485_v57  ;;  %v8548_v57 = vld [vmem:[#allocation10 + $0x3e0] ss:$12 sps:$4 sm:$0xff]  }
 0xc82   :  { %5112 = vmatprep.subr.bf16.mxu0 %v8492_v17 }
 0xc85   :  { %5113 = vmatpush1.bf16.msra.mxu0 %v8490_v28  ;;  %v8545_v28 = vld [vmem:[#allocation10 + $0x258] ss:$12 sps:$4 sm:$0xff]  }
 0xc86   :  { %5114 = vmatprep.subr.bf16.mxu0 %v8497_v29  ;;  %v8549_v29 = vld [vmem:[#allocation10 + $0x320] ss:$12 sps:$4 sm:$0xff]  }
 0xc89   :  { %5115 = vmatpush1.bf16.msra.mxu0 %v8495_v37  ;;  %v8553_v37 = vld [vmem:[#allocation10 + $0x3f8] ss:$12 sps:$4 sm:$0xff]  }
 0xc8a   :  { %5125 = vmatprep.subr.bf16.mxu0 %v8502_v42  ;;  %v8554_v42 = vld [vmem:[#allocation10 + $0x338] ss:$12 sps:$4 sm:$0xff]  }
 0xd0f   :  { %v4002_v21 = vpop.f32.mrb[48].mxu0 }
 0xd10   :  { %v4004_v23 = vpop.f32.mrb[49].mxu0  ;;  %v4009_v15 = vpack.c.bf16 %v4002_v21, %v4002_v21  ;;  %v8558_v21 = vld [vmem:[#allocation10 + $0x410] ss:$12 sps:$4 sm:$0xff]  }
 0xd11   :  { %v4010_v26 = vpack.c.bf16 %v4004_v23, %v4004_v23  ;;  %v4006_v36 = vpop.f32.mrb[50].mxu0  ;;  %v8555_v23 = vld [vmem:[#allocation10 + $0x288] ss:$12 sps:$4 sm:$0xff]  }
 0xd12   :  { %v4007_v40 = vpop.f32.mrb[51].mxu0  ;;  %v8562_v36 = vld [vmem:[#allocation10 + $0x2a4] ss:$12 sps:$4 sm:$0xff]  }
 0xd13   :  { %5116 = vmatprep.mubr.bf16.mxu0 %v4010_v26  ;;  %5239 = vmatprep.mubr.bf16.mxu1 %v4010_v26  ;;  %v8559_v26 = vld [vmem:[#allocation10 + $0x350] ss:$12 sps:$4 sm:$0xff]  }
 0xd14   :  { %5117 = vmatmul.mubr.bf16.vlgmr.msra.gmra.mrb[60].mxu0 %v4009_v15  ;;  %5240 = vmatmul.mubr.bf16.vlgmr.msra.gmra.mrb[40].mxu1 %v4009_v15  ;;  %v8564_v15 = vld [vmem:[#allocation10 + $0x368] ss:$12 sps:$4 sm:$0xff]  }
 0xd15   :  { %5126 = vmatpush1.bf16.msra.mxu0 %v8500_v25  ;;  %7181 = vmatpush3.bf16.msra.mxu1 %v8504_v27  ;;  %v8563_v25 = vld [vmem:[#allocation10 + $0x428] ss:$12 sps:$4 sm:$0xff]   ;;  %v8560_v27 = vld [vmem:[#allocation10 + $0x2a0] ss:$12 sps:$4 sm:$0xff]  }
 0xd16   :  { %5127 = vmatprep.subr.bf16.mxu0 %v8507_v50  ;;  %7182 = vmatprep.subr.bf16.mxu1 %v8508_v51  ;;  %v8567_v40 = vld [vmem:[#allocation10 + $0x2bc] ss:$12 sps:$4 sm:$0xff]   ;;  %v8568_v50 = vld [vmem:[#allocation10 + $0x440] ss:$12 sps:$4 sm:$0xff]   ;;  %v8565_v51 = vld [vmem:[#allocation10 + $0x2b8] ss:$12 sps:$4 sm:$0xff]  }
 0xd17   :  { %v4050_v59 = vpop.f32.mrb[52].mxu0 }
 0xd18   :  { %v4052_v16 = vpop.f32.mrb[53].mxu0  ;;  %v10179_v52 = vpack.c.bf16 %v4050_v59, %v4050_v59  ;;  %v8574_v59 = vld [vmem:[#allocation10 + $0x398] ss:$12 sps:$4 sm:$0xff]  }
 0xd19   :  { %5128 = vmatpush1.bf16.msra.mxu0 %v8505_v53  ;;  %7183 = vmatpush3.bf16.msra.mxu1 %v8509_v62  ;;  %v4058_v58 = vpack.c.bf16 %v4052_v16, %v4052_v16  ;;  %v4054_v20 = vpop.f32.mrb[54].mxu0  ;;  %v8569_v53 = vld [vmem:[#allocation10 + $0x380] ss:$12 sps:$4 sm:$0xff]  }
 0xd1a   :  { %5129 = vmatprep.subr.bf16.mxu0 %v8512_v2  ;;  %7184 = vmatprep.subr.bf16.mxu1 %v8513_v55  ;;  %v4055_v48 = vpop.f32.mrb[55].mxu0  ;;  %v8572_v62 = vld [vmem:[#allocation10 + $0x2d4] ss:$12 sps:$4 sm:$0xff]   ;;  %v8573_v2 = vld [vmem:[#allocation10 + $0x458] ss:$12 sps:$4 sm:$0xff]  }
 0xd1b   :  { %5279 = vmatprep.mubr.bf16.mxu1 %v4058_v58  ;;  %5157 = vmatprep.mubr.bf16.mxu0 %v4058_v58  ;;  %v8570_v55 = vld [vmem:[#allocation10 + $0x2d0] ss:$12 sps:$4 sm:$0xff]   ;;  %v8577_v16 = vld [vmem:[#allocation10 + $0x2ec] ss:$12 sps:$4 sm:$0xff]  }
 0xd1c   :  { %v8579_v58 = vld [vmem:[#allocation10 + $0x3b0] ss:$12 sps:$4 sm:$0xff]  }
 0xd1d   :  { %5130 = vmatpush1.bf16.msra.mxu0 %v8510_v13  ;;  %7185 = vmatpush3.bf16.msra.mxu1 %v8514_v18  ;;  %v8578_v13 = vld [vmem:[#allocation10 + $0x470] ss:$12 sps:$4 sm:$0xff]   ;;  %v8575_v18 = vld [vmem:[#allocation10 + $0x2e8] ss:$12 sps:$4 sm:$0xff]  }
 0xd1e   :  { %5131 = vmatprep.subr.bf16.mxu0 %v8517_v24  ;;  %7186 = vmatprep.subr.bf16.mxu1 %v8518_v44  ;;  %v8582_v20 = vld [vmem:[#allocation10 + $0x304] ss:$12 sps:$4 sm:$0xff]   ;;  %v8580_v44 = vld [vmem:[#allocation10 + $0x300] ss:$12 sps:$4 sm:$0xff]   ;;  %v8585_v48 = vld [vmem:[#allocation10 + $0x31c] ss:$12 sps:$4 sm:$0xff]  }
 0xd1f   :  { %v10177_v43 = vpop.f32.mrb[56].mxu0 }
 0xd20   :  { %v4100_v45 = vpop.f32.mrb[57].mxu0  ;;  %v10187_v24 = vpack.c.bf16 %v10177_v43, %v10177_v43  ;;  %v8589_v43 = vld [vmem:[#allocation10 + $0x348] ss:$12 sps:$4 sm:$0xff]  }
 0xd21   :  { %5132 = vmatpush1.bf16.msra.mxu0 %v8515_v32  ;;  %7187 = vmatpush3.bf16.msra.mxu1 %v8519_v35  ;;  %v4102_v22 = vpop.f32.mrb[58].mxu0  ;;  %v10181_v17 = vpack.c.bf16 %v4100_v45, %v4100_v45  ;;  %v8583_v32 = vld [vmem:[#allocation10 + $0x318] ss:$12 sps:$4 sm:$0xff]   ;;  %v8588_v35 = vld [vmem:[#allocation10 + $0x334] ss:$12 sps:$4 sm:$0xff]  }
 0xd22   :  { %5133 = vmatprep.subr.bf16.mxu0 %v8522_v38  ;;  %7188 = vmatprep.subr.bf16.mxu1 %v8523_v41  ;;  %v4103_v31 = vpop.f32.mrb[59].mxu0  ;;  %v8586_v38 = vld [vmem:[#allocation10 + $0x330] ss:$12 sps:$4 sm:$0xff]   ;;  %v8591_v41 = vld [vmem:[#allocation10 + $0x34c] ss:$12 sps:$4 sm:$0xff]  }
 0xd23   :  { %v8594_v45 = vld [vmem:[#allocation10 + $0x364] ss:$12 sps:$4 sm:$0xff]   ;;  %v8603_v31 = vld [vmem:[#allocation10 + $0x3ac] ss:$12 sps:$4 sm:$0xff]  }
 0xd24   :  { %v8595_v22 = vld [vmem:[#allocation10 + $0x378] ss:$12 sps:$4 sm:$0xff]  }
 0xd25   :  { %5134 = vmatpush1.bf16.msra.mxu0 %v8520_v47  ;;  %7189 = vmatpush3.bf16.msra.mxu1 %v8524_v49  ;;  %v8592_v47 = vld [vmem:[#allocation10 + $0x360] ss:$12 sps:$4 sm:$0xff]   ;;  %v8597_v49 = vld [vmem:[#allocation10 + $0x37c] ss:$12 sps:$4 sm:$0xff]  }
 0xd26   :  { %5135 = vmatprep.subr.bf16.mxu0 %v8527_v60  ;;  %7190 = vmatprep.subr.bf16.mxu1 %v8528_v30  ;;  %v8600_v60 = vld [vmem:[#allocation10 + $0x394] ss:$12 sps:$4 sm:$0xff]   ;;  %v8598_v30 = vld [vmem:[#allocation10 + $0x390] ss:$12 sps:$4 sm:$0xff]  }
 0xd29   :  { %5136 = vmatpush1.bf16.msra.mxu0 %v8525_v34  ;;  %7191 = vmatpush3.bf16.msra.mxu1 %v8529_v61  ;;  %v8601_v34 = vld [vmem:[#allocation10 + $0x3a8] ss:$12 sps:$4 sm:$0xff]   ;;  %v8606_v61 = vld [vmem:[#allocation10 + $0x3c4] ss:$12 sps:$4 sm:$0xff]  }
 0xd2a   :  { %5137 = vmatprep.subr.bf16.mxu0 %v8532_v63  ;;  %7192 = vmatprep.subr.bf16.mxu1 %v8533_v0  ;;  %v8604_v63 = vld [vmem:[#allocation10 + $0x3c0] ss:$12 sps:$4 sm:$0xff]   ;;  %v8609_v0 = vld [vmem:[#allocation10 + $0x3dc] ss:$12 sps:$4 sm:$0xff]  }
 0xd2d   :  { %5138 = vmatpush1.bf16.msra.mxu0 %v8530_v4  ;;  %7193 = vmatpush3.bf16.msra.mxu1 %v8534_v7  ;;  %v8607_v4 = vld [vmem:[#allocation10 + $0x3d8] ss:$12 sps:$4 sm:$0xff]   ;;  %v8612_v7 = vld [vmem:[#allocation10 + $0x3f4] ss:$12 sps:$4 sm:$0xff]  }
 0xd2e   :  { %5139 = vmatprep.subr.bf16.mxu0 %v8537_v10  ;;  %7194 = vmatprep.subr.bf16.mxu1 %v8538_v12  ;;  %v8610_v10 = vld [vmem:[#allocation10 + $0x3f0] ss:$12 sps:$4 sm:$0xff]   ;;  %v8615_v12 = vld [vmem:[#allocation10 + $0x40c] ss:$12 sps:$4 sm:$0xff]  }
 0xd31   :  { %5140 = vmatpush1.bf16.msra.mxu0 %v8535_v8  ;;  %7195 = vmatpush3.bf16.msra.mxu1 %v8539_v9  ;;  %v8613_v8 = vld [vmem:[#allocation10 + $0x408] ss:$12 sps:$4 sm:$0xff]   ;;  %v8618_v9 = vld [vmem:[#allocation10 + $0x424] ss:$12 sps:$4 sm:$0xff]  }
 0xd32   :  { %5141 = vmatprep.subr.bf16.mxu0 %v8542_v11  ;;  %7202 = vmatprep.subr.bf16.mxu1 %v8543_v14  ;;  %v8616_v11 = vld [vmem:[#allocation10 + $0x420] ss:$12 sps:$4 sm:$0xff]   ;;  %v8621_v14 = vld [vmem:[#allocation10 + $0x43c] ss:$12 sps:$4 sm:$0xff]  }
 0xd34   :  { %5280 = vmatmul.mubr.bf16.vlgmr.msra.gmra.mrb[44].mxu1 %v10179_v52 }
 0xd35   :  { %5142 = vmatpush1.bf16.msra.mxu0 %v8540_v1  ;;  %7203 = vmatpush3.bf16.msra.mxu1 %v8544_v54  ;;  %v8624_v1 = vld [vmem:[#allocation10 + $0x454] ss:$12 sps:$4 sm:$0xff]   ;;  %v8622_v54 = vld [vmem:[#allocation10 + $0x450] ss:$12 sps:$4 sm:$0xff]  }
 0xd36   :  { %5143 = vmatprep.subr.bf16.mxu0 %v8547_v56  ;;  %7204 = vmatprep.subr.bf16.mxu1 %v8548_v57  ;;  %v8627_v56 = vld [vmem:[#allocation10 + $0x46c] ss:$12 sps:$4 sm:$0xff]   ;;  %v8625_v57 = vld [vmem:[#allocation10 + $0x468] ss:$12 sps:$4 sm:$0xff]  }
 0xd37   :  { %5319 = vmatprep.mubr.bf16.mxu1 %v10181_v17 }
 0xd39   :  { %5144 = vmatpush1.bf16.msra.mxu0 %v8545_v28  ;;  %7205 = vmatpush3.bf16.msra.mxu1 %v8549_v29 }
 0xd3a   :  { %5145 = vmatprep.subr.bf16.mxu0 %v8552_v33  ;;  %7206 = vmatprep.subr.bf16.mxu1 %v8553_v37 }
 0xd3d   :  { %5146 = vmatpush1.bf16.msra.mxu0 %v8550_v39  ;;  %7207 = vmatpush3.bf16.msra.mxu1 %v8554_v42  ;;  %v4311_v39 = vsub.s32 2, %v9985_v5  ;;  %v4299_v42 = vld [vmem:[%s10353_s12] sm:$0x7] }
 0xd3e   :  { %5147 = vmatprep.subr.bf16.mxu0 %v8557_v46  ;;  %7208 = vmatprep.subr.bf16.mxu1 %v8558_v21  ;;  %v4304_v5 = vrot.slane %v4299_v42, %v9988_v6  ;;  %v5333_v6 = vld [vmem:[#allocation29] sm:$0x1] }
 0xd3f   :  { %v4312_v46 = vrot.slane %v4299_v42, %v4311_v39  ;;  %v8667_v39 = vld [vmem:[#allocation31 + $0x128] sm:$0xff]  }
 0xd41   :  { %5148 = vmatpush1.bf16.msra.mxu0 %v8555_v23  ;;  %7209 = vmatpush3.bf16.msra.mxu1 %v8559_v26 }
 0xd42   :  { %5149 = vmatprep.subr.bf16.mxu0 %v8562_v36  ;;  %7210 = vmatprep.subr.bf16.mxu1 %v8563_v25 }
 0xd45   :  { %5150 = vmatpush1.bf16.msra.mxu0 %v8560_v27  ;;  %7211 = vmatpush3.bf16.msra.mxu1 %v8564_v15 }
 0xd46   :  { %5151 = vmatprep.subr.bf16.mxu0 %v8567_v40  ;;  %7212 = vmatprep.subr.bf16.mxu1 %v8568_v50 }
 0xd49   :  { %5152 = vmatpush1.bf16.msra.mxu0 %v8565_v51  ;;  %7213 = vmatpush3.bf16.msra.mxu1 %v8569_v53 }
 0xd4a   :  { %5153 = vmatprep.subr.bf16.mxu0 %v8572_v62  ;;  %7214 = vmatprep.subr.bf16.mxu1 %v8573_v2 }
 0xd4d   :  { %5154 = vmatpush1.bf16.msra.mxu0 %v8570_v55  ;;  %7215 = vmatpush3.bf16.msra.mxu1 %v8574_v59  ;;  %v4308_v55 = vrot.slane %v4299_v42, %v9999_v19  ;;  %v9254_v19 = vmov 0.0   ;;  %v8670_v42 = vld [vmem:[#allocation31 + $0x170] sm:$0xff]  }
 0xd4e   :  { %5155 = vmatprep.subr.bf16.mxu0 %v8577_v16  ;;  %7216 = vmatprep.subr.bf16.mxu1 %v8578_v13 }
 0xd51   :  { %5156 = vmatpush1.bf16.msra.mxu0 %v8575_v18  ;;  %7217 = vmatpush3.bf16.msra.mxu1 %v8579_v58 }
 0xd52   :  { %5166 = vmatprep.subr.bf16.mxu0 %v8582_v20 }
 0xd54   :  { %5320 = vmatmul.mubr.bf16.vlgmr.msra.gmra.mrb[48].mxu1 %v10187_v24  ;;  %5158 = vmatmul.mubr.bf16.vlgmr.msra.gmra.mrb[60].mxu0 %v10179_v52  ;;  %v8619_v52 = vld [vmem:[#allocation10 + $0x438] ss:$12 sps:$4 sm:$0xff]  }
 0xd55   :  { %5167 = vmatpush1.bf16.msra.mxu0 %v8580_v44  ;;  %5198 = vmatprep.mubr.bf16.mxu0 %v10181_v17 }
 0xd56   :  { %5168 = vmatprep.subr.bf16.mxu0 %v8585_v48  ;;  %5380 = vmatprep.mubr.bf16.mxu1 %v10352_v3 }
 0xd59   :  { %5169 = vmatpush1.bf16.msra.mxu0 %v8583_v32 }
 0xd5a   :  { %5170 = vmatprep.subr.bf16.mxu0 %v8588_v35 }
 0xd5d   :  { %5171 = vmatpush1.bf16.msra.mxu0 %v8586_v38 }
 0xd5e   :  { %5172 = vmatprep.subr.bf16.mxu0 %v8591_v41 }
 0xd61   :  { %5173 = vmatpush1.bf16.msra.mxu0 %v8589_v43 }
 0xd62   :  { %5174 = vmatprep.subr.bf16.mxu0 %v8594_v45  ;;  %v5433_v45 = vld [vmem:[#allocation29 + $0x1] sm:$0x1] }
 0xd65   :  { %5175 = vmatpush1.bf16.msra.mxu0 %v8592_v47  ;;  %v5522_v47 = vld [vmem:[#allocation29 + $0x2] sm:$0x1] }
 0xd66   :  { %5176 = vmatprep.subr.bf16.mxu0 %v8597_v49  ;;  %v8628_v49 = vld [vmem:[#allocation31 + $0x40] sm:$0xff]  }
 0xd69   :  { %5177 = vmatpush1.bf16.msra.mxu0 %v8595_v22  ;;  %v8629_v22 = vld [vmem:[#allocation31] sm:$0xff]  }
 0xd6a   :  { %5178 = vmatprep.subr.bf16.mxu0 %v8600_v60  ;;  %v8630_v60 = vld [vmem:[#allocation31 + $0x48] sm:$0xff]  }
 0xd6d   :  { %5179 = vmatpush1.bf16.msra.mxu0 %v8598_v30  ;;  %v8631_v30 = vld [vmem:[#allocation31 + $0x8] sm:$0xff]  }
 0xd6e   :  { %5180 = vmatprep.subr.bf16.mxu0 %v8603_v31  ;;  %v8632_v31 = vld [vmem:[#allocation31 + $0x50] sm:$0xff]  }
 0xd71   :  { %5181 = vmatpush1.bf16.msra.mxu0 %v8601_v34  ;;  %v8634_v34 = vld [vmem:[#allocation31 + $0x58] sm:$0xff]  }
 0xd72   :  { %5182 = vmatprep.subr.bf16.mxu0 %v8606_v61  ;;  %v8635_v61 = vld [vmem:[#allocation31 + $0x18] sm:$0xff]  }
 0xd75   :  { %5183 = vmatpush1.bf16.msra.mxu0 %v8604_v63  ;;  %v8636_v63 = vld [vmem:[#allocation31 + $0x60] sm:$0xff]  }
 0xd76   :  { %5184 = vmatprep.subr.bf16.mxu0 %v8609_v0  ;;  %v8637_v0 = vld [vmem:[#allocation31 + $0x20] sm:$0xff]  }
 0xd79   :  { %5185 = vmatpush1.bf16.msra.mxu0 %v8607_v4  ;;  %v8638_v4 = vld [vmem:[#allocation31 + $0x68] sm:$0xff]  }
 0xd7a   :  { %5186 = vmatprep.subr.bf16.mxu0 %v8612_v7  ;;  %v8639_v7 = vld [vmem:[#allocation31 + $0x28] sm:$0xff]  }
 0xd7d   :  { %5187 = vmatpush1.bf16.msra.mxu0 %v8610_v10  ;;  %v8640_v10 = vld [vmem:[#allocation31 + $0x70] sm:$0xff]  }
 0xd7e   :  { %5188 = vmatprep.subr.bf16.mxu0 %v8615_v12  ;;  %v8641_v12 = vld [vmem:[#allocation31 + $0x30] sm:$0xff]  }
 0xd81   :  { %5189 = vmatpush1.bf16.msra.mxu0 %v8613_v8  ;;  %v8646_v8 = vld [vmem:[#allocation31 + $0x140] sm:$0xff]  }
 0xd82   :  { %5190 = vmatprep.subr.bf16.mxu0 %v8618_v9  ;;  %v8647_v9 = vld [vmem:[#allocation31 + $0x100] sm:$0xff]  }
 0xd85   :  { %5191 = vmatpush1.bf16.msra.mxu0 %v8616_v11  ;;  %v8642_v11 = vld [vmem:[#allocation31 + $0x78] sm:$0xff]  }
 0xd86   :  { %5192 = vmatprep.subr.bf16.mxu0 %v8621_v14  ;;  %v8643_v14 = vld [vmem:[#allocation31 + $0x38] sm:$0xff]  }
 0xd89   :  { %5193 = vmatpush1.bf16.msra.mxu0 %v8619_v52  ;;  %v8650_v52 = vld [vmem:[#allocation31 + $0x148] sm:$0xff]  }
 0xd8a   :  { %5194 = vmatprep.subr.bf16.mxu0 %v8624_v1  ;;  %v8651_v1 = vld [vmem:[#allocation31 + $0x108] sm:$0xff]  }
 0xd8d   :  { %5195 = vmatpush1.bf16.msra.mxu0 %v8622_v54  ;;  %v8644_v54 = vld [vmem:[#allocation31 + $0xc0] sm:$0xff]  }
 0xd8e   :  { %5196 = vmatprep.subr.bf16.mxu0 %v8627_v56  ;;  %v8654_v56 = vld [vmem:[#allocation31 + $0x150] sm:$0xff]  }
 0xd91   :  { %5197 = vmatpush1.bf16.msra.mxu0 %v8625_v57  ;;  %v8655_v57 = vld [vmem:[#allocation31 + $0x110] sm:$0xff]  }
 0xd92   :  { %7274 = vmatprep.subr.bf16.mxu0 %v8646_v8 }
 0xd94   :  { %5199 = vmatmul.mubr.bf16.vlgmr.msra.gmra.mrb[60].mxu0 %v10187_v24 }
 0xd95   :  { %7275 = vmatpush3.bf16.msra.mxu0 %v8647_v9  ;;  %v8678_v9 = vld [vmem:[#allocation31 + $0x1c8] sm:$0xff]  }
 0xd96   :  { %7276 = vmatprep.subr.bf16.mxu0 %v8650_v52  ;;  %v8689_v52 = vld [vmem:[#allocation31 + $0x218] sm:$0xff]  }
 0xd99   :  { %7277 = vmatpush3.bf16.msra.mxu0 %v8651_v1  ;;  %v8679_v1 = vld [vmem:[#allocation31 + $0x188] sm:$0xff]  }
 0xd9a   :  { %7278 = vmatprep.subr.bf16.mxu0 %v8654_v56 }
 0xd9d   :  { %7279 = vmatpush3.bf16.msra.mxu0 %v8655_v57  ;;  %v8692_v57 = vld [vmem:[#allocation31 + $0x220] sm:$0xff]  }
 0xde7   :  { %v7174_v17 = vpop.f32.mrb[40].mxu1 }
 0xde8   :  { %v7175_v28 = vpop.f32.mrb[41].mxu1 }
 0xde9   :  { %v7176_v29 = vadd.f32 %v7175_v28, %v7174_v17  ;;  %v7177_v33 = vpop.f32.mrb[42].mxu1  ;;  %v8658_v17 = vld [vmem:[#allocation31 + $0x158] sm:$0xff]  }
 0xdea   :  { %v7178_v37 = vpop.f32.mrb[43].mxu1  ;;  %v8659_v28 = vld [vmem:[#allocation31 + $0x118] sm:$0xff]   ;;  %7280 = vmatprep.subr.bf16.mxu0 %v8658_v17  ;;  %v8663_v33 = vld [vmem:[#allocation31 + $0x120] sm:$0xff]  }
 0xdeb   :  { %v5242_v26 = vadd.f32 %v7176_v29, %v4312_v46  ;;  %7281 = vmatpush3.bf16.msra.mxu0 %v8659_v28  ;;  %v8662_v29 = vld [vmem:[#allocation31 + $0x160] sm:$0xff]   ;;  %v8666_v37 = vld [vmem:[#allocation31 + $0x168] sm:$0xff]   ;;  %v8671_v46 = vld [vmem:[#allocation31 + $0x130] sm:$0xff]  }
 0xdec   :  { %7282 = vmatprep.subr.bf16.mxu0 %v8662_v29  ;;  %v8682_v28 = vld [vmem:[#allocation31 + $0x190] sm:$0xff]  }
 0xdef   :  { %7283 = vmatpush3.bf16.msra.mxu0 %v8663_v33  ;;  %v8684_v33 = vld [vmem:[#allocation31 + $0x1d8] sm:$0xff]  }
 0xdf0   :  { %7284 = vmatprep.subr.bf16.mxu0 %v8666_v37 }
 0xdf3   :  { %7285 = vmatpush3.bf16.msra.mxu0 %v8667_v39  ;;  %v8695_v39 = vld [vmem:[#allocation31 + $0x228] sm:$0xff]  }
 0xdf4   :  { %7286 = vmatprep.subr.bf16.mxu0 %v8670_v42  ;;  %v8685_v42 = vld [vmem:[#allocation31 + $0x198] sm:$0xff]  }
 0xdf7   :  { %7287 = vmatpush3.bf16.msra.mxu0 %v8671_v46  ;;  %v8687_v46 = vld [vmem:[#allocation31 + $0x1e0] sm:$0xff]  }
 0xe07   :  { %v7196_v21 = vpop.f32.mrb[44].mxu1 }
 0xe08   :  { %v7197_v23 = vpop.f32.mrb[45].mxu1 }
 0xe09   :  { %v7198_v36 = vadd.f32 %v7197_v23, %v7196_v21  ;;  %v7199_v25 = vpop.f32.mrb[46].mxu1  ;;  %v8674_v21 = vld [vmem:[#allocation31 + $0x178] sm:$0xff]  }
 0xe0a   :  { %v7200_v27 = vpop.f32.mrb[47].mxu1  ;;  %v8675_v23 = vld [vmem:[#allocation31 + $0x138] sm:$0xff]   ;;  %7288 = vmatprep.subr.bf16.mxu0 %v8674_v21  ;;  %v8698_v21 = vld [vmem:[#allocation31 + $0x230] sm:$0xff]  }
 0xe0b   :  { %v5282_v15 = vadd.f32 %v7198_v36, %v5242_v26  ;;  %7289 = vmatpush3.bf16.msra.mxu0 %v8675_v23  ;;  %v8645_v27 = vld [vmem:[#allocation31 + $0x80] sm:$0xff]  }
 0xe0c   :  { %7434 = vmatprep.subr.bf16.mxu0 %v9254_v19  ;;  %v8688_v23 = vld [vmem:[#allocation31 + $0x1a0] sm:$0xff]  }
 0xe27   :  { %v7218_v40 = vpop.f32.mrb[48].mxu1 }
 0xe28   :  { %v7219_v50 = vpop.f32.mrb[49].mxu1 }
 0xe29   :  { %v7220_v51 = vadd.f32 %v7219_v50, %v7218_v40  ;;  %v7221_v53 = vpop.f32.mrb[50].mxu1  ;;  %v8648_v50 = vld [vmem:[#allocation31 + $0xc8] sm:$0xff]  }
 0xe2a   :  { %v7222_v62 = vpop.f32.mrb[51].mxu1  ;;  %v8649_v53 = vld [vmem:[#allocation31 + $0x88] sm:$0xff]  }
 0xe2b   :  { %v5322_v2 = vadd.f32 %v7220_v51, %v5282_v15  ;;  %v8652_v62 = vld [vmem:[#allocation31 + $0xd0] sm:$0xff]  }
 0xe2d   :  { %v5329_v44 = vmax.f32 %v5322_v2, 0.0 }
 0xe2f   :  { %v5332_v41 = vpack.c.bf16 %v5329_v44, %v5329_v44 }
 0xe31   :  { %v5346_v43 = vsel %vm5338_vm10, %v5332_v41, 0  ;;  %v8665_v41 = vld [vmem:[#allocation31 + $0xa8] sm:$0xff]  }
 0xe67   :  { %v5200_v59 = vpop.f32.mrb[60].mxu0 }
 0xe68   :  { %v7736_v16 = vadd.f32 %v5200_v59, %v4304_v5  ;;  %v5202_v13 = vpop.f32.mrb[61].mxu0 }
 0xe69   :  { %v7737_v18 = vadd.f32 %v5202_v13, %v4308_v55  ;;  %v5204_v58 = vpop.f32.mrb[62].mxu0  ;;  %v8653_v55 = vld [vmem:[#allocation31 + $0x90] sm:$0xff]  }
 0xe6a   :  { %v5327_v20 = vmax.f32 %v7736_v16, 0.0  ;;  %v5205_v24 = vpop.f32.mrb[63].mxu0  ;;  %v8656_v16 = vld [vmem:[#allocation31 + $0xd8] sm:$0xff]   ;;  %v8660_v58 = vld [vmem:[#allocation31 + $0xe0] sm:$0xff]  }
 0xe6b   :  { %v5328_v48 = vmax.f32 %v7737_v18, 0.0  ;;  %v8657_v18 = vld [vmem:[#allocation31 + $0x98] sm:$0xff]  }
 0xe6c   :  { %v5330_v32 = vpack.c.bf16 %v5327_v20, %v5327_v20 }
 0xe6d   :  { %v5331_v35 = vpack.c.bf16 %v5328_v48, %v5328_v48  ;;  %v8661_v48 = vld [vmem:[#allocation31 + $0xa0] sm:$0xff]  }
 0xe6e   :  { %v5340_v38 = vsel %vm5338_vm10, %v5330_v32, 0 }
 0xe6f   :  { %6999 = vmatprep.subr.msk.bf16.mxu1 %vm5338_vm10, %v5331_v35 }
 0xe70   :  { %5349 = vmatpush1.bf16.msra.mxu1 %v5340_v38 }
 0xe71   :  { %7416 = vmatprep.subr.bf16.mxu1 %v9254_v19 }
 0xe73   :  { %7000 = vmatmul.mubr.msk.bf16.vlgmr.msra.gmra.mrb[52].mxu1 %vm5334_vm11, %v5333_v6 }
 0xe74   :  { %7417 = vmatpush3.bf16.msra.mxu1 %v5346_v43  ;;  %7418 = vmatprep.mubr.msk.bf16.mxu1 %vm9255_vm12, %v9254_v19 }
 0xe75   :  { %7002 = vmatprep.subr.msk.bf16.mxu1 %vm5338_vm10, %v5331_v35 }
 0xe7b   :  { %7419 = vmatmul.mubr.msk.bf16.vlgmr.msra.gmra.mrb[56].mxu1 %vm5334_vm11, %v5333_v6  ;;  %v8668_v6 = vld [vmem:[#allocation31 + $0xf0] sm:$0xff]  }
 0xe7c   :  { %5438 = vmatpush1.bf16.msra.mxu1 %v5340_v38  ;;  %5469 = vmatprep.mubr.bf16.mxu1 %v10352_v3 }
 0xe7d   :  { %7422 = vmatprep.subr.bf16.mxu1 %v9254_v19 }
 0xe83   :  { %7003 = vmatmul.mubr.msk.bf16.vlgmr.msra.gmra.mrb[60].mxu1 %vm5334_vm11, %v5433_v45 }
 0xe84   :  { %7423 = vmatpush3.bf16.msra.mxu1 %v5346_v43  ;;  %7424 = vmatprep.mubr.msk.bf16.mxu1 %vm9255_vm12, %v9254_v19 }
 0xe85   :  { %7005 = vmatprep.subr.msk.bf16.mxu1 %vm5338_vm10, %v5331_v35  ;;  %v8664_v35 = vld [vmem:[#allocation31 + $0xe8] sm:$0xff]  }
 0xe8b   :  { %7425 = vmatmul.mubr.msk.bf16.vlgmr.msra.gmra.mrb[64].mxu1 %vm5334_vm11, %v5433_v45 }
 0xe8c   :  { %5527 = vmatpush1.bf16.msra.mxu1 %v5340_v38  ;;  %5558 = vmatprep.mubr.bf16.mxu1 %v10352_v3  ;;  %v8633_v3 = vld [vmem:[#allocation31 + $0x10] sm:$0xff]  }
 0xe8d   :  { %7428 = vmatprep.subr.bf16.mxu1 %v9254_v19 }
 0xe93   :  { %7006 = vmatmul.mubr.msk.bf16.vlgmr.msra.gmra.mrb[68].mxu1 %vm5334_vm11, %v5522_v47 }
 0xe94   :  { %7429 = vmatpush3.bf16.msra.mxu1 %v5346_v43  ;;  %7430 = vmatprep.mubr.msk.bf16.mxu1 %vm9255_vm12, %v9254_v19 }
 0xe95   :  { %7230 = vmatprep.subr.bf16.mxu1 %v8628_v49  ;;  %v8680_v49 = vld [vmem:[#allocation31 + $0x200] sm:$0xff]  }
 0xe9b   :  { %7431 = vmatmul.mubr.msk.bf16.vlgmr.msra.gmra.mrb[72].mxu1 %vm5334_vm11, %v5522_v47 }
 0xe9c   :  { %7231 = vmatpush3.bf16.msra.mxu1 %v8629_v22 }
 0xe9d   :  { %7232 = vmatprep.subr.bf16.mxu1 %v8630_v60  ;;  %v8669_v60 = vld [vmem:[#allocation31 + $0xb0] sm:$0xff]  }
 0xea0   :  { %7233 = vmatpush3.bf16.msra.mxu1 %v8631_v30 }
 0xea1   :  { %7234 = vmatprep.subr.bf16.mxu1 %v8632_v31  ;;  %v8672_v31 = vld [vmem:[#allocation31 + $0xf8] sm:$0xff]  }
 0xea4   :  { %7235 = vmatpush3.bf16.msra.mxu1 %v8633_v3 }
 0xea5   :  { %7236 = vmatprep.subr.bf16.mxu1 %v8634_v34  ;;  %v8683_v34 = vld [vmem:[#allocation31 + $0x208] sm:$0xff]  }
 0xea8   :  { %7237 = vmatpush3.bf16.msra.mxu1 %v8635_v61  ;;  %v8673_v61 = vld [vmem:[#allocation31 + $0xb8] sm:$0xff]  }
 0xea9   :  { %7238 = vmatprep.subr.bf16.mxu1 %v8636_v63  ;;  %v8676_v63 = vld [vmem:[#allocation31 + $0x1c0] sm:$0xff]  }
 0xeac   :  { %7239 = vmatpush3.bf16.msra.mxu1 %v8637_v0 }
 0xead   :  { %7240 = vmatprep.subr.bf16.mxu1 %v8638_v4  ;;  %v8686_v4 = vld [vmem:[#allocation31 + $0x210] sm:$0xff]  }
 0xeb0   :  { %7241 = vmatpush3.bf16.msra.mxu1 %v8639_v7 }
 0xeb1   :  { %7242 = vmatprep.subr.bf16.mxu1 %v8640_v10  ;;  %v8677_v10 = vld [vmem:[#allocation31 + $0x180] sm:$0xff]  }
 0xeb4   :  { %7243 = vmatpush3.bf16.msra.mxu1 %v8641_v12 }
 0xeb5   :  { %7244 = vmatprep.subr.bf16.mxu1 %v8642_v11 }
 0xeb8   :  { %7245 = vmatpush3.bf16.msra.mxu1 %v8643_v14 }
 0xeb9   :  { %7252 = vmatprep.subr.bf16.mxu1 %v8644_v54  ;;  %v8681_v54 = vld [vmem:[#allocation31 + $0x1d0] sm:$0xff]  }
 0xf46   :  { %v5382_v26 = vpop.f32.mrb[52].mxu1 }
 0xf47   :  { %v5384_v36 = vpop.f32.mrb[53].mxu1  ;;  %v5429_v40 = vpack.c.bf16 %v5382_v26, %v5382_v26  ;;  %v8690_v26 = vld [vmem:[#allocation31 + $0x1e8] sm:$0xff]  }
 0xf48   :  { %v5430_v25 = vpack.c.bf16 %v5384_v36, %v5384_v36  ;;  %v5386_v15 = vpop.f32.mrb[54].mxu1  ;;  %v8699_v36 = vld [vmem:[#allocation31 + $0x238] sm:$0xff]  }
 0xf49   :  { %v5387_v51 = vpop.f32.mrb[55].mxu1 }
 0xf4a   :  { %6225 = vmatprep.mubr.bf16.mxu1 %v5430_v25  ;;  %v8691_v25 = vld [vmem:[#allocation31 + $0x1a8] sm:$0xff]   ;;  %v8697_v51 = vld [vmem:[#allocation31 + $0x1b8] sm:$0xff]  }
 0xf4b   :  { %6226 = vmatmul.mubr.bf16.vlgmr.msra.gmra.mrb[76].mxu1 %v5429_v40  ;;  %v8694_v40 = vld [vmem:[#allocation31 + $0x1b0] sm:$0xff]  }
 0xf4c   :  { %7253 = vmatpush3.bf16.msra.mxu1 %v8645_v27  ;;  %v8693_v27 = vld [vmem:[#allocation31 + $0x1f0] sm:$0xff]  }
 0xf4d   :  { %7254 = vmatprep.subr.bf16.mxu1 %v8648_v50  ;;  %v8696_v50 = vld [vmem:[#allocation31 + $0x1f8] sm:$0xff]  }
 0xf4e   :  { %v5423_v2 = vpop.f32.mrb[56].mxu1 }
 0xf4f   :  { %v7420_v5 = vpop.f32.mrb[57].mxu1  ;;  %v5431_v8 = vpack.c.bf16 %v5423_v2, %v5423_v2  ;;  %v8701_v2 = vld [vmem:[%s10354_s25 + $0x8] sm:$0xff]  }
 0xf50   :  { %7255 = vmatpush3.bf16.msra.mxu1 %v8649_v53  ;;  %v5426_v59 = vpop.f32.mrb[58].mxu1  ;;  %v8702_v5 = vld [vmem:[%s10354_s25 + $0x10] sm:$0xff]  }
 0xf51   :  { %7256 = vmatprep.subr.bf16.mxu1 %v8652_v62  ;;  %v7421_v13 = vpop.f32.mrb[59].mxu1  ;;  %v8700_v62 = vld [vmem:[%s10354_s25] sm:$0xff]  }
 0xf52   :  { %v8704_v59 = vld [vmem:[%s10354_s25 + $0x20] sm:$0xff]   ;;  %v8706_v13 = vld [vmem:[%s10354_s25 + $0x30] sm:$0xff]  }
 0xf54   :  { %7257 = vmatpush3.bf16.msra.mxu1 %v8653_v55  ;;  %v8703_v55 = vld [vmem:[%s10354_s25 + $0x18] sm:$0xff]  }
 0xf55   :  { %7258 = vmatprep.subr.bf16.mxu1 %v8656_v16  ;;  %v8705_v16 = vld [vmem:[%s10354_s25 + $0x28] sm:$0xff]  }
 0xf56   :  { %v5471_v20 = vpop.f32.mrb[60].mxu1 }
 0xf57   :  { %v5518_v24 = vpack.c.bf16 %v5471_v20, %v5471_v20  ;;  %v5473_v44 = vpop.f32.mrb[61].mxu1 }
 0xf58   :  { %7259 = vmatpush3.bf16.msra.mxu1 %v8657_v18  ;;  %v5475_v32 = vpop.f32.mrb[62].mxu1  ;;  %v5519_v43 = vpack.c.bf16 %v5473_v44, %v5473_v44  ;;  %v8707_v18 = vld [vmem:[%s10354_s25 + $0x38] sm:$0xff]  }
 0xf59   :  { %7260 = vmatprep.subr.bf16.mxu1 %v8660_v58  ;;  %v5476_v38 = vpop.f32.mrb[63].mxu1  ;;  %6265 = vmatprep.mubr.bf16.mxu1 %v5518_v24 }
 0xf5c   :  { %7261 = vmatpush3.bf16.msra.mxu1 %v8661_v48 }
 0xf5d   :  { %7262 = vmatprep.subr.bf16.mxu1 %v8664_v35 }
 0xf5e   :  { %v5512_v45 = vpop.f32.mrb[64].mxu1 }
 0xf5f   :  { %v5520_v47 = vpack.c.bf16 %v5512_v45, %v5512_v45  ;;  %v7426_v22 = vpop.f32.mrb[65].mxu1 }
 0xf60   :  { %7263 = vmatpush3.bf16.msra.mxu1 %v8665_v41  ;;  %v5515_v30 = vpop.f32.mrb[66].mxu1 }
 0xf61   :  { %7264 = vmatprep.subr.bf16.mxu1 %v8668_v6  ;;  %6305 = vmatprep.mubr.bf16.mxu0 %v5520_v47  ;;  %v7427_v3 = vpop.f32.mrb[67].mxu1 }
 0xf62   :  { %6306 = vmatmul.mubr.bf16.vlgmr.msra.gmra.mrb[64].mxu0 %v5519_v43  ;;  %v7008_v43 = vld [vmem:[#allocation32] ss:$0 sm:$0xff] }
 0xf63   :  { %7435 = vmatpush3.bf16.msra.mxu0 %v8680_v49  ;;  %7450 = vmatprep.mubr.msk.bf16.mxu0 %vm9255_vm12, %v9254_v19 }
 0xf64   :  { %7265 = vmatpush3.bf16.msra.mxu1 %v8669_v60  ;;  %7436 = vmatprep.subr.bf16.mxu0 %v9254_v19 }
 0xf65   :  { %7266 = vmatprep.subr.bf16.mxu1 %v8672_v31 }
 0xf66   :  { %v10226_v0 = vpop.f32.mrb[68].mxu1 }
 0xf67   :  { %7437 = vmatpush3.bf16.msra.mxu0 %v8683_v34  ;;  %v5562_v7 = vpop.f32.mrb[69].mxu1  ;;  %v5607_v53 = vpack.c.bf16 %v10226_v0, %v10226_v0 }
 0xf68   :  { %7267 = vmatpush3.bf16.msra.mxu1 %v8673_v61  ;;  %7438 = vmatprep.subr.bf16.mxu0 %v9254_v19  ;;  %v5564_v12 = vpop.f32.mrb[70].mxu1  ;;  %v5608_v11 = vpack.c.bf16 %v5562_v7, %v5562_v7 }
 0xf69   :  { %7296 = vmatprep.subr.bf16.mxu1 %v8676_v63  ;;  %v5565_v14 = vpop.f32.mrb[71].mxu1 }
 0xf6b   :  { %6266 = vmatmul.mubr.bf16.vlgmr.msra.gmra.mrb[80].mxu1 %v5431_v8  ;;  %7439 = vmatpush3.bf16.msra.mxu0 %v8686_v4 }
 0xf6c   :  { %7297 = vmatpush3.bf16.msra.mxu1 %v8677_v10  ;;  %7440 = vmatprep.subr.bf16.mxu0 %v9254_v19 }
 0xf6d   :  { %7298 = vmatprep.subr.bf16.mxu1 %v8678_v9  ;;  %6345 = vmatprep.mubr.bf16.mxu1 %v5608_v11 }
 0xf6e   :  { %v5601_v56 = vpop.f32.mrb[72].mxu1 }
 0xf6f   :  { %7441 = vmatpush3.bf16.msra.mxu0 %v8689_v52  ;;  %v7432_v17 = vpop.f32.mrb[73].mxu1  ;;  %v5609_v15 = vpack.c.bf16 %v5601_v56, %v5601_v56  ;;  %v7081_v52 = vld [vmem:[#allocation34] ss:$0 sm:$0xff] }
 0xf70   :  { %7299 = vmatpush3.bf16.msra.mxu1 %v8679_v1  ;;  %7442 = vmatprep.subr.bf16.mxu0 %v9254_v19  ;;  %v5604_v29 = vpop.f32.mrb[74].mxu1 }
 0xf71   :  { %7300 = vmatprep.subr.bf16.mxu1 %v8681_v54  ;;  %v7433_v37 = vpop.f32.mrb[75].mxu1 }
 0xf73   :  { %7443 = vmatpush3.bf16.msra.mxu0 %v8692_v57 }
 0xf74   :  { %7301 = vmatpush3.bf16.msra.mxu1 %v8682_v28  ;;  %7444 = vmatprep.subr.bf16.mxu0 %v9254_v19 }
 0xf75   :  { %7302 = vmatprep.subr.bf16.mxu1 %v8684_v33 }
 0xf77   :  { %7445 = vmatpush3.bf16.msra.mxu0 %v8695_v39 }
 0xf78   :  { %7303 = vmatpush3.bf16.msra.mxu1 %v8685_v42  ;;  %7446 = vmatprep.subr.bf16.mxu0 %v9254_v19 }
 0xf79   :  { %7304 = vmatprep.subr.bf16.mxu1 %v8687_v46 }
 0xf7b   :  { %7447 = vmatpush3.bf16.msra.mxu0 %v8698_v21 }
 0xf7c   :  { %7305 = vmatpush3.bf16.msra.mxu1 %v8688_v23  ;;  %7448 = vmatprep.subr.bf16.mxu0 %v9254_v19 }
 0xf7d   :  { %7306 = vmatprep.subr.bf16.mxu1 %v8690_v26 }
 0xf7f   :  { %7449 = vmatpush3.bf16.msra.mxu0 %v8699_v36 }
 0xf80   :  { %7307 = vmatpush3.bf16.msra.mxu1 %v8691_v25 }
 0xf81   :  { %7308 = vmatprep.subr.bf16.mxu1 %v8693_v27 }
 0xf82   :  { %7451 = vmatmul.mubr.bf16.vlgmr.msra.gmra.mrb[68].mxu0 %v5609_v15 }
 0xf84   :  { %7309 = vmatpush3.bf16.msra.mxu1 %v8694_v40 }
 0xf85   :  { %7310 = vmatprep.subr.bf16.mxu1 %v8696_v50 }
 0xf88   :  { %7311 = vmatpush3.bf16.msra.mxu1 %v8697_v51 }
 0xf89   :  { %7454 = vmatprep.subr.bf16.mxu1 %v9254_v19 }
 0xf8b   :  { %6346 = vmatmul.mubr.bf16.vlgmr.msra.gmra.mrb[84].mxu1 %v5607_v53 }
 0xf8c   :  { %7470 = vmatprep.mubr.msk.bf16.mxu1 %vm9255_vm12, %v9254_v19  ;;  %7455 = vmatpush3.bf16.msra.mxu1 %v8700_v62 }
 0xf8d   :  { %7456 = vmatprep.subr.bf16.mxu1 %v9254_v19 }
 0xf90   :  { %7457 = vmatpush3.bf16.msra.mxu1 %v8701_v2 }
 0xf91   :  { %7458 = vmatprep.subr.bf16.mxu1 %v9254_v19 }
 0xf94   :  { %7459 = vmatpush3.bf16.msra.mxu1 %v8702_v5 }
 0xf95   :  { %7460 = vmatprep.subr.bf16.mxu1 %v9254_v19 }
 0xf98   :  { %7461 = vmatpush3.bf16.msra.mxu1 %v8703_v55 }
 0xf99   :  { %7462 = vmatprep.subr.bf16.mxu1 %v9254_v19 }
 0xf9c   :  { %7463 = vmatpush3.bf16.msra.mxu1 %v8704_v59 }
 0xf9d   :  { %7464 = vmatprep.subr.bf16.mxu1 %v9254_v19 }
 0xfa0   :  { %7465 = vmatpush3.bf16.msra.mxu1 %v8705_v16 }
 0xfa1   :  { %7466 = vmatprep.subr.bf16.mxu1 %v9254_v19 }
 0xfa4   :  { %7467 = vmatpush3.bf16.msra.mxu1 %v8706_v13 }
 0xfa5   :  { %7468 = vmatprep.subr.bf16.mxu1 %v9254_v19 }
 0xfa8   :  { %7469 = vmatpush3.bf16.msra.mxu1 %v8707_v18 }
0x101e   :  { %v7246_v58 = vpop.f32.mrb[76].mxu1 }
0x101f   :  { %v7247_v20 = vpop.f32.mrb[77].mxu1 }
0x1020   :  { %v7248_v24 = vadd.f32 %v7247_v20, %v7246_v58  ;;  %v7249_v44 = vpop.f32.mrb[78].mxu1 }
0x1021   :  { %v7250_v48 = vpop.f32.mrb[79].mxu1 }
0x1022   :  { %v6228_v49 = vadd.f32 %v7248_v24, %v7008_v43 }
0x1035   :  { %v7290_v32 = vpop.f32.mrb[64].mxu0 }
0x1036   :  { %v7291_v35 = vpop.f32.mrb[65].mxu0 }
0x1037   :  { %v7292_v38 = vadd.f32 %v7291_v35, %v7290_v32  ;;  %v7293_v41 = vpop.f32.mrb[66].mxu0 }
0x1038   :  { %v7294_v6 = vpop.f32.mrb[67].mxu0 }
0x103e   :  { %v7268_v45 = vpop.f32.mrb[80].mxu1 }
0x103f   :  { %v7269_v47 = vpop.f32.mrb[81].mxu1 }
0x1040   :  { %v7270_v19 = vadd.f32 %v7269_v47, %v7268_v45  ;;  %v7271_v22 = vpop.f32.mrb[82].mxu1 }
0x1041   :  { %v7272_v60 = vpop.f32.mrb[83].mxu1 }
0x1042   :  { %v6268_v30 = vadd.f32 %v7270_v19, %v6228_v49 }
0x1044   :  { %v6308_v31 = vadd.f32 %v7292_v38, %v6268_v30 }
0x1055   :  { %v6387_v3 = vpop.f32.mrb[68].mxu0 }
0x1056   :  { %v7452_v34 = vpop.f32.mrb[69].mxu0 }
0x1057   :  { %v6390_v61 = vpop.f32.mrb[70].mxu0 }
0x1058   :  { %v7453_v63 = vpop.f32.mrb[71].mxu0 }
0x105e   :  { %v7312_v0 = vpop.f32.mrb[84].mxu1 }
0x105f   :  { %v7313_v4 = vpop.f32.mrb[85].mxu1 }
0x1060   :  { %v7314_v7 = vadd.f32 %v7313_v4, %v7312_v0  ;;  %v7315_v10 = vpop.f32.mrb[86].mxu1 }
0x1061   :  { %v7316_v12 = vpop.f32.mrb[87].mxu1 }
0x1062   :  { %v6348_v8 = vadd.f32 %v7314_v7, %v6308_v31 }
0x1064   :  { %v6388_v9 = vadd.f32 %v6387_v3, %v6348_v8 }
0x1066   :  { %v6393_v11 = vmax.f32 %v6388_v9, 0.0 }
0x1068   :  { %v6394_v14 = vpack.c.bf16 %v6393_v11, %v6393_v11 }
0x106a   :  { %7471 = vmatmul.mubr.bf16.vlgmr.msra.gmra.mrb[88].mxu1 %v6394_v14 }
0x113d   :  { %v6500_v1 = vpop.f32.mrb[88].mxu1 }
0x113e   :  { %v6501_v54 = vadd.f32 %v7081_v52, %v6500_v1  ;;  %v7472_v56 = vpop.f32.mrb[89].mxu1 }
0x113f   :  { %v6503_v57 = vpop.f32.mrb[90].mxu1 }
0x1140   :  { %v7473_v17 = vpop.f32.mrb[91].mxu1  ;;  %6507 = vst.msk [vmem:[#allocation35] sm:$0x3] %vm6506_vm13, %v6501_v54 }
0x1141   :  { %9189 = shalt.err (!%p9186_p4)
}
0x1142   :  { %s10355_s28 = sld [smem:[#allocation61_spill]] }
0x1148   :  { %s9190_s24 = scalar_lea.hbm %s10355_s28, 32 }
0x1149   :  { %p9191_p5 = scmp.ne.s32.totalorder %s10355_s28, %s9190_s24  ;;  %p9194_p6 = scmp.lt.u32.totalorder %s9190_s24, %s10355_s28 }
0x114b   :  { %p9196_p7 = pnand %p9194_p6, %p9191_p5 }
0x114d   :  { %9199 = shalt.err (!%p9196_p7)
}
0x114e   :  { %6517 = dma.vmem_to_hbm [thread:$0]  %s6515_s20, 32, %s10355_s28, [#allocation4]  }
0x114f   :  { %9222 = dma.done.wait [#allocation4], 32  }
0x1150   :  { %9223 = vsyncadd [#allocation4], 4294967264 }
0x1151   :  { %6521 = vsyncpa [#allocation3], 1 }
0x1152   :  { %6522 = vsyncpa [#allocation6], 1 }
0x1153   :  { %6523 = vsyncpa [#allocation9], 1 }
0x1154   :  { %6524 = vsyncpa [#allocation12], 1 }
0x1155   :  { %6525 = vsyncpa [#allocation15], 1 }
0x1156   :  { %6526 = vsyncpa [#allocation18], 1 }
0x1157   :  { %6527 = vsyncpa [#allocation21], 1 }
0x1158   :  { %6528 = vsyncpa [#allocation24], 1 }
0x1159   :  { %6529 = vsyncpa [#allocation27], 1 }
0x115a   :  { %6530 = vsyncpa [#allocation30], 1 }
0x115b   :  { %6531 = vsyncpa [#allocation33], 1 }
0x115c   :  { %6532 = vsyncpa [#allocation4], 1 }

</bundles_post_ra>
